<compile_context>
chip_gen: v6e
topology: v6e:2x2x1
jax: 0.10.0
libtpu: 0.0.40
codegen_flags: <defaults>
</compile_context>

<pallas_src>
import functools

import jax
import jax.numpy as jnp
import numpy as np
from jax.experimental import pallas as pl
from jax.experimental.pallas import tpu as pltpu

_PACK = 32  # logical rows per kernel row: 32 * 60 = 1920 = 15 * 128 lanes


def _round_up(v, m):
    return (v + m - 1) // m * m


def _cdiv(a, b):
    return (a + b - 1) // b


@functools.lru_cache(maxsize=None)
def _build_tables(input_size, freq_range, keep_raw, pack):
    """Block-diagonal frequency matrix + per-column metadata rows (numpy, cached).

    Returns (W[K, OW], cls_row[1, OW], phase_row[1, OW], enc_width_per_row) where
    K = pack*C, OW = pack*ew.  Per logical row the column order is
    [x (if keep_raw)] ++ [sin args, freq-major/coord-minor] ++ [cos args], matching
    the PyTorch reshape([-1]) flattening exactly.
    """
    C = input_size
    log_freqs = np.arange(freq_range[0], freq_range[1], dtype=np.float32)
    freqs = np.exp2(log_freqs).astype(np.float32)  # exact powers of two
    n_freq = int(freqs.shape[0])
    F = n_freq * C
    ew = (C if keep_raw else 0) + 2 * F

    blk = np.zeros((C, ew), dtype=np.float32)
    cls = np.zeros((ew,), dtype=np.float32)    # 0 = raw, 1 = sin, 2 = cos
    phase = np.zeros((ew,), dtype=np.float32)  # 0 = sin, pi/2 = cos, -1 = raw marker
    off = 0
    if keep_raw:
        blk[:, :C] = np.eye(C, dtype=np.float32)
        phase[:C] = -1.0
        off = C
    for half, (code, ph) in enumerate(((1.0, 0.0), (2.0, np.pi / 2))):
        for f in range(n_freq):
            for c in range(C):
                j = off + half * F + f * C + c
                blk[c, j] = freqs[f]
                cls[j] = code
                phase[j] = np.float32(ph)

    K, OW = pack * C, pack * ew
    W = np.zeros((K, OW), dtype=np.float32)
    for p in range(pack):
        W[p * C:(p + 1) * C, p * ew:(p + 1) * ew] = blk
    cls_row = np.tile(cls, pack).reshape(1, OW)
    phase_row = np.tile(phase, pack).reshape(1, OW)
    return W, cls_row, phase_row, ew


def _pe_kernel(x_ref, w_ref, sel_ref, o_ref, *, keep_raw, fold):
    # x_ref: (tm, K), w_ref: (K, OW), sel_ref: (1, OW), o_ref: (tm, OW)
    pre = jnp.dot(x_ref[...], w_ref[...], preferred_element_type=jnp.float32)
    sel = sel_ref[...]  # broadcast (1, OW) -> (tm, OW) inside the where
    if fold:
        # sel is the phase row: out = sin(arg + phase); raw columns (phase = -1)
        # are passed through untouched.
        enc = jnp.sin(pre + sel)
        out = jnp.where(sel < 0.0, pre, enc) if keep_raw else enc
    else:
        # Exact mode: sel is the class row (0 raw, 1 sin, 2 cos).
        out = jnp.where(sel == 1.0, jnp.sin(pre), jnp.cos(pre))
        if keep_raw:
            out = jnp.where(sel == 0.0, pre, out)
    o_ref[...] = out.astype(o_ref.dtype)


def positional_encode(x, *, input_size=3, freq_range=(-2, 8), keep_raw=False,
                      row_tile=16384, fold_cos_into_sin=False,
                      out_dtype=jnp.float32):
    """JAX/Pallas equivalent of PositionalEncoder.forward (sin & cos encodings)."""
    assert x.shape[-1] == input_size
    x = x.astype(jnp.float32)
    W_np, cls_row, phase_row, ew = _build_tables(
        input_size, tuple(freq_range), bool(keep_raw), _PACK)
    C = input_size
    K = _PACK * C
    OW = _PACK * ew

    lead_shape = x.shape[:-1]
    M = int(np.prod(lead_shape)) if lead_shape else 1
    x2d = x.reshape(M, C)

    # Pad only to the packing quantum (256 logical rows = 8 packed, sublane-aligned);
    # no padding to a full tile, the grid uses cdiv with a masked partial last block.
    quantum = _PACK * 8
    M_pad = _round_up(max(M, 1), quantum)
    if M_pad != M:
        x2d = jnp.pad(x2d, ((0, M_pad - M), (0, 0)))
    Mp = M_pad // _PACK                      # packed rows (multiple of 8)
    xp = x2d.reshape(Mp, K)                  # free: identical row-major bytes

    # Tile selection (in packed rows). Default 16384 logical rows -> 512 packed rows
    # (~8 MiB of double-buffered blocks + W): fits v7x's 64 MiB VMEM with headroom,
    # big enough to amortize the ~0.35 us/step grid overhead on v5e/v6e.
    row_tile_packed = max(8, _round_up(max(row_tile, _PACK) // _PACK, 8))
    tm = min(row_tile_packed, Mp)
    if Mp >= 32:  # keep >=4 grid steps so both v7x TCs get work and DMA pipelines
        tm = min(tm, _round_up(_cdiv(Mp, 4), 8))
    tm = max(8, tm)
    grid = (_cdiv(Mp, tm),)

    sel_row = phase_row if fold_cos_into_sin else cls_row

    cost = pl.CostEstimate(
        flops=2 * Mp * K * OW,
        transcendentals=Mp * OW * (1 if fold_cos_into_sin else 2),
        bytes_accessed=4 * (Mp * K + K * OW + OW)
        + Mp * OW * jnp.dtype(out_dtype).itemsize,
    )

    kernel = functools.partial(_pe_kernel, keep_raw=bool(keep_raw),
                               fold=bool(fold_cos_into_sin))

    out_p = pl.pallas_call(
        kernel,
        out_shape=jax.ShapeDtypeStruct((Mp, OW), out_dtype),
        grid_spec=pltpu.PrefetchScalarGridSpec(
            num_scalar_prefetch=0,
            grid=grid,
            in_specs=[
                pl.BlockSpec((tm, K), lambda i: (i, 0)),
                pl.BlockSpec((K, OW), lambda i: (0, 0)),
                pl.BlockSpec((1, OW), lambda i: (0, 0)),
            ],
            out_specs=pl.BlockSpec((tm, OW), lambda i: (i, 0)),
        ),
        compiler_params=pltpu.CompilerParams(
            dimension_semantics=("parallel",),
            vmem_limit_bytes=64 * 1024 * 1024,
        ),
        cost_estimate=cost,
    )(xp, jnp.asarray(W_np), jnp.asarray(sel_row))

    out2d = out_p.reshape(M_pad, ew)         # free reshape (same row-major bytes)
    if M_pad != M:
        out2d = out2d[:M]
    return out2d.reshape(*lead_shape, ew)


def _reference(x, *, freq_range=(-2, 8), keep_raw=False):
    log_freqs = jnp.arange(freq_range[0], freq_range[1], dtype=jnp.float32)
    freqs = jnp.power(2.0, log_freqs).reshape(1, 1, -1, 1)
    raw = x[..., None, :]
    pre_f = freqs * raw
    pre_f = pre_f.reshape(*pre_f.shape[:-2], -1)
    parts = [x] if keep_raw else []
    parts += [jnp.sin(pre_f), jnp.cos(pre_f)]
    return jnp.concatenate(parts, axis=-1)


if __name__ == "__main__":
    key = jax.random.PRNGKey(0)
    k1, k2, k3, k4 = jax.random.split(key, 4)

    # Small shape implied by the module: (batch=2, points=8, coords=3) -> (2, 8, 60).
    x = jax.random.normal(k1, (2, 8, 3), dtype=jnp.float32)
    out = jax.block_until_ready(positional_encode(x))
    ref = _reference(x)
    assert out.shape == (2, 8, 60), out.shape
    np.testing.assert_allclose(np.asarray(out), np.asarray(ref), atol=1e-5, rtol=1e-5)

    # Non-aligned row count exercises the pad + final-slice path.
    x2 = jax.random.normal(k2, (3, 7, 3), dtype=jnp.float32)
    out2 = jax.block_until_ready(positional_encode(x2))
    ref2 = _reference(x2)
    assert out2.shape == (3, 7, 60), out2.shape
    np.testing.assert_allclose(np.asarray(out2), np.asarray(ref2), atol=1e-5, rtol=1e-5)

    # keep_raw handled inside the kernel (no wrapper-side concatenate).
    x3 = jax.random.normal(k3, (2, 128, 3), dtype=jnp.float32)
    out3 = jax.block_until_ready(positional_encode(x3, keep_raw=True))
    ref3 = _reference(x3, keep_raw=True)
    assert out3.shape == (2, 128, 63), out3.shape
    np.testing.assert_allclose(np.asarray(out3), np.asarray(ref3), atol=1e-5, rtol=1e-5)

    # Multi-step grid path (no padding, 4 grid steps), still small.
    x4 = jax.random.normal(k4, (1, 2048, 3), dtype=jnp.float32)
    out4 = jax.block_until_ready(positional_encode(x4))
    ref4 = _reference(x4)
    np.testing.assert_allclose(np.asarray(out4), np.asarray(ref4), atol=1e-5, rtol=1e-5)

    # Opt-in perf variants (looser tolerances by design).
    out5 = jax.block_until_ready(positional_encode(x, fold_cos_into_sin=True))
    np.testing.assert_allclose(np.asarray(out5), np.asarray(ref), atol=1e-4, rtol=1e-4)
    out6 = jax.block_until_ready(positional_encode(x, out_dtype=jnp.bfloat16))
    np.testing.assert_allclose(np.asarray(out6, dtype=np.float32), np.asarray(ref),
                               atol=1.5e-2, rtol=1e-2)

    print("KERNEL_OK")
</pallas_src>

<mosaic_0001>
module attributes {stable_mosaic.version = 11 : i64} {
  func.func @_pe_kernel(%arg0: i32, %arg1: memref<8x96xf32, #tpu.memory_space<vmem>>, %arg2: memref<96x1920xf32, #tpu.memory_space<vmem>>, %arg3: memref<1x1920xf32, #tpu.memory_space<vmem>>, %arg4: memref<8x1920xf32, #tpu.memory_space<vmem>>) attributes {dimension_semantics = [#tpu.dimension_semantics<parallel>], iteration_bounds = array<i64: 1>, scalar_prefetch = 0 : i64, scratch_operands = 0 : i64, tpu.core_type = #tpu.core_type<tc>, window_params = [{transform_indices = @transform_0, window_bounds = array<i64: 8, 96>}, {pipeline_mode = #tpu.pipeline_mode<synchronous>, transform_indices = @transform_1, window_bounds = array<i64: 96, 1920>}, {pipeline_mode = #tpu.pipeline_mode<synchronous>, transform_indices = @transform_2, window_bounds = array<i64: 1, 1920>}, {transform_indices = @transform_3, window_bounds = array<i64: 8, 1920>}]} {
    %c0 = arith.constant 0 : index
    %c0_0 = arith.constant 0 : index
    %0 = vector.load %arg1[%c0, %c0_0] : memref<8x96xf32, #tpu.memory_space<vmem>>, vector<8x96xf32>
    %c0_1 = arith.constant 0 : index
    %c0_2 = arith.constant 0 : index
    %1 = vector.load %arg2[%c0_1, %c0_2] : memref<96x1920xf32, #tpu.memory_space<vmem>>, vector<96x1920xf32>
    %cst = arith.constant dense<0.000000e+00> : vector<8x1920xf32>
    %2 = tpu.matmul %0, %1, %cst {dimension_numbers = #tpu.dot_dimension_numbers<[1], [0], [0], [1], [0, 0, 1, 1], [], []>} : vector<8x96xf32>, vector<96x1920xf32>, vector<8x1920xf32> -> vector<8x1920xf32>
    %c0_3 = arith.constant 0 : index
    %c0_4 = arith.constant 0 : index
    %3 = vector.load %arg3[%c0_3, %c0_4] : memref<1x1920xf32, #tpu.memory_space<vmem>>, vector<1x1920xf32>
    %cst_5 = arith.constant 1.000000e+00 : f32
    %4 = vector.broadcast %cst_5 : f32 to vector<1x1920xf32>
    %5 = arith.cmpf oeq, %3, %4 : vector<1x1920xf32>
    %6 = math.sin %2 : vector<8x1920xf32>
    %7 = math.cos %2 : vector<8x1920xf32>
    %8 = vector.shape_cast %5 : vector<1x1920xi1> to vector<1x1920xi1>
    %9 = vector.broadcast %8 : vector<1x1920xi1> to vector<8x1920xi1>
    %10 = arith.select %9, %6, %7 : vector<8x1920xi1>, vector<8x1920xf32>
    %c0_6 = arith.constant 0 : index
    %c0_7 = arith.constant 0 : index
    %11 = vector.load %arg4[%c0_6, %c0_7] : memref<8x1920xf32, #tpu.memory_space<vmem>>, vector<8x1920xf32>
    tpu.vector_store %arg4[%c0_6, %c0_7], %10 {strides = array<i32>} : memref<8x1920xf32, #tpu.memory_space<vmem>>, vector<8x1920xf32>,
    return
  }
  func.func @transform_0(%arg0: i32) -> (i32, i32) {
    %c0_i32 = arith.constant 0 : i32
    %c0_i32_0 = arith.constant 0 : i32
    return %arg0, %c0_i32 : i32, i32
  }
  func.func @transform_1(%arg0: i32) -> (i32, i32) {
    %c0_i32 = arith.constant 0 : i32
    %c0_i32_0 = arith.constant 0 : i32
    %c0_i32_1 = arith.constant 0 : i32
    return %c0_i32, %c0_i32_0 : i32, i32
  }
  func.func @transform_2(%arg0: i32) -> (i32, i32) {
    %c0_i32 = arith.constant 0 : i32
    %c0_i32_0 = arith.constant 0 : i32
    %c0_i32_1 = arith.constant 0 : i32
    return %c0_i32, %c0_i32_0 : i32, i32
  }
  func.func @transform_3(%arg0: i32) -> (i32, i32) {
    %c0_i32 = arith.constant 0 : i32
    %c0_i32_0 = arith.constant 0 : i32
    return %arg0, %c0_i32 : i32, i32
  }
}

</mosaic_0001>

<bundles_post_ra>
// kernel: tpu_custom_call.1
= control target key start
LH: loop header
LB: loop body
LE: loop exit
PB: predicated region body
PF: predicated region fallthrough
CT: control target
= control target key end

     0   :  { %8 = vsyncpa [#allocation3], 0  ;;  %s5982_s0 = inlined_call_operand.hbm [shape: f32[8,96], index: 0, kind: input, shape index: {}]   ;;  %s5983_s1 = inlined_call_operand.hbm [shape: f32[96,1920], index: 1, kind: input, shape index: {}]   ;;  %s5984_s2 = inlined_call_operand.hbm [shape: f32[1,1920], index: 2, kind: input, shape index: {}]   ;;  %s5985_s3 = inlined_call_operand.hbm [shape: f32[8,1920], index: 3, kind: output, shape index: {}]  }
   0x1   :  { %9 = vsyncpa [#allocation6], 0 }
   0x2   :  { %10 = vsyncpa [#allocation4], 0  ;;  %s4425_s12 = smov [#allocation5]  }
   0x3   :  { %s26_s13 = sshll.u32 %s4425_s12, 4  ;;  %s27_s13 = int_to_ptr.vmem [resolvable:$true] %s26_s13 }
   0x4   :  { %s4347_s14 = scalar_lea.vmem %s27_s13, 23040  ;;  %p4352_p1 = scmp.lt.s32.totalorder %s27_s13, %s27_s13 }
   0x5   :  { %p4348_p0 = scmp.ne.s32.totalorder %s27_s13, %s4347_s14  ;;  %p4353_p2 = scmp.lt.s32.totalorder %s4347_s14, %s4347_s14 }
   0x7   :  { %p4354_p3 = por %p4353_p2, %p4352_p1 }
   0x9   :  { %p4355_p4 = pnand %p4354_p3, %p4348_p0 }
   0xb   :  { %4358 = shalt.err (!%p4355_p4)
}
   0xc   :  { %s4426_s15 = smov 1920   ;;  %s4427_s16 = smov 120  }
   0xd   :  { %32 = dma.hbm_to_vmem [thread:$0]  %s5983_s1, 23040, %s27_s13, [#allocation6], %s4426_s15, %s4426_s15, %s4427_s16  }
   0xe   :  { %s4428_s19 = smov [#allocation2]   ;;  %s4429_s21 = smov [#allocation7]  }
   0xf   :  { %s17_s20 = sshll.u32 %s4428_s19, 4  ;;  %s39_s22 = sshll.u32 %s4429_s21, 4  ;;  %s18_s20 = int_to_ptr.vmem [resolvable:$true] %s17_s20  ;;  %s40_s22 = int_to_ptr.vmem [resolvable:$true] %s39_s22 }
  0x10   :  { %s4367_s23 = scalar_lea.vmem %s18_s20, 128  ;;  %p4372_p6 = scmp.lt.s32.totalorder %s18_s20, %s18_s20 }
  0x11   :  { %p4368_p5 = scmp.ne.s32.totalorder %s18_s20, %s4367_s23  ;;  %p4373_p7 = scmp.lt.s32.totalorder %s4367_s23, %s4367_s23 }
  0x13   :  { %p4374_p8 = por %p4373_p7, %p4372_p6 }
  0x15   :  { %p4375_p9 = pnand %p4374_p8, %p4368_p5 }
  0x17   :  { %4378 = shalt.err (!%p4375_p9)
}
  0x18   :  { %20 = dma.hbm_to_vmem [thread:$0]  %s5982_s0, 128, %s18_s20, [#allocation3]  }
  0x19   :  { %s4387_s26 = scalar_lea.vmem %s40_s22, 240  ;;  %s4391_s1 = scalar_lea.vmem %s40_s22, 256 }
  0x1a   :  { %p4388_p10 = scmp.ne.s32.totalorder %s40_s22, %s4387_s26  ;;  %p4392_p11 = scmp.lt.s32.totalorder %s40_s22, %s40_s22 }
  0x1b   :  { %p4393_p12 = scmp.lt.s32.totalorder %s4391_s1, %s4387_s26 }
  0x1d   :  { %p4394_p13 = por %p4393_p12, %p4392_p11 }
  0x1f   :  { %p4395_p0 = pnand %p4394_p13, %p4388_p10 }
  0x21   :  { %4398 = shalt.err (!%p4395_p0)
}
  0x22   :  { %42 = dma.hbm_to_vmem [thread:$0]  %s5984_s2, 240, %s40_s22, [#allocation6]  }
  0x23   :  { %4419 = dma.done.wait [#allocation3], 128  }
  0x24   :  { %4420 = vsyncadd [#allocation3], 4294967168 }
  0x25   :  { %4421 = dma.done.wait [#allocation6], 23280  }
  0x26   :  { %4422 = vsyncadd [#allocation6], 4294944016  ;;  %v4430_v0 = vmov 0.0   ;;  %v219_v1 = vld [vmem:[#allocation5 + $0x530] sm:$0xff]  ;;  %v221_v2 = vld [vmem:[#allocation5 + $0x540] sm:$0xff]  ;;  %vm233_vm0 = vcmask 785408  }
  0x27   :  { %301 = vmatprep.mubr.f32.mxu0 %v4430_v0  ;;  %372 = vmatprep.mubr.f32.mxu1 %v4430_v0  ;;  %v218_v3 = vld [vmem:[#allocation5 + $0x528] sm:$0xff]  ;;  %v220_v4 = vld [vmem:[#allocation5 + $0x538] sm:$0xff]  ;;  %v203_v7 = vld [vmem:[#allocation5 + $0x4b0] sm:$0xff]  ;;  %vm4431_vm1 = vmmov 0   ;;  %s4439_s0 = smov [#allocation8]  }
  0x28   :  { %245 = vmatprep.subr.mxu0 %v219_v1  ;;  %316 = vmatprep.subr.mxu1 %v221_v2  ;;  %v204_v5 = vld [vmem:[#allocation5 + $0x4b8] sm:$0xff]  ;;  %v206_v6 = vld [vmem:[#allocation5 + $0x4c8] sm:$0xff]  ;;  %v205_v8 = vld [vmem:[#allocation5 + $0x4c0] sm:$0xff]  ;;  %s4026_s2 = sshll.u32 %s4439_s0, 4  ;;  %s4027_s2 = int_to_ptr.vmem [resolvable:$true] %s4026_s2 }
  0x29   :  { %246 = vmatpush1.msra.mxu0 %v218_v3  ;;  %317 = vmatpush1.msra.mxu1 %v220_v4  ;;  %v189_v9 = vld [vmem:[#allocation5 + $0x440] sm:$0xff]  ;;  %v191_v10 = vld [vmem:[#allocation5 + $0x450] sm:$0xff]  ;;  %v188_v11 = vld [vmem:[#allocation5 + $0x438] sm:$0xff]  ;;  %s4399_s29 = scalar_lea.vmem %s4027_s2, 1920  ;;  %p4404_p2 = scmp.lt.s32.totalorder %s4027_s2, %s4027_s2 }
  0x2a   :  { %247 = vmatprep.subr.mxu0 %v204_v5  ;;  %318 = vmatprep.subr.mxu1 %v206_v6  ;;  %v190_v12 = vld [vmem:[#allocation5 + $0x448] sm:$0xff]  ;;  %v176_v14 = vld [vmem:[#allocation5 + $0x3d8] sm:$0xff]  ;;  %v173_v15 = vld [vmem:[#allocation5 + $0x3c0] sm:$0xff]  ;;  %p4400_p1 = scmp.ne.s32.totalorder %s4027_s2, %s4399_s29  ;;  %p4405_p3 = scmp.lt.s32.totalorder %s4399_s29, %s4399_s29 }
  0x2b   :  { %248 = vmatpush1.msra.mxu0 %v203_v7  ;;  %319 = vmatpush1.msra.mxu1 %v205_v8  ;;  %v174_v13 = vld [vmem:[#allocation5 + $0x3c8] sm:$0xff]  ;;  %v175_v16 = vld [vmem:[#allocation5 + $0x3d0] sm:$0xff]  ;;  %v161_v18 = vld [vmem:[#allocation5 + $0x360] sm:$0xff] }
  0x2c   :  { %249 = vmatprep.subr.mxu0 %v189_v9  ;;  %320 = vmatprep.subr.mxu1 %v191_v10  ;;  %v159_v17 = vld [vmem:[#allocation5 + $0x350] sm:$0xff]  ;;  %v158_v19 = vld [vmem:[#allocation5 + $0x348] sm:$0xff]  ;;  %v160_v20 = vld [vmem:[#allocation5 + $0x358] sm:$0xff]  ;;  %p4406_p4 = por %p4405_p3, %p4404_p2 }
  0x2d   :  { %250 = vmatpush1.msra.mxu0 %v188_v11  ;;  %321 = vmatpush1.msra.mxu1 %v190_v12  ;;  %v144_v21 = vld [vmem:[#allocation5 + $0x2d8] sm:$0xff]  ;;  %v146_v22 = vld [vmem:[#allocation5 + $0x2e8] sm:$0xff]  ;;  %v143_v23 = vld [vmem:[#allocation5 + $0x2d0] sm:$0xff] }
  0x2e   :  { %251 = vmatprep.subr.mxu0 %v174_v13  ;;  %322 = vmatprep.subr.mxu1 %v176_v14  ;;  %v145_v24 = vld [vmem:[#allocation5 + $0x2e0] sm:$0xff]  ;;  %v131_v26 = vld [vmem:[#allocation5 + $0x270] sm:$0xff]  ;;  %v128_v27 = vld [vmem:[#allocation5 + $0x258] sm:$0xff]  ;;  %p4407_p5 = pnand %p4406_p4, %p4400_p1 }
  0x2f   :  { %252 = vmatpush1.msra.mxu0 %v173_v15  ;;  %323 = vmatpush1.msra.mxu1 %v175_v16  ;;  %v129_v25 = vld [vmem:[#allocation5 + $0x260] sm:$0xff]  ;;  %v130_v28 = vld [vmem:[#allocation5 + $0x268] sm:$0xff]  ;;  %v116_v30 = vld [vmem:[#allocation5 + $0x1f8] sm:$0xff] }
  0x30   :  { %253 = vmatprep.subr.mxu0 %v159_v17  ;;  %324 = vmatprep.subr.mxu1 %v161_v18  ;;  %v114_v29 = vld [vmem:[#allocation5 + $0x1e8] sm:$0xff]  ;;  %v113_v31 = vld [vmem:[#allocation5 + $0x1e0] sm:$0xff]  ;;  %v115_v32 = vld [vmem:[#allocation5 + $0x1f0] sm:$0xff] }
  0x31   :  { %254 = vmatpush1.msra.mxu0 %v158_v19  ;;  %325 = vmatpush1.msra.mxu1 %v160_v20  ;;  %v99_v33 = vld [vmem:[#allocation5 + $0x170] sm:$0xff]  ;;  %v101_v34 = vld [vmem:[#allocation5 + $0x180] sm:$0xff]  ;;  %v98_v35 = vld [vmem:[#allocation5 + $0x168] sm:$0xff] }
  0x32   :  { %255 = vmatprep.subr.mxu0 %v144_v21  ;;  %326 = vmatprep.subr.mxu1 %v146_v22  ;;  %v100_v36 = vld [vmem:[#allocation5 + $0x178] sm:$0xff]  ;;  %v86_v38 = vld [vmem:[#allocation5 + $0x108] sm:$0xff]  ;;  %v83_v39 = vld [vmem:[#allocation5 + $0xf0] sm:$0xff] }
  0x33   :  { %256 = vmatpush1.msra.mxu0 %v143_v23  ;;  %327 = vmatpush1.msra.mxu1 %v145_v24  ;;  %v84_v37 = vld [vmem:[#allocation5 + $0xf8] sm:$0xff]  ;;  %v85_v40 = vld [vmem:[#allocation5 + $0x100] sm:$0xff]  ;;  %v71_v42 = vld [vmem:[#allocation5 + $0x90] sm:$0xff] }
  0x34   :  { %257 = vmatprep.subr.mxu0 %v129_v25  ;;  %328 = vmatprep.subr.mxu1 %v131_v26  ;;  %v69_v41 = vld [vmem:[#allocation5 + $0x80] sm:$0xff]  ;;  %v68_v43 = vld [vmem:[#allocation5 + $0x78] sm:$0xff]  ;;  %v70_v44 = vld [vmem:[#allocation5 + $0x88] sm:$0xff] }
  0x35   :  { %258 = vmatpush1.msra.mxu0 %v128_v27  ;;  %329 = vmatpush1.msra.mxu1 %v130_v28  ;;  %v54_v45 = vld [vmem:[#allocation5 + $0x8] sm:$0xff]  ;;  %v56_v46 = vld [vmem:[#allocation5 + $0x18] sm:$0xff]  ;;  %v53_v47 = vld [vmem:[#allocation5] sm:$0xff] }
  0x36   :  { %259 = vmatprep.subr.mxu0 %v114_v29  ;;  %330 = vmatprep.subr.mxu1 %v116_v30  ;;  %v55_v48 = vld [vmem:[#allocation5 + $0x10] sm:$0xff]  ;;  %v4471_v49 = vld [vmem:[#allocation2] sm:$0xff]  ;;  %v225_v51 = vld [vmem:[#allocation5 + $0x560] sm:$0xff] }
  0x37   :  { %260 = vmatpush1.msra.mxu0 %v113_v31  ;;  %331 = vmatpush1.msra.mxu1 %v115_v32  ;;  %v223_v50 = vld [vmem:[#allocation5 + $0x550] sm:$0xff]  ;;  %v222_v52 = vld [vmem:[#allocation5 + $0x548] sm:$0xff]  ;;  %v224_v53 = vld [vmem:[#allocation5 + $0x558] sm:$0xff] }
  0x38   :  { %261 = vmatprep.subr.mxu0 %v99_v33  ;;  %332 = vmatprep.subr.mxu1 %v101_v34  ;;  %v208_v54 = vld [vmem:[#allocation5 + $0x4d8] sm:$0xff]  ;;  %v210_v55 = vld [vmem:[#allocation5 + $0x4e8] sm:$0xff]  ;;  %v207_v56 = vld [vmem:[#allocation5 + $0x4d0] sm:$0xff] }
  0x39   :  { %262 = vmatpush1.msra.mxu0 %v98_v35  ;;  %333 = vmatpush1.msra.mxu1 %v100_v36  ;;  %v209_v57 = vld [vmem:[#allocation5 + $0x4e0] sm:$0xff]  ;;  %v195_v59 = vld [vmem:[#allocation5 + $0x470] sm:$0xff]  ;;  %v192_v60 = vld [vmem:[#allocation5 + $0x458] sm:$0xff] }
  0x3a   :  { %263 = vmatprep.subr.mxu0 %v84_v37  ;;  %334 = vmatprep.subr.mxu1 %v86_v38  ;;  %v193_v58 = vld [vmem:[#allocation5 + $0x460] sm:$0xff]  ;;  %v194_v61 = vld [vmem:[#allocation5 + $0x468] sm:$0xff]  ;;  %v180_v63 = vld [vmem:[#allocation5 + $0x3f8] sm:$0xff] }
  0x3b   :  { %264 = vmatpush1.msra.mxu0 %v83_v39  ;;  %335 = vmatpush1.msra.mxu1 %v85_v40  ;;  %v178_v62 = vld [vmem:[#allocation5 + $0x3e8] sm:$0xff]  ;;  %v177_v1 = vld [vmem:[#allocation5 + $0x3e0] sm:$0xff]  ;;  %v179_v2 = vld [vmem:[#allocation5 + $0x3f0] sm:$0xff] }
  0x3c   :  { %265 = vmatprep.subr.mxu0 %v69_v41  ;;  %336 = vmatprep.subr.mxu1 %v71_v42  ;;  %v163_v3 = vld [vmem:[#allocation5 + $0x370] sm:$0xff]  ;;  %v165_v4 = vld [vmem:[#allocation5 + $0x380] sm:$0xff]  ;;  %v162_v5 = vld [vmem:[#allocation5 + $0x368] sm:$0xff] }
  0x3d   :  { %266 = vmatpush1.msra.mxu0 %v68_v43  ;;  %337 = vmatpush1.msra.mxu1 %v70_v44  ;;  %v164_v6 = vld [vmem:[#allocation5 + $0x378] sm:$0xff]  ;;  %v150_v8 = vld [vmem:[#allocation5 + $0x308] sm:$0xff]  ;;  %v147_v9 = vld [vmem:[#allocation5 + $0x2f0] sm:$0xff] }
  0x3e   :  { %267 = vmatprep.subr.mxu0 %v54_v45  ;;  %338 = vmatprep.subr.mxu1 %v56_v46  ;;  %v148_v7 = vld [vmem:[#allocation5 + $0x2f8] sm:$0xff]  ;;  %v149_v10 = vld [vmem:[#allocation5 + $0x300] sm:$0xff]  ;;  %v135_v12 = vld [vmem:[#allocation5 + $0x290] sm:$0xff] }
  0x3f   :  { %268 = vmatpush1.msra.mxu0 %v53_v47  ;;  %339 = vmatpush1.msra.mxu1 %v55_v48  ;;  %v133_v11 = vld [vmem:[#allocation5 + $0x280] sm:$0xff]  ;;  %v132_v13 = vld [vmem:[#allocation5 + $0x278] sm:$0xff]  ;;  %v134_v14 = vld [vmem:[#allocation5 + $0x288] sm:$0xff] }
  0x40   :  { %4036 = vmatmul.mubr.msk.f32.vlgmr.msra.gmra.mxu0 %vm233_vm0, %v4471_v49  ;;  %4037 = vmatmul.mubr.msk.f32.vlgmr.msra.gmra.mxu1 %vm233_vm0, %v4471_v49  ;;  %v118_v15 = vld [vmem:[#allocation5 + $0x208] sm:$0xff]  ;;  %v120_v16 = vld [vmem:[#allocation5 + $0x218] sm:$0xff]  ;;  %v117_v17 = vld [vmem:[#allocation5 + $0x200] sm:$0xff] }
  0x41   :  { %387 = vmatprep.subr.mxu0 %v223_v50  ;;  %458 = vmatprep.subr.mxu1 %v225_v51  ;;  %v119_v18 = vld [vmem:[#allocation5 + $0x210] sm:$0xff]  ;;  %v105_v20 = vld [vmem:[#allocation5 + $0x1a0] sm:$0xff]  ;;  %v102_v21 = vld [vmem:[#allocation5 + $0x188] sm:$0xff] }
  0x42   :  { %388 = vmatpush1.msra.mxu0 %v222_v52  ;;  %459 = vmatpush1.msra.mxu1 %v224_v53  ;;  %v103_v19 = vld [vmem:[#allocation5 + $0x190] sm:$0xff]  ;;  %v104_v22 = vld [vmem:[#allocation5 + $0x198] sm:$0xff]  ;;  %v90_v24 = vld [vmem:[#allocation5 + $0x128] sm:$0xff] }
  0x43   :  { %389 = vmatprep.subr.mxu0 %v208_v54  ;;  %460 = vmatprep.subr.mxu1 %v210_v55  ;;  %v88_v23 = vld [vmem:[#allocation5 + $0x118] sm:$0xff]  ;;  %v87_v25 = vld [vmem:[#allocation5 + $0x110] sm:$0xff]  ;;  %v89_v26 = vld [vmem:[#allocation5 + $0x120] sm:$0xff] }
  0x44   :  { %390 = vmatpush1.msra.mxu0 %v207_v56  ;;  %461 = vmatpush1.msra.mxu1 %v209_v57  ;;  %v73_v27 = vld [vmem:[#allocation5 + $0xa0] sm:$0xff]  ;;  %v75_v28 = vld [vmem:[#allocation5 + $0xb0] sm:$0xff]  ;;  %v72_v29 = vld [vmem:[#allocation5 + $0x98] sm:$0xff] }
  0x45   :  { %391 = vmatprep.subr.mxu0 %v193_v58  ;;  %462 = vmatprep.subr.mxu1 %v195_v59  ;;  %v74_v30 = vld [vmem:[#allocation5 + $0xa8] sm:$0xff]  ;;  %v60_v32 = vld [vmem:[#allocation5 + $0x38] sm:$0xff]  ;;  %v57_v33 = vld [vmem:[#allocation5 + $0x20] sm:$0xff] }
  0x46   :  { %392 = vmatpush1.msra.mxu0 %v192_v60  ;;  %463 = vmatpush1.msra.mxu1 %v194_v61  ;;  %v58_v31 = vld [vmem:[#allocation5 + $0x28] sm:$0xff]  ;;  %v59_v34 = vld [vmem:[#allocation5 + $0x30] sm:$0xff]  ;;  %v229_v36 = vld [vmem:[#allocation5 + $0x580] sm:$0xff] }
  0x47   :  { %393 = vmatprep.subr.mxu0 %v178_v62  ;;  %464 = vmatprep.subr.mxu1 %v180_v63  ;;  %v227_v35 = vld [vmem:[#allocation5 + $0x570] sm:$0xff]  ;;  %v226_v37 = vld [vmem:[#allocation5 + $0x568] sm:$0xff]  ;;  %v228_v38 = vld [vmem:[#allocation5 + $0x578] sm:$0xff] }
  0x48   :  { %394 = vmatpush1.msra.mxu0 %v177_v1  ;;  %465 = vmatpush1.msra.mxu1 %v179_v2  ;;  %v212_v39 = vld [vmem:[#allocation5 + $0x4f8] sm:$0xff]  ;;  %v214_v40 = vld [vmem:[#allocation5 + $0x508] sm:$0xff]  ;;  %v211_v41 = vld [vmem:[#allocation5 + $0x4f0] sm:$0xff] }
  0x49   :  { %395 = vmatprep.subr.mxu0 %v163_v3  ;;  %466 = vmatprep.subr.mxu1 %v165_v4  ;;  %v213_v42 = vld [vmem:[#allocation5 + $0x500] sm:$0xff]  ;;  %v199_v44 = vld [vmem:[#allocation5 + $0x490] sm:$0xff]  ;;  %v196_v45 = vld [vmem:[#allocation5 + $0x478] sm:$0xff] }
  0x4a   :  { %396 = vmatpush1.msra.mxu0 %v162_v5  ;;  %467 = vmatpush1.msra.mxu1 %v164_v6  ;;  %v197_v43 = vld [vmem:[#allocation5 + $0x480] sm:$0xff]  ;;  %v198_v46 = vld [vmem:[#allocation5 + $0x488] sm:$0xff]  ;;  %v184_v48 = vld [vmem:[#allocation5 + $0x418] sm:$0xff] }
  0x4b   :  { %397 = vmatprep.subr.mxu0 %v148_v7  ;;  %468 = vmatprep.subr.mxu1 %v150_v8  ;;  %v182_v47 = vld [vmem:[#allocation5 + $0x408] sm:$0xff]  ;;  %v181_v50 = vld [vmem:[#allocation5 + $0x400] sm:$0xff]  ;;  %v183_v51 = vld [vmem:[#allocation5 + $0x410] sm:$0xff] }
  0x4c   :  { %398 = vmatpush1.msra.mxu0 %v147_v9  ;;  %469 = vmatpush1.msra.mxu1 %v149_v10  ;;  %v167_v52 = vld [vmem:[#allocation5 + $0x390] sm:$0xff]  ;;  %v169_v53 = vld [vmem:[#allocation5 + $0x3a0] sm:$0xff]  ;;  %v166_v54 = vld [vmem:[#allocation5 + $0x388] sm:$0xff] }
  0x4d   :  { %399 = vmatprep.subr.mxu0 %v133_v11  ;;  %470 = vmatprep.subr.mxu1 %v135_v12  ;;  %v168_v55 = vld [vmem:[#allocation5 + $0x398] sm:$0xff]  ;;  %v154_v57 = vld [vmem:[#allocation5 + $0x328] sm:$0xff]  ;;  %v151_v58 = vld [vmem:[#allocation5 + $0x310] sm:$0xff] }
  0x4e   :  { %400 = vmatpush1.msra.mxu0 %v132_v13  ;;  %471 = vmatpush1.msra.mxu1 %v134_v14  ;;  %v152_v56 = vld [vmem:[#allocation5 + $0x318] sm:$0xff]  ;;  %v153_v59 = vld [vmem:[#allocation5 + $0x320] sm:$0xff]  ;;  %v139_v61 = vld [vmem:[#allocation5 + $0x2b0] sm:$0xff] }
  0x4f   :  { %401 = vmatprep.subr.mxu0 %v118_v15  ;;  %472 = vmatprep.subr.mxu1 %v120_v16  ;;  %v137_v60 = vld [vmem:[#allocation5 + $0x2a0] sm:$0xff]  ;;  %v136_v62 = vld [vmem:[#allocation5 + $0x298] sm:$0xff]  ;;  %v138_v63 = vld [vmem:[#allocation5 + $0x2a8] sm:$0xff] }
  0x50   :  { %402 = vmatpush1.msra.mxu0 %v117_v17  ;;  %473 = vmatpush1.msra.mxu1 %v119_v18  ;;  %v122_v1 = vld [vmem:[#allocation5 + $0x228] sm:$0xff]  ;;  %v124_v2 = vld [vmem:[#allocation5 + $0x238] sm:$0xff]  ;;  %v121_v3 = vld [vmem:[#allocation5 + $0x220] sm:$0xff] }
  0x51   :  { %403 = vmatprep.subr.mxu0 %v103_v19  ;;  %474 = vmatprep.subr.mxu1 %v105_v20  ;;  %v123_v4 = vld [vmem:[#allocation5 + $0x230] sm:$0xff]  ;;  %v109_v6 = vld [vmem:[#allocation5 + $0x1c0] sm:$0xff]  ;;  %v106_v7 = vld [vmem:[#allocation5 + $0x1a8] sm:$0xff] }
  0x52   :  { %404 = vmatpush1.msra.mxu0 %v102_v21  ;;  %475 = vmatpush1.msra.mxu1 %v104_v22  ;;  %v107_v5 = vld [vmem:[#allocation5 + $0x1b0] sm:$0xff]  ;;  %v108_v8 = vld [vmem:[#allocation5 + $0x1b8] sm:$0xff]  ;;  %v94_v10 = vld [vmem:[#allocation5 + $0x148] sm:$0xff] }
  0x53   :  { %405 = vmatprep.subr.mxu0 %v88_v23  ;;  %476 = vmatprep.subr.mxu1 %v90_v24  ;;  %v92_v9 = vld [vmem:[#allocation5 + $0x138] sm:$0xff]  ;;  %v91_v11 = vld [vmem:[#allocation5 + $0x130] sm:$0xff]  ;;  %v93_v12 = vld [vmem:[#allocation5 + $0x140] sm:$0xff] }
  0x54   :  { %406 = vmatpush1.msra.mxu0 %v87_v25  ;;  %477 = vmatpush1.msra.mxu1 %v89_v26  ;;  %v77_v13 = vld [vmem:[#allocation5 + $0xc0] sm:$0xff]  ;;  %v79_v14 = vld [vmem:[#allocation5 + $0xd0] sm:$0xff]  ;;  %v76_v15 = vld [vmem:[#allocation5 + $0xb8] sm:$0xff] }
  0x55   :  { %407 = vmatprep.subr.mxu0 %v73_v27  ;;  %478 = vmatprep.subr.mxu1 %v75_v28  ;;  %v78_v16 = vld [vmem:[#allocation5 + $0xc8] sm:$0xff]  ;;  %v64_v18 = vld [vmem:[#allocation5 + $0x58] sm:$0xff]  ;;  %v61_v19 = vld [vmem:[#allocation5 + $0x40] sm:$0xff] }
  0x56   :  { %408 = vmatpush1.msra.mxu0 %v72_v29  ;;  %479 = vmatpush1.msra.mxu1 %v74_v30  ;;  %v62_v17 = vld [vmem:[#allocation5 + $0x48] sm:$0xff]  ;;  %v63_v20 = vld [vmem:[#allocation5 + $0x50] sm:$0xff]  ;;  %v232_v23 = vld [vmem:[#allocation5 + $0x598] sm:$0xff] }
  0x57   :  { %409 = vmatprep.subr.mxu0 %v58_v31  ;;  %480 = vmatprep.subr.mxu1 %v60_v32  ;;  %v231_v21 = vld [vmem:[#allocation5 + $0x590] sm:$0xff]  ;;  %v230_v22 = vld [vmem:[#allocation5 + $0x588] sm:$0xff]  ;;  %v216_v24 = vld [vmem:[#allocation5 + $0x518] sm:$0xff] }
  0x58   :  { %410 = vmatpush1.msra.mxu0 %v57_v33  ;;  %443 = vmatprep.mubr.f32.mxu0 %v4430_v0  ;;  %v215_v25 = vld [vmem:[#allocation5 + $0x510] sm:$0xff]  ;;  %v217_v26 = vld [vmem:[#allocation5 + $0x520] sm:$0xff]  ;;  %v200_v28 = vld [vmem:[#allocation5 + $0x498] sm:$0xff] }
  0x59   :  { %481 = vmatpush1.msra.mxu1 %v59_v34  ;;  %514 = vmatprep.mubr.f32.mxu1 %v4430_v0  ;;  %v201_v27 = vld [vmem:[#allocation5 + $0x4a0] sm:$0xff]  ;;  %v202_v29 = vld [vmem:[#allocation5 + $0x4a8] sm:$0xff]  ;;  %v187_v32 = vld [vmem:[#allocation5 + $0x430] sm:$0xff] }
  0x5a   :  { %4038 = vmatmul.mubr.msk.f32.vlgmr.msra.gmra.mxu0 %vm233_vm0, %v4471_v49  ;;  %4039 = vmatmul.mubr.msk.f32.vlgmr.msra.gmra.mxu1 %vm233_vm0, %v4471_v49  ;;  %v186_v30 = vld [vmem:[#allocation5 + $0x428] sm:$0xff]  ;;  %v185_v31 = vld [vmem:[#allocation5 + $0x420] sm:$0xff]  ;;  %v171_v33 = vld [vmem:[#allocation5 + $0x3b0] sm:$0xff] }
  0x5b   :  { %529 = vmatprep.subr.mxu0 %v227_v35  ;;  %600 = vmatprep.subr.mxu1 %v229_v36  ;;  %v170_v34 = vld [vmem:[#allocation5 + $0x3a8] sm:$0xff]  ;;  %v172_v35 = vld [vmem:[#allocation5 + $0x3b8] sm:$0xff] }
  0x5c   :  { %530 = vmatpush1.msra.mxu0 %v226_v37  ;;  %601 = vmatpush1.msra.mxu1 %v228_v38  ;;  %v156_v36 = vld [vmem:[#allocation5 + $0x338] sm:$0xff]  ;;  %v155_v37 = vld [vmem:[#allocation5 + $0x330] sm:$0xff]  ;;  %v157_v38 = vld [vmem:[#allocation5 + $0x340] sm:$0xff] }
  0x5d   :  { %531 = vmatprep.subr.mxu0 %v212_v39  ;;  %602 = vmatprep.subr.mxu1 %v214_v40  ;;  %v141_v39 = vld [vmem:[#allocation5 + $0x2c0] sm:$0xff]  ;;  %v140_v40 = vld [vmem:[#allocation5 + $0x2b8] sm:$0xff] }
  0x5e   :  { %532 = vmatpush1.msra.mxu0 %v211_v41  ;;  %603 = vmatpush1.msra.mxu1 %v213_v42  ;;  %v142_v41 = vld [vmem:[#allocation5 + $0x2c8] sm:$0xff] }
  0x5f   :  { %533 = vmatprep.subr.mxu0 %v197_v43  ;;  %604 = vmatprep.subr.mxu1 %v199_v44  ;;  %v126_v42 = vld [vmem:[#allocation5 + $0x248] sm:$0xff]  ;;  %v125_v43 = vld [vmem:[#allocation5 + $0x240] sm:$0xff]  ;;  %v127_v44 = vld [vmem:[#allocation5 + $0x250] sm:$0xff] }
  0x60   :  { %534 = vmatpush1.msra.mxu0 %v196_v45  ;;  %605 = vmatpush1.msra.mxu1 %v198_v46  ;;  %v111_v45 = vld [vmem:[#allocation5 + $0x1d0] sm:$0xff]  ;;  %v110_v46 = vld [vmem:[#allocation5 + $0x1c8] sm:$0xff] }
  0x61   :  { %535 = vmatprep.subr.mxu0 %v182_v47  ;;  %606 = vmatprep.subr.mxu1 %v184_v48  ;;  %v112_v47 = vld [vmem:[#allocation5 + $0x1d8] sm:$0xff] }
  0x62   :  { %536 = vmatpush1.msra.mxu0 %v181_v50  ;;  %607 = vmatpush1.msra.mxu1 %v183_v51  ;;  %v96_v48 = vld [vmem:[#allocation5 + $0x158] sm:$0xff]  ;;  %v95_v50 = vld [vmem:[#allocation5 + $0x150] sm:$0xff]  ;;  %v97_v51 = vld [vmem:[#allocation5 + $0x160] sm:$0xff] }
  0x63   :  { %537 = vmatprep.subr.mxu0 %v167_v52  ;;  %608 = vmatprep.subr.mxu1 %v169_v53  ;;  %v81_v52 = vld [vmem:[#allocation5 + $0xe0] sm:$0xff]  ;;  %v80_v53 = vld [vmem:[#allocation5 + $0xd8] sm:$0xff] }
  0x64   :  { %538 = vmatpush1.msra.mxu0 %v166_v54  ;;  %609 = vmatpush1.msra.mxu1 %v168_v55  ;;  %v82_v54 = vld [vmem:[#allocation5 + $0xe8] sm:$0xff] }
  0x65   :  { %539 = vmatprep.subr.mxu0 %v152_v56  ;;  %610 = vmatprep.subr.mxu1 %v154_v57  ;;  %v66_v55 = vld [vmem:[#allocation5 + $0x68] sm:$0xff]  ;;  %v65_v56 = vld [vmem:[#allocation5 + $0x60] sm:$0xff]  ;;  %v67_v57 = vld [vmem:[#allocation5 + $0x70] sm:$0xff] }
  0x66   :  { %540 = vmatpush1.msra.mxu0 %v151_v58  ;;  %611 = vmatpush1.msra.mxu1 %v153_v59 }
  0x67   :  { %541 = vmatprep.subr.mxu0 %v137_v60  ;;  %612 = vmatprep.subr.mxu1 %v139_v61 }
  0x68   :  { %542 = vmatpush1.msra.mxu0 %v136_v62  ;;  %613 = vmatpush1.msra.mxu1 %v138_v63 }
  0x69   :  { %543 = vmatprep.subr.mxu0 %v122_v1  ;;  %614 = vmatprep.subr.mxu1 %v124_v2 }
  0x6a   :  { %544 = vmatpush1.msra.mxu0 %v121_v3  ;;  %615 = vmatpush1.msra.mxu1 %v123_v4 }
  0x6b   :  { %545 = vmatprep.subr.mxu0 %v107_v5  ;;  %616 = vmatprep.subr.mxu1 %v109_v6 }
  0x6c   :  { %546 = vmatpush1.msra.mxu0 %v106_v7  ;;  %617 = vmatpush1.msra.mxu1 %v108_v8 }
  0x6d   :  { %547 = vmatprep.subr.mxu0 %v92_v9  ;;  %618 = vmatprep.subr.mxu1 %v94_v10 }
  0x6e   :  { %548 = vmatpush1.msra.mxu0 %v91_v11  ;;  %619 = vmatpush1.msra.mxu1 %v93_v12 }
  0x6f   :  { %549 = vmatprep.subr.mxu0 %v77_v13  ;;  %620 = vmatprep.subr.mxu1 %v79_v14 }
  0x70   :  { %550 = vmatpush1.msra.mxu0 %v76_v15  ;;  %621 = vmatpush1.msra.mxu1 %v78_v16  ;;  %v3915_v16 = vlaneseq }
  0x71   :  { %551 = vmatprep.subr.mxu0 %v62_v17  ;;  %622 = vmatprep.subr.mxu1 %v64_v18 }
  0x72   :  { %552 = vmatpush1.msra.mxu0 %v61_v19  ;;  %585 = vmatprep.mubr.f32.mxu0 %v4430_v0 }
  0x73   :  { %623 = vmatpush1.msra.mxu1 %v63_v20  ;;  %656 = vmatprep.mubr.f32.mxu1 %v4430_v0 }
  0x74   :  { %4040 = vmatmul.mubr.msk.f32.vlgmr.msra.gmra.mxu0 %vm233_vm0, %v4471_v49  ;;  %4041 = vmatmul.mubr.msk.f32.vlgmr.msra.gmra.mxu1 %vm233_vm0, %v4471_v49 }
  0x75   :  { %671 = vmatprep.subr.mxu0 %v231_v21  ;;  %4177 = vmatprep.subr.mxu1 %v4430_v0 }
  0x76   :  { %672 = vmatpush1.msra.mxu0 %v230_v22  ;;  %4178 = vmatpush3.msra.mxu1 %v232_v23  ;;  %v4432_v23 = vmov 683565275  }
  0x77   :  { %673 = vmatprep.subr.mxu0 %v216_v24  ;;  %4179 = vmatprep.subr.mxu1 %v4430_v0 }
  0x78   :  { %674 = vmatpush1.msra.mxu0 %v215_v25  ;;  %4180 = vmatpush3.msra.mxu1 %v217_v26 }
  0x79   :  { %675 = vmatprep.subr.mxu0 %v201_v27  ;;  %4181 = vmatprep.subr.mxu1 %v4430_v0  ;;  %v4433_v27 = vmov 2475754826  }
  0x7a   :  { %676 = vmatpush1.msra.mxu0 %v200_v28  ;;  %4182 = vmatpush3.msra.mxu1 %v202_v29  ;;  %v4434_v29 = vmov 2131351028  }
  0x7b   :  { %677 = vmatprep.subr.mxu0 %v186_v30  ;;  %4183 = vmatprep.subr.mxu1 %v4430_v0 }
  0x7c   :  { %678 = vmatpush1.msra.mxu0 %v185_v31  ;;  %4184 = vmatpush3.msra.mxu1 %v187_v32  ;;  %v4435_v31 = vmov 2102212464  }
  0x7d   :  { %679 = vmatprep.subr.mxu0 %v171_v33  ;;  %4185 = vmatprep.subr.mxu1 %v4430_v0  ;;  %v4436_v33 = vmov 920167782  }
  0x7e   :  { %680 = vmatpush1.msra.mxu0 %v170_v34  ;;  %4186 = vmatpush3.msra.mxu1 %v172_v35 }
  0x7f   :  { %681 = vmatprep.subr.mxu0 %v156_v36  ;;  %4187 = vmatprep.subr.mxu1 %v4430_v0 }
  0x80   :  { %682 = vmatpush1.msra.mxu0 %v155_v37  ;;  %4188 = vmatpush3.msra.mxu1 %v157_v38 }
  0x81   :  { %683 = vmatprep.subr.mxu0 %v141_v39  ;;  %4189 = vmatprep.subr.mxu1 %v4430_v0 }
  0x82   :  { %684 = vmatpush1.msra.mxu0 %v140_v40  ;;  %4190 = vmatpush3.msra.mxu1 %v142_v41  ;;  %v4437_v40 = vmov 1326507024  }
  0x83   :  { %685 = vmatprep.subr.mxu0 %v126_v42  ;;  %4191 = vmatprep.subr.mxu1 %v4430_v0 }
  0x84   :  { %686 = vmatpush1.msra.mxu0 %v125_v43  ;;  %4192 = vmatpush3.msra.mxu1 %v127_v44 }
  0x85   :  { %687 = vmatprep.subr.mxu0 %v111_v45  ;;  %4193 = vmatprep.subr.mxu1 %v4430_v0 }
  0x86   :  { %688 = vmatpush1.msra.mxu0 %v110_v46  ;;  %4194 = vmatpush3.msra.mxu1 %v112_v47 }
  0x87   :  { %689 = vmatprep.subr.mxu0 %v96_v48  ;;  %4195 = vmatprep.subr.mxu1 %v4430_v0 }
  0x88   :  { %690 = vmatpush1.msra.mxu0 %v95_v50  ;;  %4196 = vmatpush3.msra.mxu1 %v97_v51 }
  0x89   :  { %691 = vmatprep.subr.mxu0 %v81_v52  ;;  %4197 = vmatprep.subr.mxu1 %v4430_v0 }
  0x8a   :  { %692 = vmatpush1.msra.mxu0 %v80_v53  ;;  %4198 = vmatpush3.msra.mxu1 %v82_v54 }
  0x8b   :  { %693 = vmatprep.subr.mxu0 %v66_v55  ;;  %4199 = vmatprep.subr.mxu1 %v4430_v0 }
  0x8c   :  { %694 = vmatpush1.msra.mxu0 %v65_v56  ;;  %727 = vmatprep.mubr.f32.mxu0 %v4430_v0 }
  0x8d   :  { %4200 = vmatpush3.msra.mxu1 %v67_v57  ;;  %4201 = vmatprep.mubr.msk.f32.mxu1 %vm4431_vm1, %v4430_v0 }
  0x8e   :  { %4042 = vmatmul.mubr.msk.f32.vlgmr.msra.gmra.mxu0 %vm233_vm0, %v4471_v49  ;;  %4202 = vmatmul.mubr.msk.f32.vlgmr.msra.gmra.mxu1 %vm233_vm0, %v4471_v49 }
 0x100   :  { %v4507_v58 = vpop.f32.mrf.mxu0  ;;  %v4509_v59 = vpop.f32.mrf.mxu1 }
 0x101   :  { %v808_v60 = vand.u32 2147483647, %v4507_v58  ;;  %v811_v61 = vand.u32 2139095040, %v4507_v58  ;;  %v1016_v62 = vand.u32 2147483647, %v4509_v59  ;;  %v1019_v63 = vand.u32 2139095040, %v4509_v59 }
 0x102   :  { %v4515_v1 = vpop.f32.mrf.mxu0  ;;  %vm810_vm0 = vcmp.lt.s32.totalorder %v4507_v58, 0 }
 0x103   :  { %v812_v0 = vshrl.u32 %v811_v61, 23  ;;  %v815_v2 = vand.u32 8388607, %v808_v60  ;;  %v1020_v3 = vshrl.u32 %v1019_v63, 23  ;;  %v1023_v49 = vand.u32 8388607, %v1016_v62 }
 0x104   :  { %v915_v4 = vand.u32 2139095040, %v4515_v1  ;;  %v912_v20 = vand.u32 2147483647, %v4515_v1 }
 0x105   :  { %v4044_v5 = vadd.s32 4294967169, %v812_v0  ;;  %v4052_v6 = vadd.s32 4294967169, %v1020_v3  ;;  %v816_v9 = vor.u32 8388608, %v815_v2  ;;  %v1024_v10 = vor.u32 8388608, %v1023_v49 }
 0x106   :  { %v916_v7 = vshrl.u32 %v915_v4, 23 }
 0x107   :  { %v818_v8 = vadd.s32 1, %v4044_v5  ;;  %v1026_v11 = vadd.s32 1, %v4052_v6  ;;  %v4522_v18 = vshll.u32 %v816_v9, 8  ;;  %v4524_v19 = vshll.u32 %v1024_v10, 8 }
 0x108   :  { %v4048_v12 = vadd.s32 4294967169, %v916_v7 }
 0x109   :  { %vm819_vm2 = vcmp.gt.s32.totalorder %v818_v8, 0  ;;  %vm1027_vm3 = vcmp.gt.s32.totalorder %v1026_v11, 0 }
 0x10a   :  { %v820_v13 = vsel %vm819_vm2, %v818_v8, 0  ;;  %v1028_v17 = vsel %vm1027_vm3, %v1026_v11, 0  ;;  %v4527_v21 = vadd.s32 1, %v4048_v12 }
 0x10b   :  { %v821_v14 = vshrl.u32 %v820_v13, 5  ;;  %v822_v15 = vand.u32 31, %v820_v13  ;;  %v4530_v25 = vshrl.u32 %v1028_v17, 5  ;;  %v1030_v26 = vand.u32 31, %v1028_v17 }
 0x10c   :  { %vm923_vm7 = vcmp.gt.s32.totalorder %v4527_v21, 0 }
 0x10d   :  { %v823_v22 = vsub.s32 32, %v822_v15  ;;  %v825_v24 = vshll.u32 %v4432_v23, %v822_v15  ;;  %v828_v28 = vshll.u32 %v4433_v27, %v822_v15  ;;  %v831_v30 = vshll.u32 %v4434_v29, %v822_v15 }
 0x10e   :  { %v834_v32 = vshll.u32 %v4435_v31, %v822_v15  ;;  %v837_v34 = vshll.u32 %v4436_v33, %v822_v15  ;;  %vm840_vm4 = vcmp.lt.s32.totalorder %v821_v14, 1  ;;  %vm842_vm5 = vcmp.lt.s32.totalorder %v821_v14, 3 }
 0x10f   :  { %v826_v35 = vshrl.u32 %v4433_v27, %v823_v22  ;;  %v829_v36 = vshrl.u32 %v4434_v29, %v823_v22  ;;  %v832_v37 = vshrl.u32 %v4435_v31, %v823_v22  ;;  %v824_v38 = vshrl.u32 %v4432_v23, %v823_v22 }
 0x110   :  { %v835_v39 = vshrl.u32 %v4436_v33, %v823_v22  ;;  %v838_v41 = vshrl.u32 %v4437_v40, %v823_v22  ;;  %v1031_v45 = vsub.s32 32, %v1030_v26  ;;  %vm843_vm6 = vcmp.lt.s32.totalorder %v821_v14, 4 }
 0x111   :  { %v827_v42 = vor.u32 %v826_v35, %v825_v24  ;;  %v830_v43 = vor.u32 %v829_v36, %v828_v28  ;;  %v833_v44 = vor.u32 %v832_v37, %v831_v30  ;;  %v1033_v48 = vshll.u32 %v4432_v23, %v1030_v26 }
 0x112   :  { %v836_v46 = vor.u32 %v835_v39, %v834_v32  ;;  %v839_v47 = vor.u32 %v838_v41, %v837_v34  ;;  %v1036_v57 = vshll.u32 %v4433_v27, %v1030_v26  ;;  %vm841_vm8 = vcmp.lt.s32.totalorder %v821_v14, 2 }
 0x113   :  { %v844_v50 = vsel %vm840_vm4, %v824_v38, %v827_v42  ;;  %v845_v51 = vsel %vm843_vm6, %v833_v44, 2102212464  ;;  %v848_v52 = vsel %vm840_vm4, %v827_v42, %v830_v43  ;;  %v852_v53 = vsel %vm840_vm4, %v830_v43, %v833_v44 }
 0x114   :  { %v846_v54 = vsel %vm842_vm5, %v830_v43, %v845_v51  ;;  %v849_v55 = vsel %vm843_vm6, %v836_v46, 920167782  ;;  %v853_v56 = vsel %vm843_vm6, %v839_v47, 1326507024  ;;  %v1034_v0 = vshrl.u32 %v4433_v27, %v1031_v45  ;;  %v804_v47 = vld [vmem:[#allocation7] sm:$0xff] }
 0x115   :  { %v850_v61 = vsel %vm842_vm5, %v833_v44, %v849_v55  ;;  %v854_v63 = vsel %vm842_vm5, %v836_v46, %v853_v56  ;;  %v847_v2 = vsel %vm841_vm8, %v844_v50, %v846_v54  ;;  %v1037_v4 = vshrl.u32 %v4434_v29, %v1031_v45  ;;  %v4594_v55 = vpop.f32.mrf.mxu1 }
 0x116   :  { %v851_v3 = vsel %vm841_vm8, %v848_v52, %v850_v61  ;;  %v855_v49 = vsel %vm841_vm8, %v852_v53, %v854_v63  ;;  %v1035_v9 = vor.u32 %v1034_v0, %v1033_v48  ;;  %v1039_v11 = vshll.u32 %v4434_v29, %v1030_v26 }
 0x117   :  { %v4554_v5 = vmul.u32.u64.low %v4522_v18, %v855_v49  ;;  %v4555_v6 = vmul.u32.u64.high %v4522_v18, %v855_v49, %v4554_v5  ;;  %v4558_v7 = vmul.u32.u64.low %v4522_v18, %v851_v3  ;;  %v4559_v8 = vmul.u32.u64.high %v4522_v18, %v851_v3, %v4558_v7 }
 0x118   :  { %v1038_v10 = vor.u32 %v1037_v4, %v1036_v57  ;;  %v1040_v12 = vshrl.u32 %v4435_v31, %v1031_v45  ;;  %v1042_v13 = vshll.u32 %v4435_v31, %v1030_v26  ;;  %v1043_v14 = vshrl.u32 %v4436_v33, %v1031_v45 }
 0x119   :  { %v1045_v15 = vshll.u32 %v4436_v33, %v1030_v26  ;;  %v1046_v17 = vshrl.u32 %v4437_v40, %v1031_v45  ;;  %v863_v22 = vmul.u32 %v4522_v18, %v847_v2  ;;  %v1032_v24 = vshrl.u32 %v4432_v23, %v1031_v45 }
 0x11a   :  { %v1041_v28 = vor.u32 %v1040_v12, %v1039_v11  ;;  %vm1048_vm9 = vcmp.lt.s32.totalorder %v4530_v25, 1  ;;  %vm865_vm10 = vc.u32 %v4555_v6, %v4558_v7  ;;  %v866_v30 = vadd.s32 1, %v4559_v8 }
 0x11b   :  { %v1044_v32 = vor.u32 %v1043_v14, %v1042_v13  ;;  %vm1049_vm11 = vcmp.lt.s32.totalorder %v4530_v25, 2  ;;  %v1047_v34 = vor.u32 %v1046_v17, %v1045_v15  ;;  %vm1050_vm12 = vcmp.lt.s32.totalorder %v4530_v25, 3 }
 0x11c   :  { %vm1051_vm13 = vcmp.lt.s32.totalorder %v4530_v25, 4  ;;  %v1056_v26 = vsel %vm1048_vm9, %v1035_v9, %v1038_v10  ;;  %v867_v18 = vsel %vm865_vm10, %v866_v30, %v4559_v8  ;;  %v1060_v37 = vsel %vm1048_vm9, %v1038_v10, %v1041_v28 }
 0x11d   :  { %v1053_v35 = vsel %vm1051_vm13, %v1041_v28, 2102212464  ;;  %v1057_v36 = vsel %vm1051_vm13, %v1044_v32, 920167782  ;;  %v868_v38 = vadd.s32 %v867_v18, %v863_v22  ;;  %v1052_v39 = vsel %vm1048_vm9, %v1032_v24, %v1035_v9 }
 0x11e   :  { %v1058_v41 = vsel %vm1050_vm12, %v1041_v28, %v1057_v36  ;;  %v1061_v42 = vsel %vm1051_vm13, %v1047_v34, 1326507024  ;;  %v1054_v43 = vsel %vm1050_vm12, %v1038_v10, %v1053_v35  ;;  %v924_v46 = vsel %vm923_vm7, %v4527_v21, 0 }
 0x11f   :  { %v1059_v44 = vsel %vm1049_vm11, %v1056_v26, %v1058_v41  ;;  %v1062_v45 = vsel %vm1050_vm12, %v1044_v32, %v1061_v42  ;;  %v869_v48 = vadd.s32 536870912, %v868_v38  ;;  %v4599_v21 = vshrl.u32 %v3915_v16, 7 }
 0x120   :  { %v1063_v50 = vsel %vm1049_vm11, %v1060_v37, %v1062_v45  ;;  %v4586_v51 = vmul.u32.u64.low %v4524_v19, %v1059_v44  ;;  %v4587_v52 = vmul.u32.u64.high %v4524_v19, %v1059_v44, %v4586_v51  ;;  %v1055_v57 = vsel %vm1049_vm11, %v1052_v39, %v1054_v43 }
 0x121   :  { %v4591_v53 = vmul.u32.u64.low %v4524_v19, %v1063_v50  ;;  %v4592_v54 = vmul.u32.u64.high %v4524_v19, %v1063_v50, %v4591_v53  ;;  %v4596_v56 = vshrl.u32 %v869_v48, 30  ;;  %vm806_vm14 = vcmp.eq.f32.partialorder %v804_v47, 1.0 }
 0x122   :  { %v919_v61 = vand.u32 8388607, %v912_v20  ;;  %v926_v63 = vand.u32 31, %v924_v46  ;;  %v1074_v2 = vadd.s32 1, %v4587_v52  ;;  %v1123_v3 = vand.u32 2139095040, %v4594_v55 }
 0x123   :  { %v871_v0 = vshll.u32 %v4596_v56, 30  ;;  %v1071_v49 = vmul.u32 %v4524_v19, %v1055_v57  ;;  %vm1073_vm15 = vc.u32 %v4592_v54, %v4586_v51  ;;  %v3917_v25 = vsub.s32 0, %v4599_v21 }
 0x124   :  { %v1075_v4 = vsel %vm1073_vm15, %v1074_v2, %v4587_v52  ;;  %v3925_v5 = vsub.s32 2, %v4599_v21  ;;  %v4438_v8 = vmov 0   ;;  %v920_v11 = vor.u32 8388608, %v919_v61 }
 0x125   :  { %v4611_v16 = vsub.s32 %v868_v38, %v871_v0  ;;  %v4617_v9 = vsel %vm806_vm14, 1, %v4438_v8  ;;  %v1076_v10 = vadd.s32 %v1075_v4, %v1071_v49  ;;  %v927_v12 = vsub.s32 32, %v926_v63 }
 0x126   :  { %v1124_v13 = vshrl.u32 %v1123_v3, 23  ;;  %v4620_v15 = vshrl.u32 %v924_v46, 5  ;;  %v4626_v22 = vrot.slane %v4617_v9, %v3917_v25  ;;  %v4631_v24 = vrot.slane %v4617_v9, %v3925_v5 }
 0x127   :  { %v874_v19 = vsub.s32 0, %v4611_v16  ;;  %v1077_v14 = vadd.s32 536870912, %v1076_v10  ;;  %v1120_v28 = vand.u32 2147483647, %v4594_v55  ;;  %v864_v30 = vadd.s32 %v4558_v7, %v4555_v6 }
 0x128   :  { %v936_v34 = vshrl.u32 %v4435_v31, %v927_v12  ;;  %v4639_v26 = vshll.u32 %v920_v11, 8  ;;  %v930_v35 = vshrl.u32 %v4433_v27, %v927_v12  ;;  %v933_v36 = vshrl.u32 %v4434_v29, %v927_v12 }
 0x129   :  { %v4045_v17 = vmin.u32 %v874_v19, %v4611_v16  ;;  %v4636_v32 = vshrl.u32 %v1077_v14, 30  ;;  %v4056_v37 = vadd.s32 4294967169, %v1124_v13  ;;  %v935_v39 = vshll.u32 %v4434_v29, %v926_v63 }
 0x12a   :  { %v939_v6 = vshrl.u32 %v4436_v33, %v927_v12  ;;  %vm944_vm1 = vcmp.lt.s32.totalorder %v4620_v15, 1  ;;  %v929_v41 = vshll.u32 %v4432_v23, %v926_v63  ;;  %v932_v42 = vshll.u32 %v4433_v27, %v926_v63 }
 0x12b   :  { %v876_v18 = vclz %v4045_v17  ;;  %v1079_v38 = vshll.u32 %v4636_v32, 30  ;;  %v938_v43 = vshll.u32 %v4435_v31, %v926_v63  ;;  %vm945_vm2 = vcmp.lt.s32.totalorder %v4620_v15, 2 }
 0x12c   :  { %v937_v45 = vor.u32 %v936_v34, %v935_v39  ;;  %v942_v46 = vshrl.u32 %v4437_v40, %v927_v12  ;;  %vm946_vm3 = vcmp.lt.s32.totalorder %v4620_v15, 3  ;;  %v931_v47 = vor.u32 %v930_v35, %v929_v41 }
 0x12d   :  { %v4046_v7 = vadd.s32 4294967294, %v876_v18  ;;  %v4652_v44 = vsub.s32 %v1076_v10, %v1079_v38  ;;  %v934_v48 = vor.u32 %v933_v36, %v932_v42  ;;  %v940_v50 = vor.u32 %v939_v6, %v938_v43 }
 0x12e   :  { %v894_v53 = vsub.s32 4, %v4596_v56  ;;  %v941_v61 = vshll.u32 %v4436_v33, %v926_v63  ;;  %v928_v3 = vshrl.u32 %v4432_v23, %v927_v12  ;;  %vm947_vm5 = vcmp.lt.s32.totalorder %v4620_v15, 4 }
 0x12f   :  { %vm4047_vm4 = vcmp.lt.s32.totalorder %v4046_v7, 0  ;;  %v1082_v57 = vsub.s32 0, %v4652_v44  ;;  %vm4663_vm6 = vcmp.le.f32.partialorder %v808_v60, 0.7853982  ;;  %v949_v63 = vsel %vm947_vm5, %v937_v45, 2102212464 }
 0x130   :  { %v879_v52 = vsel %vm4047_vm4, 0, %v4046_v7  ;;  %v943_v11 = vor.u32 %v942_v46, %v941_v61  ;;  %v952_v12 = vsel %vm944_vm1, %v931_v47, %v934_v48  ;;  %v953_v14 = vsel %vm947_vm5, %v940_v50, 920167782 }
 0x131   :  { %v880_v0 = vsub.s32 32, %v879_v52  ;;  %v884_v2 = vsub.s32 4294967266, %v879_v52  ;;  %v881_v4 = vshll.u32 %v4611_v16, %v879_v52  ;;  %v4053_v10 = vmin.u32 %v1082_v57, %v4652_v44 }
 0x132   :  { %v895_v60 = vsel %vm810_vm0, %v894_v53, %v4596_v56  ;;  %v1072_v16 = vadd.s32 %v4586_v51, %v4592_v54  ;;  %v948_v34 = vsel %vm944_vm1, %v928_v3, %v931_v47  ;;  %v954_v35 = vsel %vm946_vm3, %v937_v45, %v953_v14 }
 0x133   :  { %v882_v19 = vshrl.u32 %v864_v30, %v880_v0  ;;  %v885_v13 = vadd.s32 127, %v884_v2  ;;  %v1084_v17 = vclz %v4053_v10  ;;  %v956_v36 = vsel %vm944_vm1, %v934_v48, %v937_v45 }
 0x134   :  { %v950_v39 = vsel %vm946_vm3, %v934_v48, %v949_v63  ;;  %v955_v56 = vsel %vm945_vm2, %v952_v12, %v954_v35  ;;  %v957_v51 = vsel %vm947_vm5, %v943_v11, 1326507024  ;;  %v1130_v41 = vadd.s32 1, %v4056_v37 }
 0x135   :  { %v883_v18 = vor.u32 %v882_v19, %v881_v4  ;;  %v886_v30 = vshll.u32 %v885_v13, 23  ;;  %v4054_v38 = vadd.s32 4294967294, %v1084_v17  ;;  %v958_v7 = vsel %vm946_vm3, %v940_v50, %v957_v51 }
 0x136   :  { %v959_v42 = vsel %vm945_vm2, %v956_v36, %v958_v7  ;;  %v4697_v43 = vmul.u32.u64.low %v4639_v26, %v955_v56  ;;  %v4698_v45 = vmul.u32.u64.high %v4639_v26, %v955_v56, %v4697_v43  ;;  %v951_v37 = vsel %vm945_vm2, %v948_v34, %v950_v39 }
 0x137   :  { %v887_v54 = vor.u32 4788187, %v886_v30  ;;  %v890_v6 = vcvt.s32.f32 %v883_v18  ;;  %vm4055_vm7 = vcmp.lt.s32.totalorder %v4054_v38, 0  ;;  %vm1131_vm8 = vcmp.gt.s32.totalorder %v1130_v41, 0 }
 0x138   :  { %v1087_v47 = vsel %vm4055_vm7, 0, %v4054_v38  ;;  %v4702_v48 = vmul.u32.u64.low %v4639_v26, %v959_v42  ;;  %v4703_v52 = vmul.u32.u64.high %v4639_v26, %v959_v42, %v4702_v48  ;;  %v897_v61 = vsel %vm4663_vm6, 0, %v895_v60 }
 0x139   :  { %v888_v46 = vand.u32 2147483647, %v887_v54  ;;  %v1088_v53 = vsub.s32 32, %v1087_v47  ;;  %v1092_v57 = vsub.s32 4294967266, %v1087_v47  ;;  %v1102_v0 = vsub.s32 4, %v4636_v32 }
 0x13a   :  { %v1132_v2 = vsel %vm1131_vm8, %v1130_v41, 0  ;;  %v1089_v3 = vshll.u32 %v4652_v44, %v1087_v47  ;;  %v970_v11 = vadd.s32 1, %v4698_v45  ;;  %v967_v19 = vmul.u32 %v4639_v26, %v951_v37 }
 0x13b   :  { %v891_v50 = vmul.f32 %v890_v6, %v888_v46  ;;  %v1090_v4 = vshrl.u32 %v1072_v16, %v1088_v53  ;;  %v1093_v10 = vadd.s32 127, %v1092_v57  ;;  %vm969_vm9 = vc.u32 %v4703_v52, %v4697_v43 }
 0x13c   :  { %v1134_v15 = vand.u32 31, %v1132_v2  ;;  %v901_v13 = vadd.s32 3, %v897_v61  ;;  %v971_v60 = vsel %vm969_vm9, %v970_v11, %v4698_v45  ;;  %vm1018_vm10 = vcmp.lt.s32.totalorder %v4509_v59, 0 }
 0x13d   :  { %v892_v63 = vxor.u32 2147483648, %v891_v50  ;;  %v1091_v12 = vor.u32 %v1090_v4, %v1089_v3  ;;  %v1094_v14 = vshll.u32 %v1093_v10, 23  ;;  %v972_v44 = vadd.s32 %v971_v60, %v967_v19 }
 0x13e   :  { %v4719_v16 = vsub.s32 32, %v1134_v15  ;;  %vm4726_vm11 = vcmp.le.f32.partialorder %v1016_v62, 0.7853982  ;;  %v1103_v30 = vsel %vm1018_vm10, %v1102_v0, %v4636_v32  ;;  %v4733_v35 = vand.u32 3, %v897_v61 }
 0x13f   :  { %v893_v17 = vsel %vm810_vm0, %v892_v63, %v891_v50  ;;  %v1095_v18 = vor.u32 4788187, %v1094_v14  ;;  %v973_v36 = vadd.s32 536870912, %v972_v44  ;;  %v1127_v38 = vand.u32 8388607, %v1120_v28 }
 0x140   :  { %v896_v26 = vsel %vm4663_vm6, %v4507_v58, %v893_v17  ;;  %v4737_v49 = vand.u32 3, %v901_v13  ;;  %v1098_v62 = vcvt.s32.f32 %v1091_v12  ;;  %v1105_v56 = vsel %vm4726_vm11, 0, %v1103_v30 }
 0x141   :  { %4279 = vcosq.f32 %v896_v26  ;;  %v1096_v39 = vand.u32 2147483647, %v1095_v18  ;;  %v4741_v51 = vshrl.u32 %v973_v36, 30  ;;  %v1138_v32 = vshrl.u32 %v4433_v27, %v4719_v16 }
 0x142   :  { %4281 = vsinq.f32 %v896_v26  ;;  %v1141_v54 = vshrl.u32 %v4434_v29, %v4719_v16  ;;  %v1144_v7 = vshrl.u32 %v4435_v31, %v4719_v16  ;;  %v1146_v41 = vshll.u32 %v4435_v31, %v1134_v15 }
 0x143   :  { %v1099_v6 = vmul.f32 %v1098_v62, %v1096_v39  ;;  %v1147_v42 = vshrl.u32 %v4436_v33, %v4719_v16  ;;  %v975_v45 = vshll.u32 %v4741_v51, 30  ;;  %v4753_v46 = vshrl.u32 %v1132_v2, 5 }
 0x144   :  { %v1137_v47 = vshll.u32 %v4432_v23, %v1134_v15  ;;  %v1140_v48 = vshll.u32 %v4433_v27, %v1134_v15  ;;  %v1143_v57 = vshll.u32 %v4434_v29, %v1134_v15  ;;  %v1150_v50 = vshrl.u32 %v4437_v40, %v4719_v16 }
 0x145   :  { %v1100_v53 = vxor.u32 2147483648, %v1099_v6  ;;  %v1148_v37 = vor.u32 %v1147_v42, %v1146_v41  ;;  %v4760_v61 = vsub.s32 %v972_v44, %v975_v45  ;;  %v1128_v0 = vor.u32 8388608, %v1127_v38 }
 0x146   :  { %v1139_v3 = vor.u32 %v1138_v32, %v1137_v47  ;;  %v1142_v4 = vor.u32 %v1141_v54, %v1140_v48  ;;  %vm2466_vm12 = vcmp.eq.s32.totalorder %v4733_v35, 2  ;;  %v1145_v10 = vor.u32 %v1144_v7, %v1143_v57 }
 0x147   :  { %v1101_v2 = vsel %vm1018_vm10, %v1100_v53, %v1099_v6  ;;  %v1149_v11 = vshll.u32 %v4436_v33, %v1134_v15  ;;  %vm2463_vm13 = vcmp.eq.s32.totalorder %v4733_v35, 0  ;;  %v1109_v19 = vadd.s32 3, %v1105_v56 }
 0x148   :  { %v1104_v63 = vsel %vm4726_vm11, %v4509_v59, %v1101_v2  ;;  %v978_v13 = vsub.s32 0, %v4760_v61  ;;  %vm1155_vm14 = vcmp.lt.s32.totalorder %v4753_v46, 4  ;;  %vm903_vm15 = vcmp.lt.s32.totalorder %v4737_v49, 2 }
 0x149   :  { %vm2462_vm0 = vcmp.lt.s32.totalorder %v4733_v35, 2  ;;  %vm3975_vm1 = vcmp.eq.s32.totalorder %v4626_v22, 1  ;;  %4283 = vcosq.f32 %v1104_v63  ;;  %v1151_v12 = vor.u32 %v1150_v50, %v1149_v11 }
 0x14a   :  { %vm1152_vm2 = vcmp.lt.s32.totalorder %v4753_v46, 1  ;;  %v1161_v15 = vsel %vm1155_vm14, %v1148_v37, 920167782  ;;  %vm900_vm3 = vweird.f32 %v4507_v58  ;;  %4285 = vsinq.f32 %v1104_v63  ;;  %v4842_v63 = vpop.f32.mrf.mxu0 }
 0x14b   :  { %v4049_v14 = vmin.u32 %v978_v13, %v4760_v61  ;;  %vm1154_vm4 = vcmp.lt.s32.totalorder %v4753_v46, 3  ;;  %v1160_v60 = vsel %vm1152_vm2, %v1139_v3, %v1142_v4  ;;  %vm904_vm5 = vcmp.eq.s32.totalorder %v4737_v49, 0 }
 0x14c   :  { %vm907_vm6 = vcmp.eq.s32.totalorder %v4737_v49, 2  ;;  %v4785_v17 = vand.u32 3, %v1105_v56  ;;  %v1162_v44 = vsel %vm1154_vm4, %v1145_v10, %v1161_v15  ;;  %v4789_v26 = vand.u32 3, %v1109_v19 }
 0x14d   :  { %v980_v34 = vclz %v4049_v14  ;;  %vm1153_vm7 = vcmp.lt.s32.totalorder %v4753_v46, 2  ;;  %v4792_v18 = vshll.u32 %v1128_v0, 8  ;;  %v968_v36 = vadd.s32 %v4697_v43, %v4703_v52 }
 0x14e   :  { %v4280_v30 = vpop.eup %4279  ;;  %v1136_v38 = vshrl.u32 %v4432_v23, %v4719_v16  ;;  %v1163_v39 = vsel %vm1153_vm7, %v1160_v60, %v1162_v44  ;;  %v1165_v62 = vsel %vm1155_vm14, %v1151_v12, 1326507024  ;;  %vm914_vm8 = vcmp.lt.s32.totalorder %v4515_v1, 0 }
 0x14f   :  { %v4282_v56 = vpop.eup %4281  ;;  %v908_v32 = vxor.u32 2147483648, %v4280_v30  ;;  %v4050_v54 = vadd.s32 4294967294, %v980_v34  ;;  %v1164_v6 = vsel %vm1152_vm2, %v1142_v4, %v1145_v10  ;;  %v1166_v43 = vsel %vm1154_vm4, %v1148_v37, %v1165_v62 }
 0x150   :  { %v905_v52 = vxor.u32 2147483648, %v4282_v56  ;;  %v1157_v16 = vsel %vm1155_vm14, %v1145_v10, 2102212464  ;;  %v4810_v7 = vmul.u32.u64.low %v4792_v18, %v1163_v39  ;;  %v4811_v41 = vmul.u32.u64.high %v4792_v18, %v1163_v39, %v4810_v7 }
 0x151   :  { %v909_v42 = vsel %vm907_vm6, %v908_v32, %v4282_v56  ;;  %v2468_v45 = vsel %vm2466_vm12, %v908_v32, %v4282_v56  ;;  %vm2672_vm9 = vcmp.eq.s32.totalorder %v4785_v17, 2  ;;  %vm4051_vm10 = vcmp.lt.s32.totalorder %v4050_v54, 0 }
 0x152   :  { %v1156_v47 = vsel %vm1152_vm2, %v1136_v38, %v1139_v3  ;;  %v906_v48 = vsel %vm904_vm5, %v4280_v30, %v905_v52  ;;  %v2465_v53 = vsel %vm2463_vm13, %v4280_v30, %v905_v52  ;;  %vm2669_vm11 = vcmp.eq.s32.totalorder %v4785_v17, 0 }
 0x153   :  { %v983_v57 = vsel %vm4051_vm10, 0, %v4050_v54  ;;  %v1167_v37 = vsel %vm1153_vm7, %v1164_v6, %v1166_v43  ;;  %v910_v50 = vsel %vm903_vm15, %v906_v48, %v909_v42  ;;  %v2469_v0 = vsel %vm2462_vm0, %v2465_v53, %v2468_v45 }
 0x154   :  { %vm2668_vm12 = vcmp.lt.s32.totalorder %v4785_v17, 2  ;;  %vm3977_vm14 = vcmp.eq.s32.totalorder %v4631_v24, 1  ;;  %v984_v3 = vsub.s32 32, %v983_v57  ;;  %v1158_v2 = vsel %vm1154_vm4, %v1142_v4, %v1157_v16 }
 0x155   :  { %v911_v10 = vsel %vm900_vm3, nan, %v910_v50  ;;  %v2470_v11 = vsel %vm900_vm3, nan, %v2469_v0  ;;  %vm1108_vm13 = vweird.f32 %v4509_v59  ;;  %v988_v49 = vsub.s32 4294967266, %v983_v57  ;;  %v4889_v0 = vpop.f32.mrf.mxu1 }
 0x156   :  { %v998_v35 = vsub.s32 4, %v4741_v51  ;;  %v3990_v19 = vsel %vm3975_vm1, %v911_v10, %v2470_v11  ;;  %v986_v13 = vshrl.u32 %v968_v36, %v984_v3  ;;  %v985_v15 = vshll.u32 %v4760_v61, %v983_v57  ;;  %v4284_v44 = vpop.eup %4283 }
 0x157   :  { %v4847_v12 = vmul.u32.u64.low %v4792_v18, %v1167_v37  ;;  %v4848_v4 = vmul.u32.u64.high %v4792_v18, %v1167_v37, %v4847_v12  ;;  %4005 = vst [vmem:[#allocation8] sm:$0xff] %v3990_v19  ;;  %v989_v58 = vadd.s32 127, %v988_v49  ;;  %v1159_v14 = vsel %vm1153_vm7, %v1156_v47, %v1158_v2  ;;  %v4286_v34 = vpop.eup %4285 }
 0x158   :  { %v1178_v60 = vadd.s32 1, %v4811_v41  ;;  %vm1111_vm15 = vcmp.lt.s32.totalorder %v4789_v26, 2  ;;  %vm1112_vm0 = vcmp.eq.s32.totalorder %v4789_v26, 0  ;;  %vm1115_vm1 = vcmp.eq.s32.totalorder %v4789_v26, 2 }
 0x159   :  { %v1227_v22 = vand.u32 2139095040, %v4842_v63  ;;  %v1116_v30 = vxor.u32 2147483648, %v4284_v44  ;;  %v987_v36 = vor.u32 %v986_v13, %v985_v15  ;;  %v990_v38 = vshll.u32 %v989_v58, 23 }
 0x15a   :  { %v999_v46 = vsel %vm914_vm8, %v998_v35, %v4741_v51  ;;  %v1113_v61 = vxor.u32 2147483648, %v4286_v34  ;;  %v1175_v39 = vmul.u32 %v4792_v18, %v1159_v14  ;;  %vm1177_vm2 = vc.u32 %v4848_v4, %v4810_v7 }
 0x15b   :  { %v1224_v62 = vand.u32 2147483647, %v4842_v63  ;;  %v1117_v56 = vsel %vm1115_vm1, %v1116_v30, %v4286_v34  ;;  %v2674_v32 = vsel %vm2672_vm9, %v1116_v30, %v4286_v34  ;;  %v991_v54 = vor.u32 4788187, %v990_v38 }
 0x15c   :  { %v1179_v6 = vsel %vm1177_vm2, %v1178_v60, %v4811_v41  ;;  %v1114_v43 = vsel %vm1112_vm0, %v4284_v44, %v1113_v61  ;;  %v2671_v51 = vsel %vm2669_vm11, %v4284_v44, %v1113_v61  ;;  %v1228_v18 = vshrl.u32 %v1227_v22, 23 }
 0x15d   :  { %v1180_v52 = vadd.s32 %v1179_v6, %v1175_v39  ;;  %v1118_v16 = vsel %vm1111_vm15, %v1114_v43, %v1117_v56  ;;  %v2675_v42 = vsel %vm2668_vm12, %v2671_v51, %v2674_v32  ;;  %v992_v45 = vand.u32 2147483647, %v991_v54 }
 0x15e   :  { %v994_v47 = vcvt.s32.f32 %v987_v36  ;;  %v1119_v48 = vsel %vm1108_vm13, nan, %v1118_v16  ;;  %v2676_v41 = vsel %vm1108_vm13, nan, %v2675_v42  ;;  %v4060_v57 = vadd.s32 4294967169, %v1228_v18 }
 0x15f   :  { %v1181_v53 = vadd.s32 536870912, %v1180_v52  ;;  %v3992_v37 = vsel %vm3977_vm14, %v1119_v48, %v2676_v41  ;;  %vm4884_vm3 = vcmp.le.f32.partialorder %v912_v20, 0.7853982  ;;  %v3921_v50 = vsub.s32 1, %v4599_v21 }
 0x160   :  { %v995_v17 = vmul.f32 %v994_v47, %v992_v45  ;;  %4007 = vst [vmem:[#allocation8 + $0x10] sm:$0xff] %v3992_v37  ;;  %v1001_v59 = vsel %vm4884_vm3, 0, %v999_v46  ;;  %v1231_v24 = vand.u32 8388607, %v1224_v62  ;;  %v1234_v2 = vadd.s32 1, %v4060_v57 }
 0x161   :  { %v1182_v3 = vshrl.u32 %v1181_v53, 30  ;;  %v1435_v20 = vand.u32 2139095040, %v4889_v0  ;;  %v1005_v35 = vadd.s32 3, %v1001_v59  ;;  %v4901_v19 = vrot.slane %v4617_v9, %v3921_v50 }
 0x162   :  { %v996_v10 = vxor.u32 2147483648, %v995_v17  ;;  %vm1235_vm4 = vcmp.gt.s32.totalorder %v1234_v2, 0  ;;  %v1232_v58 = vor.u32 8388608, %v1231_v24  ;;  %v1432_v14 = vand.u32 2147483647, %v4889_v0 }
 0x163   :  { %v1183_v11 = vshll.u32 %v1182_v3, 30  ;;  %v1236_v13 = vsel %vm1235_vm4, %v1234_v2, 0  ;;  %v4909_v60 = vand.u32 3, %v1001_v59  ;;  %vm1122_vm5 = vcmp.lt.s32.totalorder %v4594_v55, 0 }
 0x164   :  { %v997_v49 = vsel %vm914_vm8, %v996_v10, %v995_v17  ;;  %v1238_v44 = vand.u32 31, %v1236_v13  ;;  %v1206_v34 = vsub.s32 4, %v1182_v3  ;;  %v1436_v30 = vshrl.u32 %v1435_v20, 23 }
 0x165   :  { %v1000_v12 = vsel %vm4884_vm3, %v4515_v1, %v997_v49  ;;  %v4906_v15 = vsub.s32 %v1180_v52, %v1183_v11  ;;  %v4913_v36 = vand.u32 3, %v1005_v35  ;;  %v1176_v38 = vadd.s32 %v4810_v7, %v4848_v4 }
 0x166   :  { %4287 = vcosq.f32 %v1000_v12  ;;  %v3929_v46 = vsub.s32 3, %v4599_v21  ;;  %v1239_v61 = vsub.s32 32, %v1238_v44  ;;  %v1237_v56 = vshrl.u32 %v1236_v13, 5 }
 0x167   :  { %4289 = vsinq.f32 %v1000_v12  ;;  %v1186_v22 = vsub.s32 0, %v4906_v15  ;;  %v4919_v32 = vshll.u32 %v1232_v58, 8  ;;  %v4923_v54 = vand.u32 8388607, %v1432_v14 }
 0x168   :  { %v1241_v6 = vshll.u32 %v4432_v23, %v1238_v44  ;;  %v1242_v43 = vshrl.u32 %v4433_v27, %v1239_v61  ;;  %v1244_v51 = vshll.u32 %v4433_v27, %v1238_v44  ;;  %v1245_v7 = vshrl.u32 %v4434_v29, %v1239_v61 }
 0x169   :  { %v4057_v39 = vmin.u32 %v1186_v22, %v4906_v15  ;;  %v4931_v52 = vsel %vm1122_vm5, %v1206_v34, %v1182_v3  ;;  %v1247_v18 = vshll.u32 %v4434_v29, %v1238_v44  ;;  %v4068_v16 = vadd.s32 4294967169, %v1436_v30 }
 0x16a   :  { %v1243_v42 = vor.u32 %v1242_v43, %v1241_v6  ;;  %v1246_v45 = vor.u32 %v1245_v7, %v1244_v51  ;;  %v1248_v47 = vshrl.u32 %v4435_v31, %v1239_v61  ;;  %v1250_v48 = vshll.u32 %v4435_v31, %v1238_v44 }
 0x16b   :  { %v1188_v4 = vclz %v4057_v39  ;;  %vm1011_vm6 = vcmp.eq.s32.totalorder %v4913_v36, 2  ;;  %vm2569_vm7 = vcmp.eq.s32.totalorder %v4909_v60, 2  ;;  %v1251_v53 = vshrl.u32 %v4436_v33, %v1239_v61 }
 0x16c   :  { %v1253_v57 = vshll.u32 %v4436_v33, %v1238_v44  ;;  %v1254_v37 = vshrl.u32 %v4437_v40, %v1239_v61  ;;  %vm1008_vm8 = vcmp.eq.s32.totalorder %v4913_v36, 0  ;;  %vm2566_vm9 = vcmp.eq.s32.totalorder %v4909_v60, 0 }
 0x16d   :  { %v4058_v41 = vadd.s32 4294967294, %v1188_v4  ;;  %v1240_v26 = vshrl.u32 %v4432_v23, %v1239_v61  ;;  %v1249_v17 = vor.u32 %v1248_v47, %v1247_v18  ;;  %vm1256_vm10 = vcmp.lt.s32.totalorder %v1237_v56, 1 }
 0x16e   :  { %vm1257_vm11 = vcmp.lt.s32.totalorder %v1237_v56, 2  ;;  %vm1007_vm12 = vcmp.lt.s32.totalorder %v4913_v36, 2  ;;  %vm2565_vm14 = vcmp.lt.s32.totalorder %v4909_v60, 2  ;;  %vm3976_vm13 = vcmp.eq.s32.totalorder %v4901_v19, 1 }
 0x16f   :  { %vm4059_vm15 = vcmp.lt.s32.totalorder %v4058_v41, 0  ;;  %v1252_v59 = vor.u32 %v1251_v53, %v1250_v48  ;;  %v1255_v3 = vor.u32 %v1254_v37, %v1253_v57  ;;  %vm1259_vm0 = vcmp.lt.s32.totalorder %v1237_v56, 4 }
 0x170   :  { %vm1004_vm1 = vweird.f32 %v4515_v1  ;;  %v1191_v24 = vsel %vm4059_vm15, 0, %v4058_v41  ;;  %vm1258_vm2 = vcmp.lt.s32.totalorder %v1237_v56, 3  ;;  %v1260_v2 = vsel %vm1256_vm10, %v1240_v26, %v1243_v42 }
 0x171   :  { %v1261_v10 = vsel %vm1259_vm0, %v1249_v17, 2102212464  ;;  %v1192_v11 = vsub.s32 32, %v1191_v24  ;;  %v1196_v20 = vsub.s32 4294967266, %v1191_v24  ;;  %v1264_v35 = vsel %vm1256_vm10, %v1243_v42, %v1246_v45 }
 0x172   :  { %v1262_v49 = vsel %vm1258_vm2, %v1246_v45, %v1261_v10  ;;  %v1193_v13 = vshll.u32 %v4906_v15, %v1191_v24  ;;  %v1265_v12 = vsel %vm1259_vm0, %v1252_v59, 920167782  ;;  %v1268_v58 = vsel %vm1256_vm10, %v1246_v45, %v1249_v17 }
 0x173   :  { %v1269_v44 = vsel %vm1259_vm0, %v1255_v3, 1326507024  ;;  %v4288_v22 = vpop.eup %4287  ;;  %v1194_v34 = vshrl.u32 %v1176_v38, %v1192_v11  ;;  %v1197_v30 = vadd.s32 127, %v1196_v20  ;;  %v1266_v61 = vsel %vm1258_vm2, %v1249_v17, %v1265_v12 }
 0x174   :  { %v1270_v39 = vsel %vm1258_vm2, %v1252_v59, %v1269_v44  ;;  %v4290_v6 = vpop.eup %4289  ;;  %v1012_v43 = vxor.u32 2147483648, %v4288_v22  ;;  %v1263_v51 = vsel %vm1257_vm11, %v1260_v2, %v1262_v49  ;;  %v1267_v7 = vsel %vm1257_vm11, %v1264_v35, %v1266_v61 }
 0x175   :  { %v1271_v4 = vsel %vm1257_vm11, %v1268_v58, %v1270_v39  ;;  %v1009_v18 = vxor.u32 2147483648, %v4290_v6  ;;  %v1195_v42 = vor.u32 %v1194_v34, %v1193_v13  ;;  %v1198_v15 = vshll.u32 %v1197_v30, 23 }
 0x176   :  { %v1442_v47 = vadd.s32 1, %v4068_v16  ;;  %v1013_v45 = vsel %vm1011_vm6, %v1012_v43, %v4290_v6  ;;  %v2571_v38 = vsel %vm2569_vm7, %v1012_v43, %v4290_v6  ;;  %vm4984_vm4 = vcmp.le.f32.partialorder %v1120_v28, 0.7853982 }
 0x177   :  { %v4960_v48 = vmul.u32.u64.low %v4919_v32, %v1271_v4  ;;  %v4961_v41 = vmul.u32.u64.high %v4919_v32, %v1271_v4, %v4960_v48  ;;  %v1010_v53 = vsel %vm1008_vm8, %v4288_v22, %v1009_v18  ;;  %v2568_v56 = vsel %vm2566_vm9, %v4288_v22, %v1009_v18 }
 0x178   :  { %v1199_v57 = vor.u32 4788187, %v1198_v15  ;;  %v1202_v37 = vcvt.s32.f32 %v1195_v42  ;;  %v1014_v16 = vsel %vm1007_vm12, %v1010_v53, %v1013_v45  ;;  %v2572_v26 = vsel %vm2565_vm14, %v2568_v56, %v2571_v38 }
 0x179   :  { %v4972_v17 = vmul.u32.u64.low %v4919_v32, %v1267_v7  ;;  %v4973_v59 = vmul.u32.u64.high %v4919_v32, %v1267_v7, %v4972_v17  ;;  %v1015_v3 = vsel %vm1004_vm1, nan, %v1014_v16  ;;  %v2573_v24 = vsel %vm1004_vm1, nan, %v2572_v26 }
 0x17a   :  { %v1200_v2 = vand.u32 2147483647, %v1199_v57  ;;  %vm1443_vm3 = vcmp.gt.s32.totalorder %v1442_v47, 0  ;;  %v3991_v36 = vsel %vm3976_vm13, %v1015_v3, %v2573_v24  ;;  %v4991_v20 = vrot.slane %v4617_v9, %v3929_v46 }
 0x17b   :  { %v1444_v10 = vsel %vm1443_vm3, %v1442_v47, 0  ;;  %4006 = vst [vmem:[#allocation8 + $0x8] sm:$0xff] %v3991_v36  ;;  %vm1281_vm6 = vc.u32 %v4961_v41, %v4972_v17  ;;  %v1209_v19 = vsel %vm4984_vm4, 0, %v4931_v52  ;;  %v1279_v28 = vmul.u32 %v4919_v32, %v1263_v51 }
 0x17c   :  { %v1203_v11 = vmul.f32 %v1202_v37, %v1200_v2  ;;  %v1446_v1 = vand.u32 31, %v1444_v10  ;;  %v1282_v49 = vadd.s32 1, %v4973_v59  ;;  %v1440_v35 = vor.u32 8388608, %v4923_v54 }
 0x17d   :  { %v1445_v12 = vshrl.u32 %v1444_v10, 5  ;;  %v1213_v56 = vadd.s32 3, %v1209_v19  ;;  %v2770_v36 = vand.u32 3, %v1209_v19  ;;  %vm1212_vm10 = vweird.f32 %v4594_v55 }
 0x17e   :  { %v1204_v13 = vxor.u32 2147483648, %v1203_v11  ;;  %v1447_v58 = vsub.s32 32, %v1446_v1  ;;  %v1449_v44 = vshll.u32 %v4432_v23, %v1446_v1  ;;  %v1283_v22 = vsel %vm1281_vm6, %v1282_v49, %v4973_v59 }
 0x17f   :  { %v1452_v34 = vshll.u32 %v4433_v27, %v1446_v1  ;;  %v1455_v30 = vshll.u32 %v4434_v29, %v1446_v1  ;;  %v1458_v61 = vshll.u32 %v4435_v31, %v1446_v1  ;;  %v1284_v52 = vadd.s32 %v1283_v22, %v1279_v28 }
 0x180   :  { %v1205_v32 = vsel %vm1122_vm5, %v1204_v13, %v1203_v11  ;;  %v1450_v39 = vshrl.u32 %v4433_v27, %v1447_v58  ;;  %v1461_v54 = vshll.u32 %v4436_v33, %v1446_v1  ;;  %v1453_v43 = vshrl.u32 %v4434_v29, %v1447_v58 }
 0x181   :  { %v1208_v6 = vsel %vm4984_vm4, %v4594_v55, %v1205_v32  ;;  %v1456_v51 = vshrl.u32 %v4435_v31, %v1447_v58  ;;  %v1459_v7 = vshrl.u32 %v4436_v33, %v1447_v58  ;;  %v1285_v4 = vadd.s32 536870912, %v1284_v52 }
 0x182   :  { %4291 = vcosq.f32 %v1208_v6  ;;  %v1451_v18 = vor.u32 %v1450_v39, %v1449_v44  ;;  %v1462_v42 = vshrl.u32 %v4437_v40, %v1447_v58  ;;  %v1454_v15 = vor.u32 %v1453_v43, %v1452_v34 }
 0x183   :  { %4293 = vsinq.f32 %v1208_v6  ;;  %v1457_v47 = vor.u32 %v1456_v51, %v1455_v30  ;;  %v1460_v45 = vor.u32 %v1459_v7, %v1458_v61  ;;  %v1286_v38 = vshrl.u32 %v1285_v4, 30  ;;  %v5034_v61 = vpop.f32.mrf.mxu0 }
 0x184   :  { %v1448_v48 = vshrl.u32 %v4432_v23, %v1447_v58  ;;  %v1463_v53 = vor.u32 %v1462_v42, %v1461_v54  ;;  %vm1464_vm5 = vcmp.lt.s32.totalorder %v1445_v12, 1  ;;  %vm1467_vm7 = vcmp.lt.s32.totalorder %v1445_v12, 4 }
 0x185   :  { %v1472_v57 = vsel %vm1464_vm5, %v1451_v18, %v1454_v15  ;;  %v1480_v37 = vshll.u32 %v1440_v35, 8  ;;  %v1287_v16 = vshll.u32 %v1286_v38, 30  ;;  %vm1466_vm8 = vcmp.lt.s32.totalorder %v1445_v12, 3 }
 0x186   :  { %v1469_v26 = vsel %vm1467_vm7, %v1457_v47, 2102212464  ;;  %v1473_v59 = vsel %vm1467_vm7, %v1460_v45, 920167782  ;;  %vm1465_vm9 = vcmp.lt.s32.totalorder %v1445_v12, 2  ;;  %v1476_v24 = vsel %vm1464_vm5, %v1454_v15, %v1457_v47 }
 0x187   :  { %v1474_v3 = vsel %vm1466_vm8, %v1457_v47, %v1473_v59  ;;  %v1477_v2 = vsel %vm1467_vm7, %v1463_v53, 1326507024  ;;  %v5018_v60 = vsub.s32 %v1284_v52, %v1287_v16  ;;  %v1468_v10 = vsel %vm1464_vm5, %v1448_v48, %v1451_v18 }
 0x188   :  { %v1475_v11 = vsel %vm1465_vm9, %v1472_v57, %v1474_v3  ;;  %v1470_v1 = vsel %vm1466_vm8, %v1454_v15, %v1469_v26  ;;  %v1478_v28 = vsel %vm1466_vm8, %v1460_v45, %v1477_v2  ;;  %v1214_v35 = vand.u32 3, %v1213_v56 }
 0x189   :  { %v5021_v49 = vmul.u32.u64.low %v1480_v37, %v1475_v11  ;;  %v5022_v13 = vmul.u32.u64.high %v1480_v37, %v1475_v11, %v5021_v49  ;;  %v1290_v58 = vsub.s32 0, %v5018_v60  ;;  %v1479_v44 = vsel %vm1465_vm9, %v1476_v24, %v1478_v28 }
 0x18a   :  { %v5027_v22 = vmul.u32.u64.low %v1480_v37, %v1479_v44  ;;  %v5028_v34 = vmul.u32.u64.high %v1480_v37, %v1479_v44, %v5027_v22  ;;  %vm3978_vm11 = vcmp.eq.s32.totalorder %v4991_v20, 1  ;;  %v1471_v30 = vsel %vm1465_vm9, %v1468_v10, %v1470_v1 }
 0x18b   :  { %v4061_v19 = vmin.u32 %v1290_v58, %v5018_v60  ;;  %vm2771_vm12 = vcmp.lt.s32.totalorder %v2770_v36, 2  ;;  %vm5038_vm14 = vcmp.le.f32.partialorder %v1224_v62, 0.7853982  ;;  %vm1226_vm13 = vcmp.lt.s32.totalorder %v4842_v63, 0 }
 0x18c   :  { %v1310_v52 = vsub.s32 4, %v1286_v38  ;;  %v1490_v39 = vadd.s32 1, %v5022_v13  ;;  %vm1215_vm15 = vcmp.lt.s32.totalorder %v1214_v35, 2  ;;  %vm2772_vm0 = vcmp.eq.s32.totalorder %v2770_v36, 0 }
 0x18d   :  { %vm2775_vm1 = vcmp.eq.s32.totalorder %v2770_v36, 2  ;;  %v1292_v54 = vclz %v4061_v19  ;;  %vm1216_vm2 = vcmp.eq.s32.totalorder %v1214_v35, 0  ;;  %v1487_v6 = vmul.u32 %v1480_v37, %v1471_v30 }
 0x18e   :  { %vm1489_vm3 = vc.u32 %v5028_v34, %v5021_v49  ;;  %v1331_v62 = vand.u32 2139095040, %v5034_v61  ;;  %vm1219_vm4 = vcmp.eq.s32.totalorder %v1214_v35, 2  ;;  %v1311_v42 = vsel %vm1226_vm13, %v1310_v52, %v1286_v38 }
 0x18f   :  { %v4292_v12 = vpop.eup %4291  ;;  %v4062_v7 = vadd.s32 4294967294, %v1292_v54  ;;  %v1491_v4 = vsel %vm1489_vm3, %v1490_v39, %v5022_v13  ;;  %v1328_v47 = vand.u32 2147483647, %v5034_v61  ;;  %v1280_v38 = vadd.s32 %v4972_v17, %v4961_v41 }
 0x190   :  { %v4294_v43 = vpop.eup %4293  ;;  %v1220_v51 = vxor.u32 2147483648, %v4292_v12  ;;  %v1492_v15 = vadd.s32 %v1491_v4, %v1487_v6  ;;  %v1332_v53 = vshrl.u32 %v1331_v62, 23  ;;  %v1313_v36 = vsel %vm5038_vm14, 0, %v1311_v42 }
 0x191   :  { %v1217_v18 = vxor.u32 2147483648, %v4294_v43  ;;  %vm4063_vm6 = vcmp.lt.s32.totalorder %v4062_v7, 0  ;;  %v1335_v58 = vand.u32 8388607, %v1328_v47  ;;  %v3933_v55 = vsub.s32 4, %v4599_v21 }
 0x192   :  { %v1221_v45 = vsel %vm1219_vm4, %v1220_v51, %v4294_v43  ;;  %v2777_v48 = vsel %vm2775_vm1, %v1220_v51, %v4294_v43  ;;  %v1295_v37 = vsel %vm4063_vm6, 0, %v4062_v7  ;;  %v1493_v16 = vadd.s32 536870912, %v1492_v15  ;;  %v5076_v7 = vpop.f32.mrf.mxu1 }
 0x193   :  { %v1218_v56 = vsel %vm1216_vm2, %v4292_v12, %v1217_v18  ;;  %v2774_v57 = vsel %vm2772_vm0, %v4292_v12, %v1217_v18  ;;  %v1296_v3 = vsub.s32 32, %v1295_v37  ;;  %v1300_v10 = vsub.s32 4294967266, %v1295_v37 }
 0x194   :  { %v1222_v26 = vsel %vm1215_vm15, %v1218_v56, %v1221_v45  ;;  %v2778_v59 = vsel %vm2771_vm12, %v2774_v57, %v2777_v48  ;;  %v1494_v11 = vshrl.u32 %v1493_v16, 30  ;;  %v4064_v13 = vadd.s32 4294967169, %v1332_v53 }
 0x195   :  { %v1223_v24 = vsel %vm1212_vm10, nan, %v1222_v26  ;;  %v2779_v2 = vsel %vm1212_vm10, nan, %v2778_v59  ;;  %v1298_v28 = vshrl.u32 %v1280_v38, %v1296_v3  ;;  %v1297_v41 = vshll.u32 %v5018_v60, %v1295_v37 }
 0x196   :  { %v3993_v1 = vsel %vm3978_vm11, %v1223_v24, %v2779_v2  ;;  %v1301_v17 = vadd.s32 127, %v1300_v10  ;;  %v1495_v35 = vshll.u32 %v1494_v11, 30  ;;  %v1338_v44 = vadd.s32 1, %v4064_v13 }
 0x197   :  { %4008 = vst [vmem:[#allocation8 + $0x18] sm:$0xff] %v3993_v1  ;;  %v1299_v22 = vor.u32 %v1298_v28, %v1297_v41  ;;  %v1317_v30 = vadd.s32 3, %v1313_v36  ;;  %v1336_v54 = vor.u32 8388608, %v1335_v58  ;;  %v5073_v60 = vrot.slane %v4617_v9, %v3933_v55 }
 0x198   :  { %v1302_v19 = vshll.u32 %v1301_v17, 23  ;;  %v1496_v20 = vsub.s32 %v1492_v15, %v1495_v35  ;;  %vm1339_vm5 = vcmp.gt.s32.totalorder %v1338_v44, 0  ;;  %v1518_v12 = vsub.s32 4, %v1494_v11 }
 0x199   :  { %v1340_v6 = vsel %vm1339_vm5, %v1338_v44, 0  ;;  %v1306_v43 = vcvt.s32.f32 %v1299_v22  ;;  %vm1434_vm7 = vcmp.lt.s32.totalorder %v4889_v0, 0  ;;  %v5078_v4 = vand.u32 3, %v1317_v30 }
 0x19a   :  { %v1303_v52 = vor.u32 4788187, %v1302_v19  ;;  %v1498_v39 = vsub.s32 0, %v1496_v20  ;;  %v5080_v18 = vand.u32 3, %v1313_v36  ;;  %v3941_v42 = vsub.s32 6, %v4599_v21 }
 0x19b   :  { %v1342_v15 = vand.u32 31, %v1340_v6  ;;  %v1488_v48 = vadd.s32 %v5021_v49, %v5028_v34  ;;  %v5085_v56 = vshll.u32 %v1336_v54, 8  ;;  %v1519_v57 = vsel %vm1434_vm7, %v1518_v12, %v1494_v11 }
 0x19c   :  { %v1304_v62 = vand.u32 2147483647, %v1303_v52  ;;  %v4069_v51 = vmin.u32 %v1498_v39, %v1496_v20  ;;  %v5089_v37 = vshrl.u32 %v1340_v6, 5  ;;  %v1539_v26 = vand.u32 2139095040, %v5076_v7 }
 0x19d   :  { %v1343_v16 = vsub.s32 32, %v1342_v15  ;;  %v1345_v3 = vshll.u32 %v4432_v23, %v1342_v15  ;;  %v1348_v24 = vshll.u32 %v4433_v27, %v1342_v15  ;;  %v1351_v34 = vshll.u32 %v4434_v29, %v1342_v15 }
 0x19e   :  { %v1307_v45 = vmul.f32 %v1306_v43, %v1304_v62  ;;  %v1500_v53 = vclz %v4069_v51  ;;  %v1354_v1 = vshll.u32 %v4435_v31, %v1342_v15  ;;  %v1357_v17 = vshll.u32 %v4436_v33, %v1342_v15 }
 0x19f   :  { %v1346_v2 = vshrl.u32 %v4433_v27, %v1343_v16  ;;  %v1349_v49 = vshrl.u32 %v4434_v29, %v1343_v16  ;;  %v1352_v10 = vshrl.u32 %v4435_v31, %v1343_v16  ;;  %v1355_v28 = vshrl.u32 %v4436_v33, %v1343_v16 }
 0x1a0   :  { %v1308_v59 = vxor.u32 2147483648, %v1307_v45  ;;  %v4070_v38 = vadd.s32 4294967294, %v1500_v53  ;;  %vm5108_vm9 = vcmp.le.f32.partialorder %v1432_v14, 0.7853982  ;;  %v1358_v32 = vshrl.u32 %v4437_v40, %v1343_v16 }
 0x1a1   :  { %v1347_v41 = vor.u32 %v1346_v2, %v1345_v3  ;;  %v1350_v44 = vor.u32 %v1349_v49, %v1348_v24  ;;  %v1353_v19 = vor.u32 %v1352_v10, %v1351_v34  ;;  %v1356_v30 = vor.u32 %v1355_v28, %v1354_v1 }
 0x1a2   :  { %v1309_v11 = vsel %vm1226_vm13, %v1308_v59, %v1307_v45  ;;  %vm4071_vm8 = vcmp.lt.s32.totalorder %v4070_v38, 0  ;;  %v1344_v12 = vshrl.u32 %v4432_v23, %v1343_v16  ;;  %v1359_v6 = vor.u32 %v1358_v32, %v1357_v17 }
 0x1a3   :  { %v1312_v36 = vsel %vm5038_vm14, %v4842_v63, %v1309_v11  ;;  %v1503_v13 = vsel %vm4071_vm8, 0, %v4070_v38  ;;  %vm1360_vm10 = vcmp.lt.s32.totalorder %v5089_v37, 1  ;;  %vm1361_vm11 = vcmp.lt.s32.totalorder %v5089_v37, 2 }
 0x1a4   :  { %4295 = vcosq.f32 %v1312_v36  ;;  %v1504_v35 = vsub.s32 32, %v1503_v13  ;;  %v1508_v58 = vsub.s32 4294967266, %v1503_v13  ;;  %v1505_v52 = vshll.u32 %v1496_v20, %v1503_v13 }
 0x1a5   :  { %4297 = vsinq.f32 %v1312_v36  ;;  %vm1363_vm12 = vcmp.lt.s32.totalorder %v5089_v37, 4  ;;  %v1368_v51 = vsel %vm1360_vm10, %v1347_v41, %v1350_v44  ;;  %vm1362_vm14 = vcmp.lt.s32.totalorder %v5089_v37, 3 }
 0x1a6   :  { %v1506_v39 = vshrl.u32 %v1488_v48, %v1504_v35  ;;  %v1509_v54 = vadd.s32 127, %v1508_v58  ;;  %v1365_v43 = vsel %vm1363_vm12, %v1353_v19, 2102212464  ;;  %v1369_v15 = vsel %vm1363_vm12, %v1356_v30, 920167782 }
 0x1a7   :  { %v1372_v45 = vsel %vm1360_vm10, %v1350_v44, %v1353_v19  ;;  %v1373_v20 = vsel %vm1363_vm12, %v1359_v6, 1326507024  ;;  %v1364_v53 = vsel %vm1360_vm10, %v1344_v12, %v1347_v41  ;;  %v1366_v59 = vsel %vm1362_vm14, %v1350_v44, %v1365_v43 }
 0x1a8   :  { %v1507_v14 = vor.u32 %v1506_v39, %v1505_v52  ;;  %v1510_v62 = vshll.u32 %v1509_v54, 23  ;;  %v1370_v16 = vsel %vm1362_vm14, %v1353_v19, %v1369_v15  ;;  %v1374_v24 = vsel %vm1362_vm14, %v1356_v30, %v1373_v20 }
 0x1a9   :  { %v1371_v3 = vsel %vm1361_vm11, %v1368_v51, %v1370_v16  ;;  %v1540_v2 = vshrl.u32 %v1539_v26, 23  ;;  %v1375_v34 = vsel %vm1361_vm11, %v1372_v45, %v1374_v24  ;;  %vm2874_vm13 = vcmp.lt.s32.totalorder %v5080_v18, 2  ;;  %v5172_v24 = vpop.f32.mrf.mxu0 }
 0x1aa   :  { %v1511_v48 = vor.u32 4788187, %v1510_v62  ;;  %v1514_v38 = vcvt.s32.f32 %v1507_v14  ;;  %v5123_v10 = vmul.u32.u64.low %v5085_v56, %v1371_v3  ;;  %v5124_v11 = vmul.u32.u64.high %v5085_v56, %v1371_v3, %v5123_v10 }
 0x1ab   :  { %vm3979_vm15 = vcmp.eq.s32.totalorder %v5073_v60, 1  ;;  %v5130_v1 = vmul.u32.u64.low %v5085_v56, %v1375_v34  ;;  %v5131_v28 = vmul.u32.u64.high %v5085_v56, %v1375_v34, %v5130_v1  ;;  %v4072_v36 = vadd.s32 4294967169, %v1540_v2 }
 0x1ac   :  { %v1512_v49 = vand.u32 2147483647, %v1511_v48  ;;  %vm2875_vm0 = vcmp.eq.s32.totalorder %v5080_v18, 0  ;;  %v1521_v13 = vsel %vm5108_vm9, 0, %v1519_v57  ;;  %v1367_v41 = vsel %vm1361_vm11, %v1364_v53, %v1366_v59  ;;  %v5168_v59 = vpop.f32.mrf.mxu1 }
 0x1ad   :  { %vm1319_vm1 = vcmp.lt.s32.totalorder %v5078_v4, 2  ;;  %vm2878_vm2 = vcmp.eq.s32.totalorder %v5080_v18, 2  ;;  %v1536_v17 = vand.u32 2147483647, %v5076_v7  ;;  %v1546_v35 = vadd.s32 1, %v4072_v36 }
 0x1ae   :  { %v1515_v26 = vmul.f32 %v1514_v38, %v1512_v49  ;;  %vm1320_vm3 = vcmp.eq.s32.totalorder %v5078_v4, 0  ;;  %vm1323_vm4 = vcmp.eq.s32.totalorder %v5078_v4, 2  ;;  %v1386_v44 = vadd.s32 1, %v5124_v11 }
 0x1af   :  { %v1525_v30 = vadd.s32 3, %v1521_v13  ;;  %v1383_v57 = vmul.u32 %v5085_v56, %v1367_v41  ;;  %vm1385_vm6 = vc.u32 %v5131_v28, %v5123_v10  ;;  %vm1547_vm5 = vcmp.gt.s32.totalorder %v1546_v35, 0  ;;  %v5192_v41 = vpop.f32.mrf.mxu1 }
 0x1b0   :  { %v1516_v58 = vxor.u32 2147483648, %v1515_v26  ;;  %v1387_v39 = vsel %vm1385_vm6, %v1386_v44, %v5124_v11  ;;  %v1548_v54 = vsel %vm1547_vm5, %v1546_v35, 0  ;;  %v1543_v56 = vand.u32 8388607, %v1536_v17 }
 0x1b1   :  { %v4296_v19 = vpop.eup %4295  ;;  %v1388_v14 = vadd.s32 %v1387_v39, %v1383_v57  ;;  %v1550_v51 = vand.u32 31, %v1548_v54  ;;  %v5176_v49 = vand.u32 3, %v1525_v30  ;;  %v5183_v4 = vrot.slane %v4617_v9, %v3941_v42 }
 0x1b2   :  { %v4298_v37 = vpop.eup %4297  ;;  %v1324_v32 = vxor.u32 2147483648, %v4296_v19  ;;  %v1517_v52 = vsel %vm1434_vm7, %v1516_v58, %v1515_v26  ;;  %vm1316_vm7 = vweird.f32 %v4842_v63  ;;  %v5178_v63 = vand.u32 3, %v1521_v13 }
 0x1b3   :  { %v1321_v12 = vxor.u32 2147483648, %v4298_v37  ;;  %v1520_v6 = vsel %vm5108_vm9, %v4889_v0, %v1517_v52  ;;  %v1389_v22 = vadd.s32 536870912, %v1388_v14  ;;  %v1551_v53 = vsub.s32 32, %v1550_v51 }
 0x1b4   :  { %v1325_v62 = vsel %vm1323_vm4, %v1324_v32, %v4298_v37  ;;  %v2880_v43 = vsel %vm2878_vm2, %v1324_v32, %v4298_v37  ;;  %4299 = vcosq.f32 %v1520_v6  ;;  %v1544_v34 = vor.u32 8388608, %v1543_v56  ;;  %v5204_v32 = vpop.f32.mrf.mxu1 }
 0x1b5   :  { %v1322_v15 = vsel %vm1320_vm3, %v4296_v19, %v1321_v12  ;;  %v2877_v45 = vsel %vm2875_vm0, %v4296_v19, %v1321_v12  ;;  %4301 = vsinq.f32 %v1520_v6  ;;  %v5170_v3 = vshrl.u32 %v1389_v22, 30 }
 0x1b6   :  { %v1326_v20 = vsel %vm1319_vm1, %v1322_v15, %v1325_v62  ;;  %v2881_v48 = vsel %vm2874_vm13, %v2877_v45, %v2880_v43  ;;  %v1554_v11 = vshrl.u32 %v4433_v27, %v1551_v53  ;;  %v1557_v1 = vshrl.u32 %v4434_v29, %v1551_v53  ;;  %v4203_v56 = vpop.f32.mrf.mxu1 }
 0x1b7   :  { %v1327_v16 = vsel %vm1316_vm7, nan, %v1326_v20  ;;  %v2882_v38 = vsel %vm1316_vm7, nan, %v2881_v48  ;;  %v1391_v18 = vshll.u32 %v5170_v3, 30  ;;  %v1560_v60 = vshrl.u32 %v4435_v31, %v1551_v53 }
 0x1b8   :  { %v3994_v2 = vsel %vm3979_vm15, %v1327_v16, %v2882_v38  ;;  %v1562_v36 = vshll.u32 %v4435_v31, %v1550_v51  ;;  %v1563_v26 = vshrl.u32 %v4436_v33, %v1551_v53  ;;  %v1643_v13 = vand.u32 2139095040, %v5172_v24 }
 0x1b9   :  { %4009 = vst [vmem:[#allocation8 + $0x20] sm:$0xff] %v3994_v2  ;;  %v5194_v35 = vsub.s32 %v1388_v14, %v1391_v18  ;;  %v5196_v58 = vshrl.u32 %v1548_v54, 5  ;;  %v1553_v44 = vshll.u32 %v4432_v23, %v1550_v51  ;;  %v1556_v19 = vshll.u32 %v4433_v27, %v1550_v51 }
 0x1ba   :  { %vm3081_vm8 = vcmp.eq.s32.totalorder %v5178_v63, 0  ;;  %vm3084_vm9 = vcmp.eq.s32.totalorder %v5178_v63, 2  ;;  %v1559_v30 = vshll.u32 %v4434_v29, %v1550_v51  ;;  %v1564_v57 = vor.u32 %v1563_v26, %v1562_v36 }
 0x1bb   :  { %v1566_v37 = vshrl.u32 %v4437_v40, %v1551_v53  ;;  %vm1527_vm10 = vcmp.lt.s32.totalorder %v5176_v49, 2  ;;  %vm1528_vm11 = vcmp.eq.s32.totalorder %v5176_v49, 0  ;;  %vm3080_vm12 = vcmp.lt.s32.totalorder %v5178_v63, 2 }
 0x1bc   :  { %vm3981_vm14 = vcmp.eq.s32.totalorder %v5183_v4, 1  ;;  %v1394_v52 = vsub.s32 0, %v5194_v35  ;;  %v1555_v39 = vor.u32 %v1554_v11, %v1553_v44  ;;  %v1558_v54 = vor.u32 %v1557_v1, %v1556_v19 }
 0x1bd   :  { %vm1524_vm13 = vweird.f32 %v4889_v0  ;;  %vm1531_vm15 = vcmp.eq.s32.totalorder %v5176_v49, 2  ;;  %v1561_v12 = vor.u32 %v1560_v60, %v1559_v30  ;;  %v1565_v6 = vshll.u32 %v4436_v33, %v1550_v51 }
 0x1be   :  { %v5214_v14 = vshll.u32 %v1544_v34, 8  ;;  %v1384_v62 = vadd.s32 %v5123_v10, %v5131_v28  ;;  %v4065_v43 = vmin.u32 %v1394_v52, %v5194_v35  ;;  %vm1571_vm0 = vcmp.lt.s32.totalorder %v5196_v58, 4 }
 0x1bf   :  { %v1644_v15 = vshrl.u32 %v1643_v13, 23  ;;  %v1552_v45 = vshrl.u32 %v4432_v23, %v1551_v53  ;;  %v1567_v22 = vor.u32 %v1566_v37, %v1565_v6  ;;  %vm1568_vm1 = vcmp.lt.s32.totalorder %v5196_v58, 1 }
 0x1c0   :  { %v1577_v20 = vsel %vm1571_vm0, %v1564_v57, 920167782  ;;  %v1396_v48 = vclz %v4065_v43  ;;  %v1414_v16 = vsub.s32 4, %v5170_v3  ;;  %vm1570_vm2 = vcmp.lt.s32.totalorder %v5196_v58, 3 }
 0x1c1   :  { %v4300_v51 = vpop.eup %4299  ;;  %v1576_v10 = vsel %vm1568_vm1, %v1555_v39, %v1558_v54  ;;  %vm1569_vm3 = vcmp.lt.s32.totalorder %v5196_v58, 2  ;;  %v1572_v2 = vsel %vm1568_vm1, %v1552_v45, %v1555_v39  ;;  %v1578_v53 = vsel %vm1570_vm2, %v1561_v12, %v1577_v20 }
 0x1c2   :  { %v4302_v28 = vpop.eup %4301  ;;  %v1532_v38 = vxor.u32 2147483648, %v4300_v51  ;;  %v4066_v34 = vadd.s32 4294967294, %v1396_v48  ;;  %v1573_v11 = vsel %vm1571_vm0, %v1561_v12, 2102212464  ;;  %v1580_v1 = vsel %vm1568_vm1, %v1558_v54, %v1561_v12 }
 0x1c3   :  { %v1529_v18 = vxor.u32 2147483648, %v4302_v28  ;;  %v1579_v26 = vsel %vm1569_vm3, %v1576_v10, %v1578_v53  ;;  %v1581_v13 = vsel %vm1571_vm0, %v1567_v22, 1326507024  ;;  %vm1330_vm6 = vcmp.lt.s32.totalorder %v5034_v61, 0 }
 0x1c4   :  { %v1533_v60 = vsel %vm1531_vm15, %v1532_v38, %v4302_v28  ;;  %v3086_v36 = vsel %vm3084_vm9, %v1532_v38, %v4302_v28  ;;  %vm4067_vm4 = vcmp.lt.s32.totalorder %v4066_v34, 0  ;;  %v1582_v30 = vsel %vm1570_vm2, %v1564_v57, %v1581_v13 }
 0x1c5   :  { %v1530_v44 = vsel %vm1528_vm11, %v4300_v51, %v1529_v18  ;;  %v3083_v19 = vsel %vm3081_vm8, %v4300_v51, %v1529_v18  ;;  %v1399_v39 = vsel %vm4067_vm4, 0, %v4066_v34  ;;  %v1583_v12 = vsel %vm1569_vm3, %v1580_v1, %v1582_v30 }
 0x1c6   :  { %v1534_v37 = vsel %vm1527_vm10, %v1530_v44, %v1533_v60  ;;  %v3087_v52 = vsel %vm3080_vm12, %v3083_v19, %v3086_v36  ;;  %v1400_v43 = vsub.s32 32, %v1399_v39  ;;  %v1574_v57 = vsel %vm1570_vm2, %v1558_v54, %v1573_v11 }
 0x1c7   :  { %v1535_v6 = vsel %vm1524_vm13, nan, %v1534_v37  ;;  %v3088_v56 = vsel %vm1524_vm13, nan, %v3087_v52  ;;  %v1404_v45 = vsub.s32 4294967266, %v1399_v39  ;;  %v1401_v20 = vshll.u32 %v5194_v35, %v1399_v39 }
 0x1c8   :  { %v3996_v49 = vsel %vm3981_vm14, %v1535_v6, %v3088_v56  ;;  %v5260_v63 = vmul.u32.u64.low %v5214_v14, %v1583_v12  ;;  %v5261_v22 = vmul.u32.u64.high %v5214_v14, %v1583_v12, %v5260_v63  ;;  %v1402_v51 = vshrl.u32 %v1384_v62, %v1400_v43 }
 0x1c9   :  { %4011 = vst [vmem:[#allocation8 + $0x30] sm:$0xff] %v3996_v49  ;;  %v5265_v48 = vmul.u32.u64.low %v5214_v14, %v1579_v26  ;;  %v5266_v0 = vmul.u32.u64.high %v5214_v14, %v1579_v26, %v5265_v48  ;;  %v1405_v54 = vadd.s32 127, %v1404_v45  ;;  %v4076_v10 = vadd.s32 4294967169, %v1644_v15 }
 0x1ca   :  { %v1403_v4 = vor.u32 %v1402_v51, %v1401_v20  ;;  %v1415_v28 = vsel %vm1330_vm6, %v1414_v16, %v5170_v3  ;;  %v1575_v38 = vsel %vm1569_vm3, %v1572_v2, %v1574_v57  ;;  %v1640_v35 = vand.u32 2147483647, %v5172_v24 }
 0x1cb   :  { %v1406_v62 = vshll.u32 %v1405_v54, 23  ;;  %vm1593_vm5 = vc.u32 %v5261_v22, %v5265_v48  ;;  %vm5280_vm7 = vcmp.le.f32.partialorder %v1328_v47, 0.7853982  ;;  %v1594_v15 = vadd.s32 1, %v5266_v0 }
 0x1cc   :  { %v1650_v18 = vadd.s32 1, %v4076_v10  ;;  %v1417_v3 = vsel %vm5280_vm7, 0, %v1415_v28  ;;  %v1591_v58 = vmul.u32 %v5214_v14, %v1575_v38  ;;  %v1410_v16 = vcvt.s32.f32 %v1403_v4 }
 0x1cd   :  { %v1407_v34 = vor.u32 4788187, %v1406_v62  ;;  %v1595_v2 = vsel %vm1593_vm5, %v1594_v15, %v5266_v0  ;;  %v1647_v11 = vand.u32 8388607, %v1640_v35  ;;  %v1851_v36 = vand.u32 2139095040, %v5168_v59 }
 0x1ce   :  { %vm1651_vm8 = vcmp.gt.s32.totalorder %v1650_v18, 0  ;;  %v1596_v1 = vadd.s32 %v1595_v2, %v1591_v58  ;;  %v1421_v19 = vadd.s32 3, %v1417_v3  ;;  %v3937_v30 = vsub.s32 5, %v4599_v21 }
 0x1cf   :  { %v1408_v47 = vand.u32 2147483647, %v1407_v34  ;;  %v1652_v60 = vsel %vm1651_vm8, %v1650_v18, 0  ;;  %v1648_v39 = vor.u32 8388608, %v1647_v11  ;;  %v1852_v12 = vshrl.u32 %v1851_v36, 23 }
 0x1d0   :  { %v1654_v26 = vand.u32 31, %v1652_v60  ;;  %v1597_v44 = vadd.s32 536870912, %v1596_v1  ;;  %v5295_v6 = vshrl.u32 %v1652_v60, 5  ;;  %v5316_v58 = vand.u32 3, %v1417_v3 }
 0x1d1   :  { %v1411_v13 = vmul.f32 %v1410_v16, %v1408_v47  ;;  %v5321_v16 = vrot.slane %v4617_v9, %v3937_v30  ;;  %v5323_v11 = vand.u32 3, %v1421_v19  ;;  %v5330_v3 = vshll.u32 %v1648_v39, 8 }
 0x1d2   :  { %v1655_v37 = vsub.s32 32, %v1654_v26  ;;  %v5293_v52 = vshrl.u32 %v1597_v44, 30  ;;  %v1657_v56 = vshll.u32 %v4432_v23, %v1654_v26  ;;  %v1660_v0 = vshll.u32 %v4433_v27, %v1654_v26 }
 0x1d3   :  { %v1412_v14 = vxor.u32 2147483648, %v1411_v13  ;;  %v1663_v54 = vshll.u32 %v4434_v29, %v1654_v26  ;;  %v1666_v10 = vshll.u32 %v4435_v31, %v1654_v26  ;;  %v1669_v38 = vshll.u32 %v4436_v33, %v1654_v26 }
 0x1d4   :  { %v1658_v43 = vshrl.u32 %v4433_v27, %v1655_v37  ;;  %v1661_v57 = vshrl.u32 %v4434_v29, %v1655_v37  ;;  %v1599_v45 = vshll.u32 %v5293_v52, 30  ;;  %v1664_v63 = vshrl.u32 %v4435_v31, %v1655_v37 }
 0x1d5   :  { %v1413_v49 = vsel %vm1330_vm6, %v1412_v14, %v1411_v13  ;;  %v1667_v20 = vshrl.u32 %v4436_v33, %v1655_v37  ;;  %v1670_v18 = vshrl.u32 %v4437_v40, %v1655_v37  ;;  %vm1672_vm9 = vcmp.lt.s32.totalorder %v5295_v6, 1 }
 0x1d6   :  { %v1416_v51 = vsel %vm5280_vm7, %v5034_v61, %v1413_v49  ;;  %v5311_v4 = vsub.s32 %v1596_v1, %v1599_v45  ;;  %v1659_v28 = vor.u32 %v1658_v43, %v1657_v56  ;;  %v1662_v62 = vor.u32 %v1661_v57, %v1660_v0 }
 0x1d7   :  { %4303 = vcosq.f32 %v1416_v51  ;;  %v1668_v15 = vor.u32 %v1667_v20, %v1666_v10  ;;  %v1665_v34 = vor.u32 %v1664_v63, %v1663_v54  ;;  %v1671_v2 = vor.u32 %v1670_v18, %v1669_v38 }
 0x1d8   :  { %4305 = vsinq.f32 %v1416_v51  ;;  %v1602_v53 = vsub.s32 0, %v5311_v4  ;;  %vm1675_vm10 = vcmp.lt.s32.totalorder %v5295_v6, 4  ;;  %v1680_v1 = vsel %vm1672_vm9, %v1659_v28, %v1662_v62 }
 0x1d9   :  { %v1681_v60 = vsel %vm1675_vm10, %v1668_v15, 920167782  ;;  %v4084_v36 = vadd.s32 4294967169, %v1852_v12  ;;  %v1656_v13 = vshrl.u32 %v4432_v23, %v1655_v37  ;;  %vm1674_vm11 = vcmp.lt.s32.totalorder %v5295_v6, 3 }
 0x1da   :  { %v4073_v47 = vmin.u32 %v1602_v53, %v5311_v4  ;;  %v1677_v44 = vsel %vm1675_vm10, %v1665_v34, 2102212464  ;;  %vm2981_vm12 = vcmp.eq.s32.totalorder %v5316_v58, 2  ;;  %vm1673_vm14 = vcmp.lt.s32.totalorder %v5295_v6, 2 }
 0x1db   :  { %v1682_v19 = vsel %vm1674_vm11, %v1665_v34, %v1681_v60  ;;  %v1684_v14 = vsel %vm1672_vm9, %v1662_v62, %v1665_v34  ;;  %v1685_v56 = vsel %vm1675_vm10, %v1671_v2, 1326507024  ;;  %vm2978_vm13 = vcmp.eq.s32.totalorder %v5316_v58, 0 }
 0x1dc   :  { %v1604_v26 = vclz %v4073_v47  ;;  %v1676_v12 = vsel %vm1672_vm9, %v1656_v13, %v1659_v28  ;;  %v1683_v37 = vsel %vm1673_vm14, %v1680_v1, %v1682_v19  ;;  %v1686_v43 = vsel %vm1674_vm11, %v1668_v15, %v1685_v56 }
 0x1dd   :  { %vm2977_vm15 = vcmp.lt.s32.totalorder %v5316_v58, 2  ;;  %vm3980_vm0 = vcmp.eq.s32.totalorder %v5321_v16, 1  ;;  %v1678_v57 = vsel %vm1674_vm11, %v1662_v62, %v1677_v44  ;;  %v1687_v49 = vsel %vm1673_vm14, %v1684_v14, %v1686_v43 }
 0x1de   :  { %v4074_v39 = vadd.s32 4294967294, %v1604_v26  ;;  %v5348_v45 = vmul.u32.u64.low %v5330_v3, %v1683_v37  ;;  %v5349_v63 = vmul.u32.u64.high %v5330_v3, %v1683_v37, %v5348_v45  ;;  %vm1420_vm1 = vweird.f32 %v5034_v61 }
 0x1df   :  { %v5354_v20 = vmul.u32.u64.low %v5330_v3, %v1687_v49  ;;  %v5355_v51 = vmul.u32.u64.high %v5330_v3, %v1687_v49, %v5354_v20  ;;  %v1858_v0 = vadd.s32 1, %v4084_v36  ;;  %vm1423_vm3 = vcmp.lt.s32.totalorder %v5323_v11, 2 }
 0x1e0   :  { %vm4075_vm2 = vcmp.lt.s32.totalorder %v4074_v39, 0  ;;  %vm1424_vm4 = vcmp.eq.s32.totalorder %v5323_v11, 0  ;;  %vm1538_vm6 = vcmp.lt.s32.totalorder %v5076_v7, 0  ;;  %v1592_v54 = vadd.s32 %v5265_v48, %v5261_v22 }
 0x1e1   :  { %v1607_v10 = vsel %vm4075_vm2, 0, %v4074_v39  ;;  %v1679_v62 = vsel %vm1673_vm14, %v1676_v12, %v1678_v57  ;;  %vm1859_vm5 = vcmp.gt.s32.totalorder %v1858_v0, 0  ;;  %vm1427_vm7 = vcmp.eq.s32.totalorder %v5323_v11, 2 }
 0x1e2   :  { %v1608_v28 = vsub.s32 32, %v1607_v10  ;;  %v1612_v38 = vsub.s32 4294967266, %v1607_v10  ;;  %v1622_v18 = vsub.s32 4, %v5293_v52  ;;  %v1698_v53 = vadd.s32 1, %v5349_v63 }
 0x1e3   :  { %v1860_v34 = vsel %vm1859_vm5, %v1858_v0, 0  ;;  %v1609_v1 = vshll.u32 %v5311_v4, %v1607_v10  ;;  %v1695_v36 = vmul.u32 %v5330_v3, %v1679_v62  ;;  %vm1697_vm8 = vc.u32 %v5355_v51, %v5348_v45  ;;  %v805_v62 = vld [vmem:[#allocation7 + $0x8] sm:$0xff] }
 0x1e4   :  { %v4304_v15 = vpop.eup %4303  ;;  %v1610_v22 = vshrl.u32 %v1592_v54, %v1608_v28  ;;  %v1613_v48 = vadd.s32 127, %v1612_v38  ;;  %v1862_v6 = vand.u32 31, %v1860_v34  ;;  %v1699_v56 = vsel %vm1697_vm8, %v1698_v53, %v5349_v63 }
 0x1e5   :  { %v4306_v2 = vpop.eup %4305  ;;  %v1428_v47 = vxor.u32 2147483648, %v4304_v15  ;;  %vm5384_vm9 = vcmp.le.f32.partialorder %v1536_v17, 0.7853982  ;;  %v1700_v63 = vadd.s32 %v1699_v56, %v1695_v36  ;;  %v1848_v11 = vand.u32 2147483647, %v5168_v59 }
 0x1e6   :  { %v1425_v60 = vxor.u32 2147483648, %v4306_v2  ;;  %v1611_v44 = vor.u32 %v1610_v22, %v1609_v1  ;;  %v1614_v19 = vshll.u32 %v1613_v48, 23  ;;  %v1863_v39 = vsub.s32 32, %v1862_v6 }
 0x1e7   :  { %v1429_v26 = vsel %vm1427_vm7, %v1428_v47, %v4306_v2  ;;  %v2983_v13 = vsel %vm2981_vm12, %v1428_v47, %v4306_v2  ;;  %v1623_v17 = vsel %vm1538_vm6, %v1622_v18, %v5293_v52  ;;  %v1701_v54 = vadd.s32 536870912, %v1700_v63 }
 0x1e8   :  { %v1426_v14 = vsel %vm1424_vm4, %v4304_v15, %v1425_v60  ;;  %v2980_v4 = vsel %vm2978_vm13, %v4304_v15, %v1425_v60  ;;  %v1615_v43 = vor.u32 4788187, %v1614_v19  ;;  %v1618_v0 = vcvt.s32.f32 %v1611_v44 }
 0x1e9   :  { %v1430_v3 = vsel %vm1423_vm3, %v1426_v14, %v1429_v26  ;;  %v2984_v12 = vsel %vm2977_vm15, %v2980_v4, %v2983_v13  ;;  %v1865_v10 = vshll.u32 %v4432_v23, %v1862_v6  ;;  %v1866_v28 = vshrl.u32 %v4433_v27, %v1863_v39 }
 0x1ea   :  { %v1431_v57 = vsel %vm1420_vm1, nan, %v1430_v3  ;;  %v2985_v49 = vsel %vm1420_vm1, nan, %v2984_v12  ;;  %v1616_v20 = vand.u32 2147483647, %v1615_v43  ;;  %v1868_v61 = vshll.u32 %v4433_v27, %v1862_v6 }
 0x1eb   :  { %v3995_v58 = vsel %vm3980_vm0, %v1431_v57, %v2985_v49  ;;  %v1869_v15 = vshrl.u32 %v4434_v29, %v1863_v39  ;;  %v1871_v16 = vshll.u32 %v4434_v29, %v1862_v6  ;;  %v1874_v53 = vshll.u32 %v4435_v31, %v1862_v6 }
 0x1ec   :  { %4010 = vst [vmem:[#allocation8 + $0x28] sm:$0xff] %v3995_v58  ;;  %v1619_v38 = vmul.f32 %v1618_v0, %v1616_v20  ;;  %v5404_v2 = vshrl.u32 %v1701_v54, 30  ;;  %v1872_v52 = vshrl.u32 %v4435_v31, %v1863_v39  ;;  %v1875_v18 = vshrl.u32 %v4436_v33, %v1863_v39 }
 0x1ed   :  { %v1877_v47 = vshll.u32 %v4436_v33, %v1862_v6  ;;  %v3945_v22 = vsub.s32 7, %v4599_v21  ;;  %v1855_v48 = vand.u32 8388607, %v1848_v11  ;;  %v1878_v60 = vshrl.u32 %v4437_v40, %v1863_v39 }
 0x1ee   :  { %v1620_v1 = vxor.u32 2147483648, %v1619_v38  ;;  %v1625_v36 = vsel %vm5384_vm9, 0, %v1623_v17  ;;  %vm807_vm10 = vcmp.eq.f32.partialorder %v805_v62, 1.0  ;;  %v1703_v26 = vshll.u32 %v5404_v2, 30  ;;  %v5435_v17 = vpop.f32.mrf.mxu0 }
 0x1ef   :  { %v1861_v13 = vshrl.u32 %v1860_v34, 5  ;;  %v1867_v19 = vor.u32 %v1866_v28, %v1865_v10  ;;  %v1876_v6 = vor.u32 %v1875_v18, %v1874_v53  ;;  %v1879_v14 = vor.u32 %v1878_v60, %v1877_v47 }
 0x1f0   :  { %v1621_v44 = vsel %vm1538_vm6, %v1620_v1, %v1619_v38  ;;  %v5421_v56 = vsub.s32 %v1700_v63, %v1703_v26  ;;  %v1870_v3 = vor.u32 %v1869_v15, %v1868_v61  ;;  %v1873_v12 = vor.u32 %v1872_v52, %v1871_v16 }
 0x1f1   :  { %v1624_v4 = vsel %vm5384_vm9, %v5076_v7, %v1621_v44  ;;  %v5424_v43 = vrot.slane %v4617_v9, %v3945_v22  ;;  %v5427_v34 = vsel %vm807_vm10, 1, %v4438_v8  ;;  %v1856_v57 = vor.u32 8388608, %v1855_v48 }
 0x1f2   :  { %4307 = vcosq.f32 %v1624_v4  ;;  %v1629_v49 = vadd.s32 3, %v1625_v36  ;;  %v1706_v58 = vsub.s32 0, %v5421_v56  ;;  %vm1883_vm11 = vcmp.lt.s32.totalorder %v1861_v13, 4 }
 0x1f3   :  { %4309 = vsinq.f32 %v1624_v4  ;;  %v1864_v37 = vshrl.u32 %v4432_v23, %v1863_v39  ;;  %vm1880_vm12 = vcmp.lt.s32.totalorder %v1861_v13, 1  ;;  %v1889_v63 = vsel %vm1883_vm11, %v1876_v6, 920167782 }
 0x1f4   :  { %v1893_v20 = vsel %vm1883_vm11, %v1879_v14, 1326507024  ;;  %vm1642_vm14 = vcmp.lt.s32.totalorder %v5172_v24, 0  ;;  %v4077_v0 = vmin.u32 %v1706_v58, %v5421_v56  ;;  %vm1882_vm13 = vcmp.lt.s32.totalorder %v1861_v13, 3 }
 0x1f5   :  { %v1888_v9 = vsel %vm1880_vm12, %v1867_v19, %v1870_v3  ;;  %v1892_v8 = vsel %vm1880_vm12, %v1870_v3, %v1873_v12  ;;  %v5437_v54 = vand.u32 3, %v1625_v36  ;;  %v1885_v10 = vsel %vm1883_vm11, %v1873_v12, 2102212464 }
 0x1f6   :  { %v1890_v28 = vsel %vm1882_vm13, %v1873_v12, %v1889_v63  ;;  %v1894_v39 = vsel %vm1882_vm13, %v1876_v6, %v1893_v20  ;;  %v1630_v61 = vand.u32 3, %v1629_v49  ;;  %v1708_v38 = vclz %v4077_v0 }
 0x1f7   :  { %vm1881_vm15 = vcmp.lt.s32.totalorder %v1861_v13, 2  ;;  %v1896_v62 = vshll.u32 %v1856_v57, 8  ;;  %v1884_v15 = vsel %vm1880_vm12, %v1864_v37, %v1867_v19  ;;  %v1747_v52 = vand.u32 2139095040, %v5435_v17 }
 0x1f8   :  { %v1891_v16 = vsel %vm1881_vm15, %v1888_v9, %v1890_v28  ;;  %v1895_v53 = vsel %vm1881_vm15, %v1892_v8, %v1894_v39  ;;  %vm5447_vm0 = vcmp.le.f32.partialorder %v1640_v35, 0.7853982  ;;  %v4078_v47 = vadd.s32 4294967294, %v1708_v38 }
 0x1f9   :  { %v1886_v1 = vsel %vm1882_vm13, %v1870_v3, %v1885_v10  ;;  %v5452_v22 = vmul.u32.u64.low %v1896_v62, %v1895_v53  ;;  %v5453_v48 = vmul.u32.u64.high %v1896_v62, %v1895_v53, %v5452_v22  ;;  %v1726_v60 = vsub.s32 4, %v5404_v2 }
 0x1fa   :  { %v5456_v36 = vmul.u32.u64.low %v1896_v62, %v1891_v16  ;;  %v5457_v26 = vmul.u32.u64.high %v1896_v62, %v1891_v16, %v5456_v36  ;;  %v1748_v44 = vshrl.u32 %v1747_v52, 23  ;;  %vm1631_vm1 = vcmp.lt.s32.totalorder %v1630_v61, 2 }
 0x1fb   :  { %vm3183_vm2 = vcmp.lt.s32.totalorder %v5437_v54, 2  ;;  %vm3184_vm3 = vcmp.eq.s32.totalorder %v5437_v54, 0  ;;  %vm3187_vm4 = vcmp.eq.s32.totalorder %v5437_v54, 2  ;;  %vm3982_vm6 = vcmp.eq.s32.totalorder %v5424_v43, 1 }
 0x1fc   :  { %vm4079_vm5 = vcmp.lt.s32.totalorder %v4078_v47, 0  ;;  %vm1628_vm7 = vweird.f32 %v5076_v7  ;;  %vm1632_vm8 = vcmp.eq.s32.totalorder %v1630_v61, 0  ;;  %v1887_v19 = vsel %vm1881_vm15, %v1884_v15, %v1886_v1 }
 0x1fd   :  { %v1711_v35 = vsel %vm4079_vm5, 0, %v4078_v47  ;;  %v4080_v6 = vadd.s32 4294967169, %v1748_v44  ;;  %v1696_v14 = vadd.s32 %v5348_v45, %v5355_v51  ;;  %v1744_v12 = vand.u32 2147483647, %v5435_v17 }
 0x1fe   :  { %v1712_v4 = vsub.s32 32, %v1711_v35  ;;  %v1716_v3 = vsub.s32 4294967266, %v1711_v35  ;;  %v1727_v57 = vsel %vm1642_vm14, %v1726_v60, %v5404_v2  ;;  %vm1905_vm9 = vc.u32 %v5453_v48, %v5456_v36 }
 0x1ff   :  { %v1906_v49 = vadd.s32 1, %v5457_v26  ;;  %v1754_v58 = vadd.s32 1, %v4080_v6  ;;  %v4308_v13 = vpop.eup %4307  ;;  %v1713_v37 = vshll.u32 %v5421_v56, %v1711_v35  ;;  %v1903_v45 = vmul.u32 %v1896_v62, %v1887_v19 }
 0x200   :  { %v1714_v63 = vshrl.u32 %v1696_v14, %v1712_v4  ;;  %v1717_v20 = vadd.s32 127, %v1716_v3  ;;  %v4310_v51 = vpop.eup %4309  ;;  %vm1635_vm10 = vcmp.eq.s32.totalorder %v1630_v61, 2  ;;  %v1636_v0 = vxor.u32 2147483648, %v4308_v13 }
 0x201   :  { %v1907_v9 = vsel %vm1905_vm9, %v1906_v49, %v5457_v26  ;;  %vm1755_vm11 = vcmp.gt.s32.totalorder %v1754_v58, 0  ;;  %v1633_v8 = vxor.u32 2147483648, %v4310_v51  ;;  %v1729_v56 = vsel %vm5447_vm0, 0, %v1727_v57 }
 0x202   :  { %v1715_v2 = vor.u32 %v1714_v63, %v1713_v37  ;;  %v1718_v10 = vshll.u32 %v1717_v20, 23  ;;  %v1908_v28 = vadd.s32 %v1907_v9, %v1903_v45  ;;  %v1637_v39 = vsel %vm1635_vm10, %v1636_v0, %v4310_v51 }
 0x203   :  { %v3189_v38 = vsel %vm3187_vm4, %v1636_v0, %v4310_v51  ;;  %v1756_v15 = vsel %vm1755_vm11, %v1754_v58, 0  ;;  %v1634_v62 = vsel %vm1632_vm8, %v4308_v13, %v1633_v8  ;;  %v3186_v16 = vsel %vm3184_vm3, %v4308_v13, %v1633_v8 }
 0x204   :  { %v1719_v53 = vor.u32 4788187, %v1718_v10  ;;  %v1751_v52 = vand.u32 8388607, %v1744_v12  ;;  %v1638_v47 = vsel %vm1631_vm1, %v1634_v62, %v1637_v39  ;;  %v3190_v1 = vsel %vm3183_vm2, %v3186_v16, %v3189_v38 }
 0x205   :  { %v1722_v22 = vcvt.s32.f32 %v1715_v2  ;;  %v1909_v60 = vadd.s32 536870912, %v1908_v28  ;;  %v1639_v26 = vsel %vm1628_vm7, nan, %v1638_v47  ;;  %v3191_v44 = vsel %vm1628_vm7, nan, %v3190_v1 }
 0x206   :  { %v1720_v35 = vand.u32 2147483647, %v1719_v53  ;;  %v1758_v19 = vand.u32 31, %v1756_v15  ;;  %v3997_v6 = vsel %vm3982_vm6, %v1639_v26, %v3191_v44  ;;  %v1955_v61 = vand.u32 2139095040, %v5192_v41 }
 0x207   :  { %v5495_v14 = vshrl.u32 %v1909_v60, 30  ;;  %4012 = vst [vmem:[#allocation8 + $0x38] sm:$0xff] %v3997_v6  ;;  %v1733_v3 = vadd.s32 3, %v1729_v56  ;;  %v5498_v57 = vand.u32 3, %v1729_v56  ;;  %v5503_v7 = vrot.slane %v5427_v34, %v3917_v25 }
 0x208   :  { %v1723_v54 = vmul.f32 %v1722_v22, %v1720_v35  ;;  %v1759_v4 = vsub.s32 32, %v1758_v19  ;;  %v1752_v43 = vor.u32 8388608, %v1751_v52  ;;  %v1956_v51 = vshrl.u32 %v1955_v61, 23 }
 0x209   :  { %v1911_v49 = vshll.u32 %v5495_v14, 30  ;;  %v1757_v25 = vshrl.u32 %v1756_v15, 5  ;;  %v1761_v9 = vshll.u32 %v4432_v23, %v1758_v19  ;;  %v1764_v8 = vshll.u32 %v4433_v27, %v1758_v19 }
 0x20a   :  { %v1724_v58 = vxor.u32 2147483648, %v1723_v54  ;;  %v1762_v13 = vshrl.u32 %v4433_v27, %v1759_v4  ;;  %v1765_v37 = vshrl.u32 %v4434_v29, %v1759_v4  ;;  %v1768_v20 = vshrl.u32 %v4435_v31, %v1759_v4 }
 0x20b   :  { %v5508_v63 = vsub.s32 %v1908_v28, %v1911_v49  ;;  %v1771_v45 = vshrl.u32 %v4436_v33, %v1759_v4  ;;  %v1767_v28 = vshll.u32 %v4434_v29, %v1758_v19  ;;  %v1770_v39 = vshll.u32 %v4435_v31, %v1758_v19 }
 0x20c   :  { %v1725_v0 = vsel %vm1642_vm14, %v1724_v58, %v1723_v54  ;;  %v5522_v38 = vand.u32 3, %v1733_v3  ;;  %v1763_v56 = vor.u32 %v1762_v13, %v1761_v9  ;;  %v1766_v62 = vor.u32 %v1765_v37, %v1764_v8 }
 0x20d   :  { %v1728_v2 = vsel %vm5447_vm0, %v5172_v24, %v1725_v0  ;;  %v1914_v10 = vsub.s32 0, %v5508_v63  ;;  %v1769_v16 = vor.u32 %v1768_v20, %v1767_v28  ;;  %v1772_v53 = vor.u32 %v1771_v45, %v1770_v39 }
 0x20e   :  { %4311 = vcosq.f32 %v1728_v2  ;;  %v1773_v52 = vshll.u32 %v4436_v33, %v1758_v19  ;;  %v1774_v18 = vshrl.u32 %v4437_v40, %v1759_v4  ;;  %v5527_v47 = vshll.u32 %v1752_v43, 8 }
 0x20f   :  { %4313 = vsinq.f32 %v1728_v2  ;;  %v4085_v15 = vmin.u32 %v1914_v10, %v5508_v63  ;;  %v4088_v1 = vadd.s32 4294967169, %v1956_v51  ;;  %vm1850_vm12 = vcmp.lt.s32.totalorder %v5168_v59, 0 }
 0x210   :  { %v1760_v60 = vshrl.u32 %v4432_v23, %v1759_v4  ;;  %vm1776_vm14 = vcmp.lt.s32.totalorder %v1757_v25, 1  ;;  %vm1777_vm13 = vcmp.lt.s32.totalorder %v1757_v25, 2  ;;  %v1775_v26 = vor.u32 %v1774_v18, %v1773_v52 }
 0x211   :  { %v1916_v22 = vclz %v4085_v15  ;;  %vm1778_vm15 = vcmp.lt.s32.totalorder %v1757_v25, 3  ;;  %vm1779_vm0 = vcmp.lt.s32.totalorder %v1757_v25, 4  ;;  %v1784_v44 = vsel %vm1776_vm14, %v1763_v56, %v1766_v62 }
 0x212   :  { %v1781_v6 = vsel %vm1779_vm0, %v1769_v16, 2102212464  ;;  %v1785_v61 = vsel %vm1779_vm0, %v1772_v53, 920167782  ;;  %v1788_v19 = vsel %vm1776_vm14, %v1766_v62, %v1769_v16  ;;  %vm5533_vm1 = vcmp.le.f32.partialorder %v1848_v11, 0.7853982 }
 0x213   :  { %v4086_v35 = vadd.s32 4294967294, %v1916_v22  ;;  %v1934_v3 = vsub.s32 4, %v5495_v14  ;;  %v1780_v49 = vsel %vm1776_vm14, %v1760_v60, %v1763_v56  ;;  %v1786_v4 = vsel %vm1778_vm15, %v1769_v16, %v1785_v61 }
 0x214   :  { %v1789_v58 = vsel %vm1779_vm0, %v1775_v26, 1326507024  ;;  %v1782_v43 = vsel %vm1778_vm15, %v1766_v62, %v1781_v6  ;;  %v1787_v13 = vsel %vm1777_vm13, %v1784_v44, %v1786_v4  ;;  %vm3287_vm3 = vcmp.eq.s32.totalorder %v5498_v57, 0 }
 0x215   :  { %vm4087_vm2 = vcmp.lt.s32.totalorder %v4086_v35, 0  ;;  %v1790_v37 = vsel %vm1778_vm15, %v1772_v53, %v1789_v58  ;;  %v5542_v11 = vmul.u32.u64.low %v5527_v47, %v1787_v13  ;;  %v5543_v51 = vmul.u32.u64.high %v5527_v47, %v1787_v13, %v5542_v11 }
 0x216   :  { %v1919_v20 = vsel %vm4087_vm2, 0, %v4086_v35  ;;  %v1791_v45 = vsel %vm1777_vm13, %v1788_v19, %v1790_v37  ;;  %vm3286_vm4 = vcmp.lt.s32.totalorder %v5498_v57, 2  ;;  %vm3290_vm6 = vcmp.eq.s32.totalorder %v5498_v57, 2 }
 0x217   :  { %vm3983_vm5 = vcmp.eq.s32.totalorder %v5503_v7, 1  ;;  %v1904_v0 = vadd.s32 %v5456_v36, %v5453_v48  ;;  %v1920_v9 = vsub.s32 32, %v1919_v20  ;;  %v1924_v8 = vsub.s32 4294967266, %v1919_v20 }
 0x218   :  { %vm1732_vm7 = vweird.f32 %v5172_v24  ;;  %vm1735_vm8 = vcmp.lt.s32.totalorder %v5522_v38, 2  ;;  %v5554_v2 = vmul.u32.u64.low %v5527_v47, %v1791_v45  ;;  %v5555_v10 = vmul.u32.u64.high %v5527_v47, %v1791_v45, %v5554_v2 }
 0x219   :  { %v1962_v28 = vadd.s32 1, %v4088_v1  ;;  %v1921_v39 = vshll.u32 %v5508_v63, %v1919_v20  ;;  %v1922_v56 = vshrl.u32 %v1904_v0, %v1920_v9  ;;  %v1925_v62 = vadd.s32 127, %v1924_v8 }
 0x21a   :  { %v1783_v15 = vsel %vm1777_vm13, %v1780_v49, %v1782_v43  ;;  %vm1736_vm9 = vcmp.eq.s32.totalorder %v5522_v38, 0  ;;  %v1935_v48 = vsel %vm1850_vm12, %v1934_v3, %v5495_v14  ;;  %v1802_v36 = vadd.s32 1, %v5543_v51 }
 0x21b   :  { %vm1963_vm10 = vcmp.gt.s32.totalorder %v1962_v28, 0  ;;  %v4312_v16 = vpop.eup %4311  ;;  %vm1739_vm11 = vcmp.eq.s32.totalorder %v5522_v38, 2  ;;  %v1923_v53 = vor.u32 %v1922_v56, %v1921_v39  ;;  %v1926_v52 = vshll.u32 %v1925_v62, 23 }
 0x21c   :  { %v1964_v18 = vsel %vm1963_vm10, %v1962_v28, 0  ;;  %v4314_v63 = vpop.eup %4313  ;;  %v1740_v1 = vxor.u32 2147483648, %v4312_v16  ;;  %v1799_v25 = vmul.u32 %v5527_v47, %v1783_v15  ;;  %vm1801_vm14 = vc.u32 %v5555_v10, %v5542_v11 }
 0x21d   :  { %v1952_v22 = vand.u32 2147483647, %v5192_v41  ;;  %v1737_v60 = vxor.u32 2147483648, %v4314_v63  ;;  %v1927_v14 = vor.u32 4788187, %v1926_v52  ;;  %v1937_v26 = vsel %vm5533_vm1, 0, %v1935_v48 }
 0x21e   :  { %v1803_v44 = vsel %vm1801_vm14, %v1802_v36, %v5543_v51  ;;  %v1741_v35 = vsel %vm1739_vm11, %v1740_v1, %v4314_v63  ;;  %v3292_v6 = vsel %vm3290_vm6, %v1740_v1, %v4314_v63  ;;  %v1966_v19 = vand.u32 31, %v1964_v18 }
 0x21f   :  { %v1804_v61 = vadd.s32 %v1803_v44, %v1799_v25  ;;  %v1738_v47 = vsel %vm1736_vm9, %v4312_v16, %v1737_v60  ;;  %v3289_v3 = vsel %vm3287_vm3, %v4312_v16, %v1737_v60  ;;  %v1928_v49 = vand.u32 2147483647, %v1927_v14 }
 0x220   :  { %v1930_v4 = vcvt.s32.f32 %v1923_v53  ;;  %v1742_v58 = vsel %vm1735_vm8, %v1738_v47, %v1741_v35  ;;  %v3293_v43 = vsel %vm3286_vm4, %v3289_v3, %v3292_v6  ;;  %v1967_v37 = vsub.s32 32, %v1966_v19 }
 0x221   :  { %v1805_v13 = vadd.s32 536870912, %v1804_v61  ;;  %v1743_v20 = vsel %vm1732_vm7, nan, %v1742_v58  ;;  %v3294_v45 = vsel %vm1732_vm7, nan, %v3293_v43  ;;  %v1959_v0 = vand.u32 8388607, %v1952_v22 }
 0x222   :  { %v1931_v51 = vmul.f32 %v1930_v4, %v1928_v49  ;;  %v3998_v9 = vsel %vm3983_vm5, %v1743_v20, %v3294_v45  ;;  %v1941_v8 = vadd.s32 3, %v1937_v26  ;;  %v1970_v28 = vshrl.u32 %v4433_v27, %v1967_v37 }
 0x223   :  { %v5590_v38 = vshrl.u32 %v1805_v13, 30  ;;  %4013 = vst [vmem:[#allocation8 + $0x40] sm:$0xff] %v3998_v9  ;;  %v1976_v39 = vshrl.u32 %v4435_v31, %v1967_v37  ;;  %v1960_v56 = vor.u32 8388608, %v1959_v0  ;;  %v1973_v62 = vshrl.u32 %v4434_v29, %v1967_v37 }
 0x224   :  { %v1932_v57 = vxor.u32 2147483648, %v1931_v51  ;;  %v1979_v7 = vshrl.u32 %v4436_v33, %v1967_v37  ;;  %v1969_v36 = vshll.u32 %v4432_v23, %v1966_v19  ;;  %v1975_v16 = vshll.u32 %v4434_v29, %v1966_v19 }
 0x225   :  { %v1807_v2 = vshll.u32 %v5590_v38, 30  ;;  %v1965_v53 = vshrl.u32 %v1964_v18, 5  ;;  %v1972_v52 = vshll.u32 %v4433_v27, %v1966_v19  ;;  %v1978_v63 = vshll.u32 %v4435_v31, %v1966_v19 }
 0x226   :  { %v1933_v24 = vsel %vm1850_vm12, %v1932_v57, %v1931_v51  ;;  %v1971_v25 = vor.u32 %v1970_v28, %v1969_v36  ;;  %v1977_v60 = vor.u32 %v1976_v39, %v1975_v16  ;;  %v1981_v44 = vshll.u32 %v4436_v33, %v1966_v19  ;;  %v5634_v57 = vpop.f32.mrf.mxu0 }
 0x227   :  { %v1936_v15 = vsel %vm5533_vm1, %v5168_v59, %v1933_v24  ;;  %v5602_v48 = vsub.s32 %v1804_v61, %v1807_v2  ;;  %v1974_v14 = vor.u32 %v1973_v62, %v1972_v52  ;;  %v1980_v54 = vor.u32 %v1979_v7, %v1978_v63 }
 0x228   :  { %4315 = vcosq.f32 %v1936_v15  ;;  %v1982_v35 = vshrl.u32 %v4437_v40, %v1967_v37  ;;  %v5611_v6 = vand.u32 3, %v1941_v8  ;;  %v5613_v61 = vand.u32 3, %v1937_v26 }
 0x229   :  { %4317 = vsinq.f32 %v1936_v15  ;;  %v1810_v1 = vsub.s32 0, %v5602_v48  ;;  %v5618_v18 = vrot.slane %v5427_v34, %v3925_v5  ;;  %v1800_v3 = vadd.s32 %v5542_v11, %v5555_v10 }
 0x22a   :  { %v1983_v49 = vor.u32 %v1982_v35, %v1981_v44  ;;  %vm1987_vm12 = vcmp.lt.s32.totalorder %v1965_v53, 4  ;;  %v2000_v4 = vshll.u32 %v1960_v56, 8  ;;  %vm1746_vm13 = vcmp.lt.s32.totalorder %v5435_v17, 0 }
 0x22b   :  { %v4081_v47 = vmin.u32 %v1810_v1, %v5602_v48  ;;  %v1968_v58 = vshrl.u32 %v4432_v23, %v1967_v37  ;;  %vm1984_vm15 = vcmp.lt.s32.totalorder %v1965_v53, 1  ;;  %v1989_v26 = vsel %vm1987_vm12, %v1977_v60, 2102212464 }
 0x22c   :  { %vm1986_vm0 = vcmp.lt.s32.totalorder %v1965_v53, 3  ;;  %v1992_v43 = vsel %vm1984_vm15, %v1971_v25, %v1974_v14  ;;  %v1993_v13 = vsel %vm1987_vm12, %v1980_v54, 920167782  ;;  %v1996_v5 = vsel %vm1984_vm15, %v1974_v14, %v1977_v60 }
 0x22d   :  { %v1812_v19 = vclz %v4081_v47  ;;  %vm3496_vm1 = vcmp.eq.s32.totalorder %v5613_v61, 2  ;;  %vm1985_vm2 = vcmp.lt.s32.totalorder %v1965_v53, 2  ;;  %v1994_v45 = vsel %vm1986_vm0, %v1977_v60, %v1993_v13 }
 0x22e   :  { %v1997_v11 = vsel %vm1987_vm12, %v1983_v49, 1326507024  ;;  %vm3493_vm3 = vcmp.eq.s32.totalorder %v5613_v61, 0  ;;  %vm5629_vm4 = vcmp.le.f32.partialorder %v1744_v12, 0.7853982  ;;  %v1988_v37 = vsel %vm1984_vm15, %v1968_v58, %v1971_v25 }
 0x22f   :  { %v4082_v20 = vadd.s32 4294967294, %v1812_v19  ;;  %v1990_v51 = vsel %vm1986_vm0, %v1974_v14, %v1989_v26  ;;  %v1995_v0 = vsel %vm1985_vm2, %v1992_v43, %v1994_v45  ;;  %v1998_v9 = vsel %vm1986_vm0, %v1980_v54, %v1997_v11 }
 0x230   :  { %vm1943_vm6 = vcmp.lt.s32.totalorder %v5611_v6, 2  ;;  %vm3492_vm5 = vcmp.lt.s32.totalorder %v5613_v61, 2  ;;  %vm3985_vm7 = vcmp.eq.s32.totalorder %v5618_v18, 1  ;;  %v1999_v8 = vsel %vm1985_vm2, %v1996_v5, %v1998_v9 }
 0x231   :  { %vm4083_vm8 = vcmp.lt.s32.totalorder %v4082_v20, 0  ;;  %v5640_v12 = vmul.u32.u64.low %v2000_v4, %v1995_v0  ;;  %v5641_v2 = vmul.u32.u64.high %v2000_v4, %v1995_v0, %v5640_v12  ;;  %vm1940_vm9 = vweird.f32 %v5168_v59 }
 0x232   :  { %v1815_v28 = vsel %vm4083_vm8, 0, %v4082_v20  ;;  %v1830_v39 = vsub.s32 4, %v5590_v38  ;;  %v5646_v24 = vmul.u32.u64.low %v2000_v4, %v1999_v8  ;;  %v5647_v56 = vmul.u32.u64.high %v2000_v4, %v1999_v8, %v5646_v24 }
 0x233   :  { %v1816_v62 = vsub.s32 32, %v1815_v28  ;;  %v1820_v7 = vsub.s32 4294967266, %v1815_v28  ;;  %v1991_v15 = vsel %vm1985_vm2, %v1988_v37, %v1990_v51  ;;  %v2059_v36 = vand.u32 2139095040, %v5634_v57 }
 0x234   :  { %vm1944_vm10 = vcmp.eq.s32.totalorder %v5611_v6, 0  ;;  %vm1947_vm11 = vcmp.eq.s32.totalorder %v5611_v6, 2  ;;  %v1817_v16 = vshll.u32 %v5602_v48, %v1815_v28  ;;  %v2056_v52 = vand.u32 2147483647, %v5634_v57 }
 0x235   :  { %v4316_v63 = vpop.eup %4315  ;;  %v1818_v1 = vshrl.u32 %v1800_v3, %v1816_v62  ;;  %v1821_v25 = vadd.s32 127, %v1820_v7  ;;  %v2010_v60 = vadd.s32 1, %v5641_v2  ;;  %v2060_v14 = vshrl.u32 %v2059_v36, 23 }
 0x236   :  { %v4318_v54 = vpop.eup %4317  ;;  %v1948_v44 = vxor.u32 2147483648, %v4316_v63  ;;  %v1831_v53 = vsel %vm1746_vm13, %v1830_v39, %v5590_v38  ;;  %v2007_v35 = vmul.u32 %v2000_v4, %v1991_v15  ;;  %vm2009_vm14 = vc.u32 %v5647_v56, %v5640_v12 }
 0x237   :  { %v1945_v47 = vxor.u32 2147483648, %v4318_v54  ;;  %v1819_v48 = vor.u32 %v1818_v1, %v1817_v16  ;;  %v1822_v49 = vshll.u32 %v1821_v25, 23  ;;  %v2011_v19 = vsel %vm2009_vm14, %v2010_v60, %v5641_v2 }
 0x238   :  { %v1949_v3 = vsel %vm1947_vm11, %v1948_v44, %v4318_v54  ;;  %v3498_v58 = vsel %vm3496_vm1, %v1948_v44, %v4318_v54  ;;  %v2012_v26 = vadd.s32 %v2011_v19, %v2007_v35  ;;  %v4092_v43 = vadd.s32 4294967169, %v2060_v14 }
 0x239   :  { %v1946_v38 = vsel %vm1944_vm10, %v4316_v63, %v1945_v47  ;;  %v3495_v4 = vsel %vm3493_vm3, %v4316_v63, %v1945_v47  ;;  %v1823_v13 = vor.u32 4788187, %v1822_v49  ;;  %v1833_v5 = vsel %vm5629_vm4, 0, %v1831_v53 }
 0x23a   :  { %v1950_v20 = vsel %vm1943_vm6, %v1946_v38, %v1949_v3  ;;  %v3499_v45 = vsel %vm3492_vm5, %v3495_v4, %v3498_v58  ;;  %v2013_v11 = vadd.s32 536870912, %v2012_v26  ;;  %v2066_v37 = vadd.s32 1, %v4092_v43 }
 0x23b   :  { %v1951_v51 = vsel %vm1940_vm9, nan, %v1950_v20  ;;  %v3500_v0 = vsel %vm1940_vm9, nan, %v3499_v45  ;;  %v1824_v9 = vand.u32 2147483647, %v1823_v13  ;;  %v1826_v8 = vcvt.s32.f32 %v1819_v48 }
 0x23c   :  { %v4000_v2 = vsel %vm3985_vm7, %v1951_v51, %v3500_v0  ;;  %v5682_v28 = vshrl.u32 %v2013_v11, 30  ;;  %vm2067_vm12 = vcmp.gt.s32.totalorder %v2066_v37, 0  ;;  %v2063_v61 = vand.u32 8388607, %v2056_v52 }
 0x23d   :  { %4015 = vst [vmem:[#allocation8 + $0x50] sm:$0xff] %v4000_v2  ;;  %v1827_v6 = vmul.f32 %v1826_v8, %v1824_v9  ;;  %v2068_v39 = vsel %vm2067_vm12, %v2066_v37, 0  ;;  %v1837_v24 = vadd.s32 3, %v1833_v5  ;;  %v5694_v16 = vrot.slane %v5427_v34, %v3921_v50 }
 0x23e   :  { %v2015_v62 = vshll.u32 %v5682_v28, 30  ;;  %v2070_v7 = vand.u32 31, %v2068_v39  ;;  %v2064_v63 = vor.u32 8388608, %v2063_v61  ;;  %v5701_v60 = vand.u32 3, %v1833_v5 }
 0x23f   :  { %v1828_v59 = vxor.u32 2147483648, %v1827_v6  ;;  %v5699_v25 = vand.u32 3, %v1837_v24  ;;  %v2008_v54 = vadd.s32 %v5640_v12, %v5647_v56  ;;  %v2069_v35 = vshrl.u32 %v2068_v39, 5 }
 0x240   :  { %v5687_v15 = vsub.s32 %v2012_v26, %v2015_v62  ;;  %v2071_v36 = vsub.s32 32, %v2070_v7  ;;  %v2073_v10 = vshll.u32 %v4432_v23, %v2070_v7  ;;  %v2038_v47 = vsub.s32 4, %v5682_v28 }
 0x241   :  { %v1829_v18 = vsel %vm1746_vm13, %v1828_v59, %v1827_v6  ;;  %v2076_v48 = vshll.u32 %v4433_v27, %v2070_v7  ;;  %v5712_v49 = vshll.u32 %v2064_v63, 8  ;;  %v2267_v19 = vand.u32 2139095040, %v5204_v32 }
 0x242   :  { %v1832_v1 = vsel %vm5629_vm4, %v5435_v17, %v1829_v18  ;;  %v2018_v14 = vsub.s32 0, %v5687_v15  ;;  %v2074_v44 = vshrl.u32 %v4433_v27, %v2071_v36  ;;  %v2077_v50 = vshrl.u32 %v4434_v29, %v2071_v36 }
 0x243   :  { %4319 = vcosq.f32 %v1832_v1  ;;  %v2072_v12 = vshrl.u32 %v4432_v23, %v2071_v36  ;;  %v2079_v58 = vshll.u32 %v4434_v29, %v2070_v7  ;;  %v2080_v43 = vshrl.u32 %v4435_v31, %v2071_v36 }
 0x244   :  { %4321 = vsinq.f32 %v1832_v1  ;;  %v4089_v53 = vmin.u32 %v2018_v14, %v5687_v15  ;;  %v2075_v56 = vor.u32 %v2074_v44, %v2073_v10  ;;  %v2078_v26 = vor.u32 %v2077_v50, %v2076_v48 }
 0x245   :  { %v2082_v38 = vshll.u32 %v4435_v31, %v2070_v7  ;;  %v2083_v4 = vshrl.u32 %v4436_v33, %v2071_v36  ;;  %v2085_v5 = vshll.u32 %v4436_v33, %v2070_v7  ;;  %v2086_v20 = vshrl.u32 %v4437_v40, %v2071_v36 }
 0x246   :  { %v2020_v3 = vclz %v4089_v53  ;;  %vm2088_vm13 = vcmp.lt.s32.totalorder %v2069_v35, 1  ;;  %vm1954_vm15 = vcmp.lt.s32.totalorder %v5192_v41, 0  ;;  %v2081_v45 = vor.u32 %v2080_v43, %v2079_v58 }
 0x247   :  { %v2084_v11 = vor.u32 %v2083_v4, %v2082_v38  ;;  %vm2089_vm0 = vcmp.lt.s32.totalorder %v2069_v35, 2  ;;  %vm2090_vm1 = vcmp.lt.s32.totalorder %v2069_v35, 3  ;;  %vm3393_vm2 = vcmp.eq.s32.totalorder %v5701_v60, 2 }
 0x248   :  { %v4090_v13 = vadd.s32 4294967294, %v2020_v3  ;;  %v2087_v37 = vor.u32 %v2086_v20, %v2085_v5  ;;  %vm2091_vm4 = vcmp.lt.s32.totalorder %v2069_v35, 4  ;;  %v2092_v51 = vsel %vm2088_vm13, %v2072_v12, %v2075_v56 }
 0x249   :  { %vm1840_vm6 = vcmp.eq.s32.totalorder %v5699_v25, 0  ;;  %vm3390_vm5 = vcmp.eq.s32.totalorder %v5701_v60, 0  ;;  %v2093_v9 = vsel %vm2091_vm4, %v2081_v45, 2102212464  ;;  %v2096_v8 = vsel %vm2088_vm13, %v2075_v56, %v2078_v26 }
 0x24a   :  { %vm4091_vm3 = vcmp.lt.s32.totalorder %v4090_v13, 0  ;;  %v2097_v2 = vsel %vm2091_vm4, %v2084_v11, 920167782  ;;  %vm1839_vm7 = vcmp.lt.s32.totalorder %v5699_v25, 2  ;;  %vm3389_vm8 = vcmp.lt.s32.totalorder %v5701_v60, 2 }
 0x24b   :  { %v2023_v0 = vsel %vm4091_vm3, 0, %v4090_v13  ;;  %vm3984_vm9 = vcmp.eq.s32.totalorder %v5694_v16, 1  ;;  %v2094_v39 = vsel %vm2090_vm1, %v2078_v26, %v2093_v9  ;;  %v2100_v24 = vsel %vm2088_vm13, %v2078_v26, %v2081_v45 }
 0x24c   :  { %v2024_v6 = vsub.s32 32, %v2023_v0  ;;  %v2028_v61 = vsub.s32 4294967266, %v2023_v0  ;;  %vm1836_vm10 = vweird.f32 %v5435_v17  ;;  %v2025_v62 = vshll.u32 %v5687_v15, %v2023_v0 }
 0x24d   :  { %v2098_v7 = vsel %vm2090_vm1, %v2081_v45, %v2097_v2  ;;  %v2101_v59 = vsel %vm2091_vm4, %v2087_v37, 1326507024  ;;  %v2268_v36 = vshrl.u32 %v2267_v19, 23  ;;  %vm5741_vm11 = vcmp.le.f32.partialorder %v1952_v22, 0.7853982 }
 0x24e   :  { %v2026_v63 = vshrl.u32 %v2008_v54, %v2024_v6  ;;  %v2029_v1 = vadd.s32 127, %v2028_v61  ;;  %v2099_v14 = vsel %vm2089_vm0, %v2096_v8, %v2098_v7  ;;  %v2102_v44 = vsel %vm2090_vm1, %v2084_v11, %v2101_v59 }
 0x24f   :  { %v2095_v50 = vsel %vm2089_vm0, %v2092_v51, %v2094_v39  ;;  %v2103_v15 = vsel %vm2089_vm0, %v2100_v24, %v2102_v44  ;;  %v5750_v53 = vmul.u32.u64.low %v5712_v49, %v2099_v14  ;;  %v5751_v10 = vmul.u32.u64.high %v5712_v49, %v2099_v14, %v5750_v53 }
 0x250   :  { %v4320_v48 = vpop.eup %4319  ;;  %v2027_v22 = vor.u32 %v2026_v63, %v2025_v62  ;;  %v2030_v19 = vshll.u32 %v2029_v1, 23  ;;  %v5755_v3 = vmul.u32.u64.low %v5712_v49, %v2103_v15  ;;  %v5756_v54 = vmul.u32.u64.high %v5712_v49, %v2103_v15, %v5755_v3 }
 0x251   :  { %v4322_v12 = vpop.eup %4321  ;;  %vm1843_vm14 = vcmp.eq.s32.totalorder %v5699_v25, 2  ;;  %v1844_v56 = vxor.u32 2147483648, %v4320_v48  ;;  %v2264_v58 = vand.u32 2147483647, %v5204_v32  ;;  %v4100_v35 = vadd.s32 4294967169, %v2268_v36 }
 0x252   :  { %v1841_v26 = vxor.u32 2147483648, %v4322_v12  ;;  %v2031_v43 = vor.u32 4788187, %v2030_v19  ;;  %v2039_v38 = vsel %vm1954_vm15, %v2038_v47, %v5682_v28  ;;  %v2111_v4 = vmul.u32 %v5712_v49, %v2095_v50 }
 0x253   :  { %v1845_v13 = vsel %vm1843_vm14, %v1844_v56, %v4322_v12  ;;  %v3395_v5 = vsel %vm3393_vm2, %v1844_v56, %v4322_v12  ;;  %v2114_v20 = vadd.s32 1, %v5751_v10  ;;  %v2274_v45 = vadd.s32 1, %v4100_v35 }
 0x254   :  { %v1842_v11 = vsel %vm1840_vm6, %v4320_v48, %v1841_v26  ;;  %v3392_v37 = vsel %vm3390_vm5, %v4320_v48, %v1841_v26  ;;  %v2032_v51 = vand.u32 2147483647, %v2031_v43  ;;  %v2034_v0 = vcvt.s32.f32 %v2027_v22 }
 0x255   :  { %v1846_v28 = vsel %vm1839_vm7, %v1842_v11, %v1845_v13  ;;  %v3396_v47 = vsel %vm3389_vm8, %v3392_v37, %v3395_v5  ;;  %vm2113_vm12 = vc.u32 %v5756_v54, %v5750_v53  ;;  %vm2275_vm13 = vcmp.gt.s32.totalorder %v2274_v45, 0 }
 0x256   :  { %v1847_v49 = vsel %vm1836_vm10, nan, %v1846_v28  ;;  %v3397_v9 = vsel %vm1836_vm10, nan, %v3396_v47  ;;  %v2035_v8 = vmul.f32 %v2034_v0, %v2032_v51  ;;  %v2115_v2 = vsel %vm2113_vm12, %v2114_v20, %v5751_v10  ;;  %v5814_v20 = vpop.f32.mrf.mxu0 }
 0x257   :  { %v3999_v25 = vsel %vm3984_vm9, %v1847_v49, %v3397_v9  ;;  %v2041_v60 = vsel %vm5741_vm11, 0, %v2039_v38  ;;  %v2116_v6 = vadd.s32 %v2115_v2, %v2111_v4  ;;  %v2276_v61 = vsel %vm2275_vm13, %v2274_v45, 0 }
 0x258   :  { %4014 = vst [vmem:[#allocation8 + $0x48] sm:$0xff] %v3999_v25  ;;  %v2036_v39 = vxor.u32 2147483648, %v2035_v8  ;;  %v2278_v24 = vand.u32 31, %v2276_v61  ;;  %v2271_v7 = vand.u32 8388607, %v2264_v58  ;;  %v2045_v59 = vadd.s32 3, %v2041_v60 }
 0x259   :  { %v2117_v62 = vadd.s32 536870912, %v2116_v6  ;;  %v5807_v19 = vand.u32 3, %v2041_v60  ;;  %v2277_v26 = vshrl.u32 %v2276_v61, 5  ;;  %v5819_v45 = vrot.slane %v5427_v34, %v3929_v46 }
 0x25a   :  { %v2037_v17 = vsel %vm1954_vm15, %v2036_v39, %v2035_v8  ;;  %v2279_v36 = vsub.s32 32, %v2278_v24  ;;  %v2281_v16 = vshll.u32 %v4432_v23, %v2278_v24  ;;  %v2284_v14 = vshll.u32 %v4433_v27, %v2278_v24 }
 0x25b   :  { %v2040_v63 = vsel %vm5741_vm11, %v5192_v41, %v2037_v17  ;;  %v5796_v1 = vshrl.u32 %v2117_v62, 30  ;;  %v2287_v44 = vshll.u32 %v4434_v29, %v2278_v24  ;;  %v2290_v10 = vshll.u32 %v4435_v31, %v2278_v24 }
 0x25c   :  { %4323 = vcosq.f32 %v2040_v63  ;;  %v2282_v50 = vshrl.u32 %v4433_v27, %v2279_v36  ;;  %v2285_v15 = vshrl.u32 %v4434_v29, %v2279_v36  ;;  %v2288_v22 = vshrl.u32 %v4435_v31, %v2279_v36 }
 0x25d   :  { %4325 = vsinq.f32 %v2040_v63  ;;  %v2119_v48 = vshll.u32 %v5796_v1, 30  ;;  %v5805_v18 = vand.u32 3, %v2045_v59  ;;  %v2291_v3 = vshrl.u32 %v4436_v33, %v2279_v36 }
 0x25e   :  { %v2293_v12 = vshll.u32 %v4436_v33, %v2278_v24  ;;  %v2272_v35 = vor.u32 8388608, %v2271_v7  ;;  %v2294_v43 = vshrl.u32 %v4437_v40, %v2279_v36  ;;  %v2283_v38 = vor.u32 %v2282_v50, %v2281_v16 }
 0x25f   :  { %v5811_v56 = vsub.s32 %v2116_v6, %v2119_v48  ;;  %v2286_v4 = vor.u32 %v2285_v15, %v2284_v14  ;;  %v2289_v13 = vor.u32 %v2288_v22, %v2287_v44  ;;  %v2292_v5 = vor.u32 %v2291_v3, %v2290_v10 }
 0x260   :  { %v2280_v37 = vshrl.u32 %v4432_v23, %v2279_v36  ;;  %v2295_v51 = vor.u32 %v2294_v43, %v2293_v12  ;;  %vm3599_vm15 = vcmp.eq.s32.totalorder %v5807_v19, 2  ;;  %vm2296_vm0 = vcmp.lt.s32.totalorder %v2277_v26, 1 }
 0x261   :  { %v2122_v11 = vsub.s32 0, %v5811_v56  ;;  %vm2299_vm1 = vcmp.lt.s32.totalorder %v2277_v26, 4  ;;  %v2163_v28 = vand.u32 2139095040, %v5814_v20  ;;  %vm2048_vm2 = vcmp.eq.s32.totalorder %v5805_v18, 0 }
 0x262   :  { %vm3596_vm3 = vcmp.eq.s32.totalorder %v5807_v19, 0  ;;  %v2301_v46 = vsel %vm2299_vm1, %v2289_v13, 2102212464  ;;  %v2304_v47 = vsel %vm2296_vm0, %v2283_v38, %v2286_v4  ;;  %v2305_v49 = vsel %vm2299_vm1, %v2292_v5, 920167782 }
 0x263   :  { %v4093_v0 = vmin.u32 %v2122_v11, %v5811_v56  ;;  %v2312_v9 = vshll.u32 %v2272_v35, 8  ;;  %vm2047_vm4 = vcmp.lt.s32.totalorder %v5805_v18, 2  ;;  %vm3595_vm6 = vcmp.lt.s32.totalorder %v5807_v19, 2 }
 0x264   :  { %vm3986_vm5 = vcmp.eq.s32.totalorder %v5819_v45, 1  ;;  %vm2297_vm7 = vcmp.lt.s32.totalorder %v2277_v26, 2  ;;  %vm2298_vm8 = vcmp.lt.s32.totalorder %v2277_v26, 3  ;;  %v2308_v2 = vsel %vm2296_vm0, %v2286_v4, %v2289_v13 }
 0x265   :  { %v2124_v8 = vclz %v4093_v0  ;;  %vm2044_vm9 = vweird.f32 %v5192_v41  ;;  %v2300_v25 = vsel %vm2296_vm0, %v2280_v37, %v2283_v38  ;;  %v2302_v60 = vsel %vm2298_vm8, %v2286_v4, %v2301_v46 }
 0x266   :  { %v2306_v6 = vsel %vm2298_vm8, %v2289_v13, %v2305_v49  ;;  %v2309_v61 = vsel %vm2299_vm1, %v2295_v51, 1326507024  ;;  %v2164_v7 = vshrl.u32 %v2163_v28, 23  ;;  %vm2051_vm10 = vcmp.eq.s32.totalorder %v5805_v18, 2 }
 0x267   :  { %v4094_v39 = vadd.s32 4294967294, %v2124_v8  ;;  %v2307_v24 = vsel %vm2297_vm7, %v2304_v47, %v2306_v6  ;;  %v2310_v62 = vsel %vm2298_vm8, %v2292_v5, %v2309_v61  ;;  %v2112_v63 = vadd.s32 %v5750_v53, %v5756_v54 }
 0x268   :  { %v2311_v17 = vsel %vm2297_vm7, %v2308_v2, %v2310_v62  ;;  %v5841_v59 = vmul.u32.u64.low %v2312_v9, %v2307_v24  ;;  %v5842_v36 = vmul.u32.u64.high %v2312_v9, %v2307_v24, %v5841_v59  ;;  %v2142_v48 = vsub.s32 4, %v5796_v1 }
 0x269   :  { %v4324_v16 = vpop.eup %4323  ;;  %vm4095_vm11 = vcmp.lt.s32.totalorder %v4094_v39, 0  ;;  %v5847_v14 = vmul.u32.u64.low %v2312_v9, %v2311_v17  ;;  %v5848_v44 = vmul.u32.u64.high %v2312_v9, %v2311_v17, %v5847_v14  ;;  %v2303_v22 = vsel %vm2297_vm7, %v2300_v25, %v2302_v60 }
 0x26a   :  { %v4326_v50 = vpop.eup %4325  ;;  %v2052_v15 = vxor.u32 2147483648, %v4324_v16  ;;  %v2127_v10 = vsel %vm4095_vm11, 0, %v4094_v39  ;;  %v4096_v43 = vadd.s32 4294967169, %v2164_v7  ;;  %v2322_v4 = vadd.s32 1, %v5842_v36 }
 0x26b   :  { %v2049_v3 = vxor.u32 2147483648, %v4326_v50  ;;  %v2128_v12 = vsub.s32 32, %v2127_v10  ;;  %v2132_v35 = vsub.s32 4294967266, %v2127_v10  ;;  %v2129_v54 = vshll.u32 %v5811_v56, %v2127_v10 }
 0x26c   :  { %v2053_v38 = vsel %vm2051_vm10, %v2052_v15, %v4326_v50  ;;  %v3601_v53 = vsel %vm3599_vm15, %v2052_v15, %v4326_v50  ;;  %v2319_v0 = vmul.u32 %v2312_v9, %v2303_v22  ;;  %vm2321_vm14 = vc.u32 %v5848_v44, %v5841_v59 }
 0x26d   :  { %v2050_v13 = vsel %vm2048_vm2, %v4324_v16, %v2049_v3  ;;  %v3598_v26 = vsel %vm3596_vm3, %v4324_v16, %v2049_v3  ;;  %v2130_v5 = vshrl.u32 %v2112_v63, %v2128_v12  ;;  %v2133_v11 = vadd.s32 127, %v2132_v35 }
 0x26e   :  { %v2054_v37 = vsel %vm2047_vm4, %v2050_v13, %v2053_v38  ;;  %v3602_v51 = vsel %vm3595_vm6, %v3598_v26, %v3601_v53  ;;  %v2323_v18 = vsel %vm2321_vm14, %v2322_v4, %v5842_v36  ;;  %v2170_v8 = vadd.s32 1, %v4096_v43 }
 0x26f   :  { %v2055_v56 = vsel %vm2044_vm9, nan, %v2054_v37  ;;  %v3603_v28 = vsel %vm2044_vm9, nan, %v3602_v51  ;;  %v2131_v46 = vor.u32 %v2130_v5, %v2129_v54  ;;  %v2134_v47 = vshll.u32 %v2133_v11, 23 }
 0x270   :  { %v4001_v49 = vsel %vm3986_vm5, %v2055_v56, %v3603_v28  ;;  %vm2058_vm12 = vcmp.lt.s32.totalorder %v5634_v57, 0  ;;  %v2324_v9 = vadd.s32 %v2323_v18, %v2319_v0  ;;  %v2160_v41 = vand.u32 2147483647, %v5814_v20 }
 0x271   :  { %4016 = vst [vmem:[#allocation8 + $0x58] sm:$0xff] %v4001_v49  ;;  %v2135_v19 = vor.u32 4788187, %v2134_v47  ;;  %v2143_v2 = vsel %vm2058_vm12, %v2142_v48, %v5796_v1  ;;  %vm2171_vm13 = vcmp.gt.s32.totalorder %v2170_v8, 0  ;;  %v2138_v60 = vcvt.s32.f32 %v2131_v46 }
 0x272   :  { %v2325_v6 = vadd.s32 536870912, %v2324_v9  ;;  %v2172_v45 = vsel %vm2171_vm13, %v2170_v8, 0  ;;  %vm2057_vm15 = vcmp.le.f32.partialorder %v2056_v52, 0.7853982  ;;  %v2167_v7 = vand.u32 8388607, %v2160_v41 }
 0x273   :  { %v2136_v25 = vand.u32 2147483647, %v2135_v19  ;;  %v2174_v61 = vand.u32 31, %v2172_v45  ;;  %v2145_v24 = vsel %vm2057_vm15, 0, %v2143_v2  ;;  %v5903_v38 = vrot.slane %v5427_v34, %v3933_v55 }
 0x274   :  { %v5882_v62 = vshrl.u32 %v2325_v6, 30  ;;  %v2149_v16 = vadd.s32 3, %v2145_v24  ;;  %v2168_v48 = vor.u32 8388608, %v2167_v7  ;;  %v2173_v53 = vshrl.u32 %v2172_v45, 5 }
 0x275   :  { %v2139_v39 = vmul.f32 %v2138_v60, %v2136_v25  ;;  %v2175_v17 = vsub.s32 32, %v2174_v61  ;;  %v2177_v22 = vshll.u32 %v4432_v23, %v2174_v61  ;;  %v2180_v35 = vshll.u32 %v4433_v27, %v2174_v61 }
 0x276   :  { %v2327_v36 = vshll.u32 %v5882_v62, 30  ;;  %v2186_v43 = vshll.u32 %v4435_v31, %v2174_v61  ;;  %v2183_v54 = vshll.u32 %v4434_v29, %v2174_v61  ;;  %v5907_v11 = vand.u32 3, %v2145_v24 }
 0x277   :  { %v2140_v1 = vxor.u32 2147483648, %v2139_v39  ;;  %v2178_v63 = vshrl.u32 %v4433_v27, %v2175_v17  ;;  %v2181_v52 = vshrl.u32 %v4434_v29, %v2175_v17  ;;  %v2187_v15 = vshrl.u32 %v4436_v33, %v2175_v17 }
 0x278   :  { %v5890_v50 = vsub.s32 %v2324_v9, %v2327_v36  ;;  %v2184_v3 = vshrl.u32 %v4435_v31, %v2175_v17  ;;  %v2189_v27 = vshll.u32 %v4436_v33, %v2174_v61  ;;  %v2190_v31 = vshrl.u32 %v4437_v40, %v2175_v17 }
 0x279   :  { %v2141_v14 = vsel %vm2058_vm12, %v2140_v1, %v2139_v39  ;;  %v2179_v13 = vor.u32 %v2178_v63, %v2177_v22  ;;  %v2182_v26 = vor.u32 %v2181_v52, %v2180_v35  ;;  %v2188_v5 = vor.u32 %v2187_v15, %v2186_v43 }
 0x27a   :  { %v2144_v10 = vsel %vm2057_vm15, %v5634_v57, %v2141_v14  ;;  %v2330_v12 = vsub.s32 0, %v5890_v50  ;;  %v2185_v37 = vor.u32 %v2184_v3, %v2183_v54  ;;  %v2150_v51 = vand.u32 3, %v2149_v16 }
 0x27b   :  { %4327 = vcosq.f32 %v2144_v10  ;;  %v2320_v55 = vadd.s32 %v5841_v59, %v5848_v44  ;;  %v2208_v56 = vshll.u32 %v2168_v48, 8  ;;  %v2191_v28 = vor.u32 %v2190_v31, %v2189_v27 }
 0x27c   :  { %4329 = vsinq.f32 %v2144_v10  ;;  %v4101_v4 = vmin.u32 %v2330_v12, %v5890_v50  ;;  %vm2192_vm0 = vcmp.lt.s32.totalorder %v2173_v53, 1  ;;  %vm2193_vm1 = vcmp.lt.s32.totalorder %v2173_v53, 2 }
 0x27d   :  { %vm2195_vm2 = vcmp.lt.s32.totalorder %v2173_v53, 4  ;;  %vm2194_vm3 = vcmp.lt.s32.totalorder %v2173_v53, 3  ;;  %v2200_v46 = vsel %vm2192_vm0, %v2179_v13, %v2182_v26  ;;  %v2204_v40 = vsel %vm2192_vm0, %v2182_v26, %v2185_v37 }
 0x27e   :  { %v2332_v0 = vclz %v4101_v4  ;;  %v2201_v47 = vsel %vm2195_vm2, %v2188_v5, 920167782  ;;  %v2197_v49 = vsel %vm2195_vm2, %v2185_v37, 2102212464  ;;  %v2205_v18 = vsel %vm2195_vm2, %v2191_v28, 1326507024 }
 0x27f   :  { %v2202_v33 = vsel %vm2194_vm3, %v2185_v37, %v2201_v47  ;;  %v2176_v59 = vshrl.u32 %v4432_v23, %v2175_v17  ;;  %v2206_v8 = vsel %vm2194_vm3, %v2188_v5, %v2205_v18  ;;  %v2198_v61 = vsel %vm2194_vm3, %v2182_v26, %v2197_v49 }
 0x280   :  { %v4102_v29 = vadd.s32 4294967294, %v2332_v0  ;;  %v2203_v44 = vsel %vm2193_vm1, %v2200_v46, %v2202_v33  ;;  %v2207_v9 = vsel %vm2193_vm1, %v2204_v40, %v2206_v8  ;;  %vm2148_vm6 = vweird.f32 %v5634_v57 }
 0x281   :  { %v5920_v2 = vmul.u32.u64.low %v2208_v56, %v2203_v44  ;;  %v5921_v25 = vmul.u32.u64.high %v2208_v56, %v2203_v44, %v5920_v2  ;;  %v2196_v45 = vsel %vm2192_vm0, %v2176_v59, %v2179_v13  ;;  %vm3987_vm5 = vcmp.eq.s32.totalorder %v5903_v38, 1 }
 0x282   :  { %vm4103_vm4 = vcmp.lt.s32.totalorder %v4102_v29, 0  ;;  %v5928_v23 = vmul.u32.u64.low %v2208_v56, %v2207_v9  ;;  %v5929_v39 = vmul.u32.u64.high %v2208_v56, %v2207_v9, %v5928_v23  ;;  %vm3698_vm7 = vcmp.lt.s32.totalorder %v5907_v11, 2 }
 0x283   :  { %v2335_v19 = vsel %vm4103_vm4, 0, %v4102_v29  ;;  %vm3699_vm8 = vcmp.eq.s32.totalorder %v5907_v11, 0  ;;  %vm3702_vm9 = vcmp.eq.s32.totalorder %v5907_v11, 2  ;;  %v2199_v36 = vsel %vm2193_vm1, %v2196_v45, %v2198_v61 }
 0x284   :  { %v2336_v60 = vsub.s32 32, %v2335_v19  ;;  %v2340_v6 = vsub.s32 4294967266, %v2335_v19  ;;  %v2337_v24 = vshll.u32 %v5890_v50, %v2335_v19  ;;  %v2218_v16 = vadd.s32 1, %v5921_v25 }
 0x285   :  { %vm2151_vm10 = vcmp.lt.s32.totalorder %v2150_v51, 2  ;;  %vm2152_vm11 = vcmp.eq.s32.totalorder %v2150_v51, 0  ;;  %vm2155_vm14 = vcmp.eq.s32.totalorder %v2150_v51, 2  ;;  %vm2217_vm12 = vc.u32 %v5929_v39, %v5920_v2 }
 0x286   :  { %v2338_v7 = vshrl.u32 %v2320_v55, %v2336_v60  ;;  %v2341_v17 = vadd.s32 127, %v2340_v6  ;;  %v2215_v3 = vmul.u32 %v2208_v56, %v2199_v36  ;;  %v2219_v53 = vsel %vm2217_vm12, %v2218_v16, %v5921_v25 }
 0x287   :  { %vm2266_vm13 = vcmp.lt.s32.totalorder %v5204_v32, 0  ;;  %v2350_v11 = vsub.s32 4, %v5882_v62  ;;  %vm2265_vm15 = vcmp.le.f32.partialorder %v2264_v58, 0.7853982  ;;  %v3974_v58 = vrot.slane %v5427_v34, %v3941_v42 }
 0x288   :  { %v4328_v1 = vpop.eup %4327  ;;  %v2339_v52 = vor.u32 %v2338_v7, %v2337_v24  ;;  %v2342_v15 = vshll.u32 %v2341_v17, 23  ;;  %v2220_v26 = vadd.s32 %v2219_v53, %v2215_v3  ;;  %v2216_v19 = vadd.s32 %v5920_v2, %v5929_v39 }
 0x289   :  { %v4330_v63 = vpop.eup %4329  ;;  %v2156_v14 = vxor.u32 2147483648, %v4328_v1  ;;  %v2351_v29 = vsel %vm2266_vm13, %v2350_v11, %v5882_v62  ;;  %vm3989_vm2 = vcmp.eq.s32.totalorder %v3974_v58, 1 }
 0x28a   :  { %v2153_v10 = vxor.u32 2147483648, %v4330_v63  ;;  %v2343_v22 = vor.u32 4788187, %v2342_v15  ;;  %v2346_v43 = vcvt.s32.f32 %v2339_v52  ;;  %v2221_v55 = vadd.s32 536870912, %v2220_v26 }
 0x28b   :  { %v2157_v50 = vsel %vm2155_vm14, %v2156_v14, %v4330_v63  ;;  %v3704_v48 = vsel %vm3702_vm9, %v2156_v14, %v4330_v63  ;;  %v2353_v47 = vsel %vm2265_vm15, 0, %v2351_v29  ;;  %vm2162_vm9 = vcmp.lt.s32.totalorder %v5814_v20, 0 }
 0x28c   :  { %v2154_v12 = vsel %vm2152_vm11, %v4328_v1, %v2153_v10  ;;  %v3701_v35 = vsel %vm3699_vm8, %v4328_v1, %v2153_v10  ;;  %v2344_v13 = vand.u32 2147483647, %v2343_v22  ;;  %v5951_v51 = vshrl.u32 %v2221_v55, 30 }
 0x28d   :  { %v2158_v54 = vsel %vm2151_vm10, %v2154_v12, %v2157_v50  ;;  %v3705_v4 = vsel %vm3698_vm7, %v3701_v35, %v3704_v48  ;;  %v2357_v40 = vadd.s32 3, %v2353_v47  ;;  %v3903_v59 = vand.u32 3, %v2353_v47 }
 0x28e   :  { %v2159_v5 = vsel %vm2148_vm6, nan, %v2158_v54  ;;  %v3706_v37 = vsel %vm2148_vm6, nan, %v3705_v4  ;;  %v2347_v31 = vmul.f32 %v2346_v43, %v2344_v13  ;;  %v2223_v57 = vshll.u32 %v5951_v51, 30 }
 0x28f   :  { %v4002_v27 = vsel %vm3987_vm5, %v2159_v5, %v3706_v37  ;;  %v2358_v44 = vand.u32 3, %v2357_v40  ;;  %vm3905_vm1 = vcmp.eq.s32.totalorder %v3903_v59, 0  ;;  %vm3908_vm6 = vcmp.eq.s32.totalorder %v3903_v59, 2 }
 0x290   :  { %4017 = vst [vmem:[#allocation8 + $0x60] sm:$0xff] %v4002_v27  ;;  %v2348_v0 = vxor.u32 2147483648, %v2347_v31  ;;  %v2224_v38 = vsub.s32 %v2220_v26, %v2223_v57  ;;  %vm3904_vm7 = vcmp.lt.s32.totalorder %v3903_v59, 2  ;;  %vm2356_vm8 = vweird.f32 %v5204_v32 }
 0x291   :  { %vm2360_vm3 = vcmp.eq.s32.totalorder %v2358_v44, 0  ;;  %vm2363_vm4 = vcmp.eq.s32.totalorder %v2358_v44, 2  ;;  %vm2359_vm5 = vcmp.lt.s32.totalorder %v2358_v44, 2  ;;  %v2246_v3 = vsub.s32 4, %v5951_v51 }
 0x292   :  { %v2349_v56 = vsel %vm2266_vm13, %v2348_v0, %v2347_v31  ;;  %v2226_v46 = vsub.s32 0, %v2224_v38  ;;  %vm2161_vm10 = vcmp.le.f32.partialorder %v2160_v41, 0.7853982  ;;  %v3970_v13 = vrot.slane %v5427_v34, %v3937_v30 }
 0x293   :  { %v2352_v28 = vsel %vm2265_vm15, %v5204_v32, %v2349_v56  ;;  %v2247_v35 = vsel %vm2162_vm9, %v2246_v3, %v5951_v51 }
 0x294   :  { %4331 = vcosq.f32 %v2352_v28  ;;  %v4097_v49 = vmin.u32 %v2226_v46, %v2224_v38  ;;  %v2249_v43 = vsel %vm2161_vm10, 0, %v2247_v35  ;;  %vm3988_vm12 = vcmp.eq.s32.totalorder %v3970_v13, 1 }
 0x295   :  { %4333 = vsinq.f32 %v2352_v28  ;;  %v2253_v53 = vadd.s32 3, %v2249_v43  ;;  %v3800_v4 = vand.u32 3, %v2249_v43 }
 0x296   :  { %v2228_v33 = vclz %v4097_v49 }
 0x297   :  { %v2254_v54 = vand.u32 3, %v2253_v53  ;;  %vm3805_vm14 = vcmp.eq.s32.totalorder %v3800_v4, 2  ;;  %vm3802_vm15 = vcmp.eq.s32.totalorder %v3800_v4, 0 }
 0x298   :  { %v4098_v18 = vadd.s32 4294967294, %v2228_v33 }
 0x299   :  { %vm2259_vm11 = vcmp.eq.s32.totalorder %v2254_v54, 2  ;;  %vm2256_vm13 = vcmp.eq.s32.totalorder %v2254_v54, 0 }
 0x29a   :  { %vm4099_vm0 = vcmp.lt.s32.totalorder %v4098_v18, 0 }
 0x29b   :  { %v2231_v8 = vsel %vm4099_vm0, 0, %v4098_v18  ;;  %vm2255_vm0 = vcmp.lt.s32.totalorder %v2254_v54, 2 }
 0x29c   :  { %v2232_v9 = vsub.s32 32, %v2231_v8  ;;  %v2236_v62 = vsub.s32 4294967266, %v2231_v8  ;;  %v2233_v45 = vshll.u32 %v2224_v38, %v2231_v8 }
 0x29e   :  { %v2234_v61 = vshrl.u32 %v2216_v19, %v2232_v9  ;;  %v2237_v23 = vadd.s32 127, %v2236_v62 }
 0x2a0   :  { %v2235_v17 = vor.u32 %v2234_v61, %v2233_v45  ;;  %v2238_v1 = vshll.u32 %v2237_v23, 23 }
 0x2a1   :  { %v4332_v25 = vpop.eup %4331 }
 0x2a2   :  { %v4334_v60 = vpop.eup %4333  ;;  %v2364_v6 = vxor.u32 2147483648, %v4332_v25  ;;  %v2239_v63 = vor.u32 4788187, %v2238_v1  ;;  %v2242_v50 = vcvt.s32.f32 %v2235_v17 }
 0x2a3   :  { %v2361_v24 = vxor.u32 2147483648, %v4334_v60 }
 0x2a4   :  { %v2365_v42 = vsel %vm2363_vm4, %v2364_v6, %v4334_v60  ;;  %v3910_v7 = vsel %vm3908_vm6, %v2364_v6, %v4334_v60  ;;  %v2240_v10 = vand.u32 2147483647, %v2239_v63 }
 0x2a5   :  { %v2362_v2 = vsel %vm2360_vm3, %v4332_v25, %v2361_v24  ;;  %v3907_v39 = vsel %vm3905_vm1, %v4332_v25, %v2361_v24  ;;  %vm3801_vm1 = vcmp.lt.s32.totalorder %v3800_v4, 2 }
 0x2a6   :  { %v2366_v36 = vsel %vm2359_vm5, %v2362_v2, %v2365_v42  ;;  %v3911_v16 = vsel %vm3904_vm7, %v3907_v39, %v3910_v7  ;;  %v2243_v48 = vmul.f32 %v2242_v50, %v2240_v10 }
 0x2a7   :  { %v2367_v14 = vsel %vm2356_vm8, nan, %v2366_v36  ;;  %v3912_v52 = vsel %vm2356_vm8, nan, %v3911_v16 }
 0x2a8   :  { %v4004_v15 = vsel %vm3989_vm2, %v2367_v14, %v3912_v52  ;;  %v2244_v22 = vxor.u32 2147483648, %v2243_v48  ;;  %vm2252_vm2 = vweird.f32 %v5814_v20 }
 0x2a9   :  { %4019 = vst [vmem:[#allocation8 + $0x70] sm:$0xff] %v4004_v15 }
 0x2aa   :  { %v2245_v32 = vsel %vm2162_vm9, %v2244_v22, %v2243_v48 }
 0x2ab   :  { %v2248_v12 = vsel %vm2161_vm10, %v5814_v20, %v2245_v32 }
 0x2ac   :  { %4335 = vcosq.f32 %v2248_v12 }
 0x2ad   :  { %4337 = vsinq.f32 %v2248_v12 }
 0x2b9   :  { %v4336_v26 = vpop.eup %4335 }
 0x2ba   :  { %v4338_v5 = vpop.eup %4337  ;;  %v2260_v37 = vxor.u32 2147483648, %v4336_v26 }
 0x2bb   :  { %v2257_v27 = vxor.u32 2147483648, %v4338_v5 }
 0x2bc   :  { %v2261_v41 = vsel %vm2259_vm11, %v2260_v37, %v4338_v5  ;;  %v3807_v31 = vsel %vm3805_vm14, %v2260_v37, %v4338_v5 }
 0x2bd   :  { %v2258_v55 = vsel %vm2256_vm13, %v4336_v26, %v2257_v27  ;;  %v3804_v0 = vsel %vm3802_vm15, %v4336_v26, %v2257_v27 }
 0x2be   :  { %v2262_v21 = vsel %vm2255_vm0, %v2258_v55, %v2261_v41  ;;  %v3808_v30 = vsel %vm3801_vm1, %v3804_v0, %v3807_v31 }
 0x2bf   :  { %v2263_v34 = vsel %vm2252_vm2, nan, %v2262_v21  ;;  %v3809_v51 = vsel %vm2252_vm2, nan, %v3808_v30 }
 0x2c0   :  { %v4003_v11 = vsel %vm3988_vm12, %v2263_v34, %v3809_v51 }
 0x2c1   :  { %4018 = vst [vmem:[#allocation8 + $0x68] sm:$0xff] %v4003_v11 }
 0x2c2   :  { %4410 = shalt.err (!%p4407_p5)
}
 0x2c3   :  { %4029 = dma.vmem_to_hbm [thread:$0]  %s4027_s2, 1920, %s5985_s3, [#allocation4]  }
 0x2c4   :  { %4423 = dma.done.wait [#allocation4], 1920  }
 0x2c5   :  { %4424 = vsyncadd [#allocation4], 4294965376 }
 0x2c6   :  { %4033 = vsyncpa [#allocation3], 1 }
 0x2c7   :  { %4034 = vsyncpa [#allocation6], 1 }
 0x2c8   :  { %4035 = vsyncpa [#allocation4], 1 }

</bundles_post_ra>
